<compile_context>
chip_gen: v7x
topology: tpu7x:2x2x1
jax: 0.10.0
libtpu: 0.0.40
codegen_flags: <defaults>
</compile_context>

<pallas_src>
import functools

import jax
import jax.numpy as jnp
from jax import lax
from jax.experimental import pallas as pl
from jax.experimental.pallas import tpu as pltpu


def _round_up(x, m):
    return ((x + m - 1) // m) * m


def _make_predictor_kernel(*, T, H, Tc, Bb, H_pad, mask_time):
    """Builds the kernel closure over the static shape parameters."""
    Hp = H_pad

    def gates_split(g):
        return (jax.nn.sigmoid(g[:, 0 * Hp:1 * Hp]),   # i
                jax.nn.sigmoid(g[:, 1 * Hp:2 * Hp]),   # f
                jnp.tanh(g[:, 2 * Hp:3 * Hp]),         # g
                jax.nn.sigmoid(g[:, 3 * Hp:4 * Hp]))   # o

    def kernel(x_ref,       # (Tc*Bb, E_pad)     bf16  time-major chunk
               wih0_ref,    # (E_pad, 4*H_pad)   bf16  (single-buffered VMEM)
               whh0_ref,    # (H_pad, 4*H_pad)   bf16
               b0_ref,      # (1, 4*H_pad)       f32
               wih1_ref,    # (H_pad, 4*H_pad)   bf16
               whh1_ref,    # (H_pad, 4*H_pad)   bf16
               b1_ref,      # (1, 4*H_pad)       f32
               gamma_ref,   # (1, H_pad)         f32
               beta_ref,    # (1, H_pad)         f32
               out_ref,     # (Tc*Bb, H_pad)     bf16  time-major chunk
               h_ref,       # (2, Bb, H_pad)     f32   resident carry -> h_n
               c_ref,       # (2, Bb, H_pad)     f32   resident carry -> c_n
               z0_ref,      # (Tc*Bb, 4*H_pad)   f32   scratch (hoisted proj)
               y_ref):      # (Tc*Bb, H_pad)     f32   scratch (chunk outputs)
        chunk = pl.program_id(1)

        @pl.when(chunk == 0)
        def _init():
            h_ref[...] = jnp.zeros_like(h_ref)
            c_ref[...] = jnp.zeros_like(c_ref)

        # Hoisted layer-0 input projection for the whole chunk: one big MXU
        # matmul (Tc*Bb rows) instead of Tc tiny matmuls on the serial path.
        z0_ref[...] = jnp.dot(x_ref[...], wih0_ref[...],
                              preferred_element_type=jnp.float32) + b0_ref[...]

        # Hoist broadcasts once per chunk (JAX does not CSE broadcast_in_dim).
        b1_b = jnp.broadcast_to(b1_ref[...], (Bb, 4 * Hp))
        gamma_b = jnp.broadcast_to(gamma_ref[...], (Bb, Hp))
        beta_b = jnp.broadcast_to(beta_ref[...], (Bb, Hp))
        inv_h = 1.0 / float(H)
        if H != Hp:
            ln_mask = jnp.broadcast_to(
                (lax.broadcasted_iota(jnp.int32, (1, Hp), 1) < H
                 ).astype(jnp.float32), (Bb, Hp))

        # Recurrent state carried as values (vregs) within the chunk.
        h0 = h_ref[0]
        c0 = c_ref[0]
        h1 = h_ref[1]
        c1 = c_ref[1]

        # TODO(synk): for Bb >= 32-64 switch to lax.fori_loop to bound live ranges.
        for i in range(Tc):                       # fully unrolled time loop
            # Hidden-state matmuls depend only on the previous step's state,
            # so they are off the strict serial path (the scheduler overlaps
            # them with the previous step's layer-1 tail).
            r0 = jnp.dot(h0.astype(jnp.bfloat16), whh0_ref[...],
                         preferred_element_type=jnp.float32)
            r1 = jnp.dot(h1.astype(jnp.bfloat16), whh1_ref[...],
                         preferred_element_type=jnp.float32)

            # ----- LSTM layer 0 -----
            g0 = z0_ref[i * Bb:(i + 1) * Bb, :] + r0
            i0, f0, gg0, o0 = gates_split(g0)
            c0_new = f0 * c0 + i0 * gg0
            h0_new = o0 * jnp.tanh(c0_new)

            # ----- LSTM layer 1 (only this matmul is strictly serial) -----
            g1 = jnp.dot(h0_new.astype(jnp.bfloat16), wih1_ref[...],
                         preferred_element_type=jnp.float32) + r1 + b1_b
            i1, f1, gg1, o1 = gates_split(g1)
            c1_new = f1 * c1 + i1 * gg1
            h1_new = o1 * jnp.tanh(c1_new)

            if mask_time:
                valid = (chunk * Tc + i) < T       # T-padding must not touch h/c
                h0 = jnp.where(valid, h0_new, h0)
                c0 = jnp.where(valid, c0_new, c0)
                h1 = jnp.where(valid, h1_new, h1)
                c1 = jnp.where(valid, c1_new, c1)
            else:
                h0, c0, h1, c1 = h0_new, c0_new, h1_new, c1_new

            # ----- LayerNorm over the (real) hidden dim + clamp -----
            hy = h1_new
            if H != Hp:
                mu = jnp.sum(hy * ln_mask, axis=-1, keepdims=True) * inv_h
                d = (hy - mu) * ln_mask
            else:
                mu = jnp.sum(hy, axis=-1, keepdims=True) * inv_h
                d = hy - mu
            var = jnp.sum(d * d, axis=-1, keepdims=True) * inv_h
            y = d * lax.rsqrt(var + 1e-5) * gamma_b + beta_b
            y = jnp.clip(y, -100.0, 100.0)

            # Dense, lane-aligned, full-tile f32 store (Bb sublanes x Hp lanes)
            # into the time-major chunk scratch -- no relayout in the loop.
            y_ref[i * Bb:(i + 1) * Bb, :] = y

        # One bulk bf16 writeback per chunk, off the latency-critical loop.
        out_ref[...] = y_ref[...].astype(out_ref.dtype)

        # Carry the state to the next chunk.  Constant (over t) index map keeps
        # these blocks VMEM-resident across the time axis.
        h_ref[0] = h0
        c_ref[0] = c0
        h_ref[1] = h1
        c_ref[1] = c1

    return kernel


def transducer_predictor_forward(labels, params, vocab_size, *,
                                 time_chunk=None, batch_blocks=None):
    """labels: (B, T) int32.  Returns {'outputs': (B,T,H), 'hidden': (h_n, c_n)}."""
    labels = jnp.clip(labels, 0, vocab_size - 1)
    B, T = labels.shape
    emb_table = params['embedding']
    E = emb_table.shape[1]
    H = params['whh0'].shape[0]

    B_pad = _round_up(B, 8)
    E_pad = _round_up(E, 128)
    H_pad = _round_up(H, 128)

    # Batch blocking: leading "parallel" grid axis so v7x's two TensorCores
    # can each take a batch block.  Small batches stay in a single block so
    # the recurrence matmuls are as wide as possible on 1-TC chips.
    if batch_blocks is None:
        n_bblk = 2 if (B_pad >= 32 and B_pad % 16 == 0) else 1
    else:
        n_bblk = max(1, int(batch_blocks))
        while B_pad % (8 * n_bblk) != 0:
            n_bblk -= 1
    Bb = B_pad // n_bblk

    # Time chunk: aim for >= 256 rows in the hoisted input projection so the
    # MXU is well filled and per-grid-step overhead is amortized.
    if time_chunk is None:
        time_chunk = -(-256 // Bb)
    Tc = min(_round_up(time_chunk, 8), _round_up(T, 8))
    T_pad = _round_up(T, Tc)
    n_chunks = T_pad // Tc

    # ----- parameter prep: per-gate padding, bf16 matmul operands -----
    def pad_gate_mat(w, rows_pad):
        rows = w.shape[0]
        w = w.reshape(rows, 4, H)
        w = jnp.pad(w, ((0, rows_pad - rows), (0, 0), (0, H_pad - H)))
        return w.reshape(rows_pad, 4 * H_pad).astype(jnp.bfloat16)

    def pad_gate_bias(b):
        b = b.reshape(1, 4, H)
        b = jnp.pad(b, ((0, 0), (0, 0), (0, H_pad - H)))
        return b.reshape(1, 4 * H_pad).astype(jnp.float32)

    wih0 = pad_gate_mat(params['wih0'], E_pad)
    whh0 = pad_gate_mat(params['whh0'], H_pad)
    b0 = pad_gate_bias(params['b0'])
    wih1 = pad_gate_mat(params['wih1'], H_pad)
    whh1 = pad_gate_mat(params['whh1'], H_pad)
    b1 = pad_gate_bias(params['b1'])
    gamma = jnp.pad(params['gamma'],
                    ((0, 0), (0, H_pad - H))).astype(jnp.float32)
    beta = jnp.pad(params['beta'],
                   ((0, 0), (0, H_pad - H))).astype(jnp.float32)

    # ----- embedding gather straight into the padded, per-batch-block,
    #       time-major bf16 slab: x[b, t*Bb + j, :] = emb[labels[b*Bb + j, t]].
    emb_pad = jnp.pad(emb_table, ((0, 0), (0, E_pad - E))).astype(jnp.bfloat16)
    labels_pad = jnp.pad(labels, ((0, B_pad - B), (0, T_pad - T)))
    idx = jnp.transpose(labels_pad.reshape(n_bblk, Bb, T_pad), (0, 2, 1))
    x = jnp.take(emb_pad, idx.reshape(-1), axis=0).reshape(
        n_bblk, T_pad * Bb, E_pad)

    kernel = _make_predictor_kernel(T=T, H=H, Tc=Tc, Bb=Bb, H_pad=H_pad,
                                    mask_time=(T_pad != T))

    def vmem_full():
        # Grid-invariant weights: whole array, single-buffered in VMEM
        # (no per-grid-step double buffering -> fits v7x's 64 MiB VMEM).
        return pl.BlockSpec(memory_space=pltpu.MemorySpace.VMEM)

    grid_spec = pltpu.PrefetchScalarGridSpec(
        num_scalar_prefetch=0,
        grid=(n_bblk, n_chunks),
        in_specs=[
            pl.BlockSpec((None, Tc * Bb, E_pad), lambda b, t: (b, t, 0)),
            vmem_full(), vmem_full(), vmem_full(), vmem_full(),
            vmem_full(), vmem_full(), vmem_full(), vmem_full(),
        ],
        out_specs=(
            pl.BlockSpec((None, Tc * Bb, H_pad), lambda b, t: (b, t, 0)),
            pl.BlockSpec((2, Bb, H_pad), lambda b, t: (0, b, 0)),
            pl.BlockSpec((2, Bb, H_pad), lambda b, t: (0, b, 0)),
        ),
        scratch_shapes=[
            pltpu.VMEM((Tc * Bb, 4 * H_pad), jnp.float32),   # hoisted z0
            pltpu.VMEM((Tc * Bb, H_pad), jnp.float32),       # chunk outputs
        ],
    )

    # Advisory scoped-VMEM limit, capped below the physical capacity of the
    # current TPU generation (v7x has only 64 MiB per TensorCore).
    bpe = lambda a: a.size * a.dtype.itemsize
    weight_bytes = sum(bpe(a) for a in (wih0, whh0, b0, wih1, whh1, b1,
                                        gamma, beta))
    io_block_bytes = Tc * Bb * E_pad * 2 + Tc * Bb * H_pad * 2     # x + out (bf16)
    state_bytes = 2 * (2 * Bb * H_pad * 4)                          # h + c blocks
    scratch_bytes = Tc * Bb * 4 * H_pad * 4 + Tc * Bb * H_pad * 4
    need = (weight_bytes + 2 * io_block_bytes + 2 * state_bytes + scratch_bytes)
    try:
        vmem_cap = int(pltpu.get_tpu_info().vmem_capacity_bytes)
    except Exception:
        vmem_cap = 64 * 1024 * 1024      # conservative: v7x per-TC VMEM
    vmem_limit = int(min(0.9 * vmem_cap,
                         max(32 * 1024 * 1024, 1.5 * need + (8 << 20))))

    out_pad, h_n, c_n = pl.pallas_call(
        kernel,
        out_shape=(
            jax.ShapeDtypeStruct((n_bblk, T_pad * Bb, H_pad), jnp.bfloat16),
            jax.ShapeDtypeStruct((2, B_pad, H_pad), jnp.float32),
            jax.ShapeDtypeStruct((2, B_pad, H_pad), jnp.float32),
        ),
        grid_spec=grid_spec,
        compiler_params=pltpu.CompilerParams(
            dimension_semantics=("parallel", "arbitrary"),
            vmem_limit_bytes=vmem_limit,
        ),
    )(x, wih0, whh0, b0, wih1, whh1, b1, gamma, beta)

    # Cheap batch-first relayout of the (bf16) output in the wrapper.
    outputs = jnp.transpose(out_pad.reshape(n_bblk, T_pad, Bb, H_pad),
                            (0, 2, 1, 3)).reshape(B_pad, T_pad, H_pad)
    outputs = outputs[:B, :T, :H].astype(jnp.float32)
    hidden = (h_n[:, :B, :H], c_n[:, :B, :H])
    return {'outputs': outputs, 'hidden': hidden}


def reference_forward(labels, params, vocab_size):
    """Pure-JAX reference mirroring the PyTorch eval-mode semantics and the
    kernel's precision policy (bf16 matmul operands, f32 accumulation/state/LN)."""
    labels = jnp.clip(labels, 0, vocab_size - 1)
    emb = jnp.take(params['embedding'], labels, axis=0)      # (B, T, E) f32
    B, T, E = emb.shape
    H = params['whh0'].shape[0]
    bf = jnp.bfloat16
    wih0 = params['wih0'].astype(bf)
    whh0 = params['whh0'].astype(bf)
    wih1 = params['wih1'].astype(bf)
    whh1 = params['whh1'].astype(bf)
    b0 = params['b0'][0]
    b1 = params['b1'][0]
    gamma = params['gamma'][0]
    beta = params['beta'][0]

    def cell(xv, h, c, wih, whh, b):
        gates = (jnp.dot(xv.astype(bf), wih, preferred_element_type=jnp.float32)
                 + jnp.dot(h.astype(bf), whh, preferred_element_type=jnp.float32)
                 + b)
        i = jax.nn.sigmoid(gates[:, :H])
        f = jax.nn.sigmoid(gates[:, H:2 * H])
        g = jnp.tanh(gates[:, 2 * H:3 * H])
        o = jax.nn.sigmoid(gates[:, 3 * H:])
        c = f * c + i * g
        h = o * jnp.tanh(c)
        return h, c

    h0 = jnp.zeros((B, H), jnp.float32)
    c0 = jnp.zeros((B, H), jnp.float32)
    h1 = jnp.zeros((B, H), jnp.float32)
    c1 = jnp.zeros((B, H), jnp.float32)
    outs = []
    for t in range(T):
        xt = emb[:, t, :]
        h0, c0 = cell(xt, h0, c0, wih0, whh0, b0)
        h1, c1 = cell(h0, h1, c1, wih1, whh1, b1)
        mu = h1.mean(-1, keepdims=True)
        var = ((h1 - mu) ** 2).mean(-1, keepdims=True)
        y = (h1 - mu) / jnp.sqrt(var + 1e-5) * gamma + beta
        outs.append(jnp.clip(y, -100.0, 100.0))
    outputs = jnp.stack(outs, axis=1)
    return outputs, (jnp.stack([h0, h1]), jnp.stack([c0, c1]))


def make_params(key, vocab_size, embedding_dim, hidden_dim):
    """Deterministic synthetic parameters (shapes per the PyTorch __init__)."""
    kE, k0a, k0b, k0c, k0d, k1a, k1b, k1c, k1d = jax.random.split(key, 9)
    E, H = embedding_dim, hidden_dim

    # Embedding: xavier_uniform with gain 0.1.
    bound_e = 0.1 * (6.0 / (vocab_size + E)) ** 0.5
    embedding = jax.random.uniform(kE, (vocab_size, E), jnp.float32,
                                   -bound_e, bound_e)

    # LSTM default init: U(-1/sqrt(H), 1/sqrt(H)); gate order [i, f, g, o].
    s = 1.0 / (H ** 0.5)
    u = lambda k, shape: jax.random.uniform(k, shape, jnp.float32, -s, s)
    params = {
        'embedding': embedding,
        # layer 0 (input = embedding), weights pre-transposed to (in, 4H)
        'wih0': u(k0a, (E, 4 * H)),
        'whh0': u(k0b, (H, 4 * H)),
        'b0': (u(k0c, (1, 4 * H)) + u(k0d, (1, 4 * H))),   # b_ih + b_hh
        # layer 1 (input = hidden of layer 0)
        'wih1': u(k1a, (H, 4 * H)),
        'whh1': u(k1b, (H, 4 * H)),
        'b1': (u(k1c, (1, 4 * H)) + u(k1d, (1, 4 * H))),
        # LayerNorm
        'gamma': jnp.ones((1, H), jnp.float32),
        'beta': jnp.zeros((1, H), jnp.float32),
    }
    return params


if __name__ == "__main__":
    vocab_size = 16
    embedding_dim = 32
    hidden_dim = 32
    batch = 2
    seq = 8

    key = jax.random.PRNGKey(0)
    kp, kl = jax.random.split(key)
    params = make_params(kp, vocab_size, embedding_dim, hidden_dim)
    labels = jax.random.randint(kl, (batch, seq), 0, vocab_size, dtype=jnp.int32)

    fwd = jax.jit(functools.partial(transducer_predictor_forward,
                                    vocab_size=vocab_size))
    result = fwd(labels, params)
    outputs = jax.block_until_ready(result['outputs'])
    h_n = jax.block_until_ready(result['hidden'][0])
    c_n = jax.block_until_ready(result['hidden'][1])

    # Cross-check against the pure-JAX reference (same bf16 matmul policy;
    # outputs additionally pass through one bf16 round-trip in the kernel).
    ref_out, (ref_h, ref_c) = reference_forward(labels, params, vocab_size)
    assert outputs.shape == (batch, seq, hidden_dim)
    assert h_n.shape == (2, batch, hidden_dim)
    assert c_n.shape == (2, batch, hidden_dim)
    assert jnp.allclose(outputs, ref_out, atol=2e-2, rtol=2e-2), \
        float(jnp.max(jnp.abs(outputs - ref_out)))
    assert jnp.allclose(h_n, ref_h, atol=1e-2, rtol=1e-2)
    assert jnp.allclose(c_n, ref_c, atol=1e-2, rtol=1e-2)

    print("KERNEL_OK")
</pallas_src>

<mosaic_0001>
module attributes {stable_mosaic.version = 11 : i64} {
  func.func @kernel(%arg0: i32, %arg1: i32, %arg2: memref<1x64x128xbf16, #tpu.memory_space<vmem>>, %arg3: memref<128x512xbf16, #tpu.memory_space<vmem>>, %arg4: memref<128x512xbf16, #tpu.memory_space<vmem>>, %arg5: memref<1x512xf32, #tpu.memory_space<vmem>>, %arg6: memref<128x512xbf16, #tpu.memory_space<vmem>>, %arg7: memref<128x512xbf16, #tpu.memory_space<vmem>>, %arg8: memref<1x512xf32, #tpu.memory_space<vmem>>, %arg9: memref<1x128xf32, #tpu.memory_space<vmem>>, %arg10: memref<1x128xf32, #tpu.memory_space<vmem>>, %arg11: memref<1x64x128xbf16, #tpu.memory_space<vmem>>, %arg12: memref<2x8x128xf32, #tpu.memory_space<vmem>>, %arg13: memref<2x8x128xf32, #tpu.memory_space<vmem>>, %arg14: memref<64x512xf32, #tpu.memory_space<vmem>>, %arg15: memref<64x128xf32, #tpu.memory_space<vmem>>) attributes {dimension_semantics = [#tpu.dimension_semantics<parallel>, #tpu.dimension_semantics<arbitrary>], iteration_bounds = array<i64: 1, 1>, scalar_prefetch = 0 : i64, scratch_operands = 2 : i64, tpu.core_type = #tpu.core_type<tc>, window_params = [{transform_indices = @transform_0, window_bounds = array<i64: 1, 64, 128>}, {pipeline_mode = #tpu.pipeline_mode<synchronous>, transform_indices = @transform_1, window_bounds = array<i64: 128, 512>}, {pipeline_mode = #tpu.pipeline_mode<synchronous>, transform_indices = @transform_2, window_bounds = array<i64: 128, 512>}, {pipeline_mode = #tpu.pipeline_mode<synchronous>, transform_indices = @transform_3, window_bounds = array<i64: 1, 512>}, {pipeline_mode = #tpu.pipeline_mode<synchronous>, transform_indices = @transform_4, window_bounds = array<i64: 128, 512>}, {pipeline_mode = #tpu.pipeline_mode<synchronous>, transform_indices = @transform_5, window_bounds = array<i64: 128, 512>}, {pipeline_mode = #tpu.pipeline_mode<synchronous>, transform_indices = @transform_6, window_bounds = array<i64: 1, 512>}, {pipeline_mode = #tpu.pipeline_mode<synchronous>, transform_indices = @transform_7, window_bounds = array<i64: 1, 128>}, {pipeline_mode = #tpu.pipeline_mode<synchronous>, transform_indices = @transform_8, window_bounds = array<i64: 1, 128>}, {transform_indices = @transform_9, window_bounds = array<i64: 1, 64, 128>}, {transform_indices = @transform_10, window_bounds = array<i64: 2, 8, 128>}, {transform_indices = @transform_11, window_bounds = array<i64: 2, 8, 128>}]} {
    %c0_i32 = arith.constant 0 : i32
    %0 = arith.cmpi eq, %arg1, %c0_i32 : i32
    %1 = arith.extui %0 : i1 to i32
    %c0_i32_0 = arith.constant 0 : i32
    %2 = arith.cmpi ne, %1, %c0_i32_0 : i32
    scf.if %2 {
      %cst_244 = arith.constant 0.000000e+00 : f32
      %756 = vector.broadcast %cst_244 : f32 to vector<2x8x128xf32>
      %c0_245 = arith.constant 0 : index
      %c0_246 = arith.constant 0 : index
      %c0_247 = arith.constant 0 : index
      %757 = vector.load %arg12[%c0_245, %c0_246, %c0_247] : memref<2x8x128xf32, #tpu.memory_space<vmem>>, vector<2x8x128xf32>
      tpu.vector_store %arg12[%c0_245, %c0_246, %c0_247], %756 {strides = array<i32>} : memref<2x8x128xf32, #tpu.memory_space<vmem>>, vector<2x8x128xf32>,
      %cst_248 = arith.constant 0.000000e+00 : f32
      %758 = vector.broadcast %cst_248 : f32 to vector<2x8x128xf32>
      %c0_249 = arith.constant 0 : index
      %c0_250 = arith.constant 0 : index
      %c0_251 = arith.constant 0 : index
      %759 = vector.load %arg13[%c0_249, %c0_250, %c0_251] : memref<2x8x128xf32, #tpu.memory_space<vmem>>, vector<2x8x128xf32>
      tpu.vector_store %arg13[%c0_249, %c0_250, %c0_251], %758 {strides = array<i32>} : memref<2x8x128xf32, #tpu.memory_space<vmem>>, vector<2x8x128xf32>,
    } else {
    }
    %c0 = arith.constant 0 : index
    %c0_1 = arith.constant 0 : index
    %c0_2 = arith.constant 0 : index
    %3 = vector.load %arg2[%c0, %c0_1, %c0_2] : memref<1x64x128xbf16, #tpu.memory_space<vmem>>, vector<1x64x128xbf16>
    %4 = vector.shape_cast %3 : vector<1x64x128xbf16> to vector<64x128xbf16>
    %c0_3 = arith.constant 0 : index
    %c0_4 = arith.constant 0 : index
    %5 = vector.load %arg3[%c0_3, %c0_4] : memref<128x512xbf16, #tpu.memory_space<vmem>>, vector<128x512xbf16>
    %cst = arith.constant dense<0.000000e+00> : vector<64x512xf32>
    %6 = tpu.matmul %4, %5, %cst {dimension_numbers = #tpu.dot_dimension_numbers<[1], [0], [0], [1], [0, 0, 1, 1], [], []>} : vector<64x128xbf16>, vector<128x512xbf16>, vector<64x512xf32> -> vector<64x512xf32>
    %c0_5 = arith.constant 0 : index
    %c0_6 = arith.constant 0 : index
    %7 = vector.load %arg5[%c0_5, %c0_6] : memref<1x512xf32, #tpu.memory_space<vmem>>, vector<1x512xf32>
    %8 = vector.broadcast %7 : vector<1x512xf32> to vector<64x512xf32>
    %9 = arith.addf %6, %8 : vector<64x512xf32>
    %c0_7 = arith.constant 0 : index
    %c0_8 = arith.constant 0 : index
    %10 = vector.load %arg14[%c0_7, %c0_8] : memref<64x512xf32, #tpu.memory_space<vmem>>, vector<64x512xf32>
    tpu.vector_store %arg14[%c0_7, %c0_8], %9 {strides = array<i32>} : memref<64x512xf32, #tpu.memory_space<vmem>>, vector<64x512xf32>,
    %c0_9 = arith.constant 0 : index
    %c0_10 = arith.constant 0 : index
    %11 = vector.load %arg8[%c0_9, %c0_10] : memref<1x512xf32, #tpu.memory_space<vmem>>, vector<1x512xf32>
    %12 = vector.shape_cast %11 : vector<1x512xf32> to vector<1x512xf32>
    %13 = vector.broadcast %12 : vector<1x512xf32> to vector<8x512xf32>
    %c0_11 = arith.constant 0 : index
    %c0_12 = arith.constant 0 : index
    %14 = vector.load %arg9[%c0_11, %c0_12] : memref<1x128xf32, #tpu.memory_space<vmem>>, vector<1x128xf32>
    %15 = vector.shape_cast %14 : vector<1x128xf32> to vector<1x128xf32>
    %16 = vector.broadcast %15 : vector<1x128xf32> to vector<8x128xf32>
    %c0_13 = arith.constant 0 : index
    %c0_14 = arith.constant 0 : index
    %17 = vector.load %arg10[%c0_13, %c0_14] : memref<1x128xf32, #tpu.memory_space<vmem>>, vector<1x128xf32>
    %18 = vector.shape_cast %17 : vector<1x128xf32> to vector<1x128xf32>
    %19 = vector.broadcast %18 : vector<1x128xf32> to vector<8x128xf32>
    %20 = tpu.iota {dimensions = array<i32: 1>} : vector<1x128xi32>
    %c32_i32 = arith.constant 32 : i32
    %21 = vector.broadcast %c32_i32 : i32 to vector<1x128xi32>
    %22 = arith.cmpi slt, %20, %21 : vector<1x128xi32>
    %23 = arith.extui %22 : vector<1x128xi1> to vector<1x128xi32>
    %24 = arith.sitofp %23 : vector<1x128xi32> to vector<1x128xf32>
    %25 = vector.shape_cast %24 : vector<1x128xf32> to vector<1x128xf32>
    %26 = vector.broadcast %25 : vector<1x128xf32> to vector<8x128xf32>
    %c0_15 = arith.constant 0 : index
    %c0_16 = arith.constant 0 : index
    %c0_17 = arith.constant 0 : index
    %27 = vector.load %arg12[%c0_15, %c0_16, %c0_17] : memref<2x8x128xf32, #tpu.memory_space<vmem>>, vector<1x8x128xf32>
    %28 = vector.shape_cast %27 : vector<1x8x128xf32> to vector<8x128xf32>
    %c0_18 = arith.constant 0 : index
    %c0_19 = arith.constant 0 : index
    %c0_20 = arith.constant 0 : index
    %29 = vector.load %arg13[%c0_18, %c0_19, %c0_20] : memref<2x8x128xf32, #tpu.memory_space<vmem>>, vector<1x8x128xf32>
    %30 = vector.shape_cast %29 : vector<1x8x128xf32> to vector<8x128xf32>
    %c1 = arith.constant 1 : index
    %c0_21 = arith.constant 0 : index
    %c0_22 = arith.constant 0 : index
    %31 = vector.load %arg12[%c1, %c0_21, %c0_22] : memref<2x8x128xf32, #tpu.memory_space<vmem>>, vector<1x8x128xf32>
    %32 = vector.shape_cast %31 : vector<1x8x128xf32> to vector<8x128xf32>
    %c1_23 = arith.constant 1 : index
    %c0_24 = arith.constant 0 : index
    %c0_25 = arith.constant 0 : index
    %33 = vector.load %arg13[%c1_23, %c0_24, %c0_25] : memref<2x8x128xf32, #tpu.memory_space<vmem>>, vector<1x8x128xf32>
    %34 = vector.shape_cast %33 : vector<1x8x128xf32> to vector<8x128xf32>
    %35 = arith.truncf %28 : vector<8x128xf32> to vector<8x128xbf16>
    %c0_26 = arith.constant 0 : index
    %c0_27 = arith.constant 0 : index
    %36 = vector.load %arg4[%c0_26, %c0_27] : memref<128x512xbf16, #tpu.memory_space<vmem>>, vector<128x512xbf16>
    %cst_28 = arith.constant dense<0.000000e+00> : vector<8x512xf32>
    %37 = tpu.matmul %35, %36, %cst_28 {dimension_numbers = #tpu.dot_dimension_numbers<[1], [0], [0], [1], [0, 0, 1, 1], [], []>} : vector<8x128xbf16>, vector<128x512xbf16>, vector<8x512xf32> -> vector<8x512xf32>
    %38 = arith.truncf %32 : vector<8x128xf32> to vector<8x128xbf16>
    %c0_29 = arith.constant 0 : index
    %c0_30 = arith.constant 0 : index
    %39 = vector.load %arg7[%c0_29, %c0_30] : memref<128x512xbf16, #tpu.memory_space<vmem>>, vector<128x512xbf16>
    %cst_31 = arith.constant dense<0.000000e+00> : vector<8x512xf32>
    %40 = tpu.matmul %38, %39, %cst_31 {dimension_numbers = #tpu.dot_dimension_numbers<[1], [0], [0], [1], [0, 0, 1, 1], [], []>} : vector<8x128xbf16>, vector<128x512xbf16>, vector<8x512xf32> -> vector<8x512xf32>
    %c0_32 = arith.constant 0 : index
    %c0_33 = arith.constant 0 : index
    %41 = vector.load %arg14[%c0_32, %c0_33] : memref<64x512xf32, #tpu.memory_space<vmem>>, vector<8x512xf32>
    %42 = arith.addf %41, %37 : vector<8x512xf32>
    %43 = vector.extract_strided_slice %42 {offsets = [0, 0], sizes = [8, 128], strides = [1, 1]} : vector<8x512xf32> to vector<8x128xf32>
    %44 = arith.negf %43 : vector<8x128xf32>
    %45 = math.exp %44 : vector<8x128xf32>
    %cst_34 = arith.constant 1.000000e+00 : f32
    %46 = vector.broadcast %cst_34 : f32 to vector<8x128xf32>
    %47 = arith.addf %46, %45 : vector<8x128xf32>
    %48 = arith.divf %46, %47 : vector<8x128xf32>
    %49 = vector.extract_strided_slice %42 {offsets = [0, 128], sizes = [8, 128], strides = [1, 1]} : vector<8x512xf32> to vector<8x128xf32>
    %50 = arith.negf %49 : vector<8x128xf32>
    %51 = math.exp %50 : vector<8x128xf32>
    %cst_35 = arith.constant 1.000000e+00 : f32
    %52 = vector.broadcast %cst_35 : f32 to vector<8x128xf32>
    %53 = arith.addf %52, %51 : vector<8x128xf32>
    %54 = arith.divf %52, %53 : vector<8x128xf32>
    %55 = vector.extract_strided_slice %42 {offsets = [0, 256], sizes = [8, 128], strides = [1, 1]} : vector<8x512xf32> to vector<8x128xf32>
    %56 = math.tanh %55 : vector<8x128xf32>
    %57 = vector.extract_strided_slice %42 {offsets = [0, 384], sizes = [8, 128], strides = [1, 1]} : vector<8x512xf32> to vector<8x128xf32>
    %58 = arith.negf %57 : vector<8x128xf32>
    %59 = math.exp %58 : vector<8x128xf32>
    %cst_36 = arith.constant 1.000000e+00 : f32
    %60 = vector.broadcast %cst_36 : f32 to vector<8x128xf32>
    %61 = arith.addf %60, %59 : vector<8x128xf32>
    %62 = arith.divf %60, %61 : vector<8x128xf32>
    %63 = arith.mulf %54, %30 : vector<8x128xf32>
    %64 = arith.mulf %48, %56 : vector<8x128xf32>
    %65 = arith.addf %63, %64 : vector<8x128xf32>
    %66 = math.tanh %65 : vector<8x128xf32>
    %67 = arith.mulf %62, %66 : vector<8x128xf32>
    %68 = arith.truncf %67 : vector<8x128xf32> to vector<8x128xbf16>
    %c0_37 = arith.constant 0 : index
    %c0_38 = arith.constant 0 : index
    %69 = vector.load %arg6[%c0_37, %c0_38] : memref<128x512xbf16, #tpu.memory_space<vmem>>, vector<128x512xbf16>
    %cst_39 = arith.constant dense<0.000000e+00> : vector<8x512xf32>
    %70 = tpu.matmul %68, %69, %cst_39 {dimension_numbers = #tpu.dot_dimension_numbers<[1], [0], [0], [1], [0, 0, 1, 1], [], []>} : vector<8x128xbf16>, vector<128x512xbf16>, vector<8x512xf32> -> vector<8x512xf32>
    %71 = arith.addf %70, %40 : vector<8x512xf32>
    %72 = arith.addf %71, %13 : vector<8x512xf32>
    %73 = vector.extract_strided_slice %72 {offsets = [0, 0], sizes = [8, 128], strides = [1, 1]} : vector<8x512xf32> to vector<8x128xf32>
    %74 = arith.negf %73 : vector<8x128xf32>
    %75 = math.exp %74 : vector<8x128xf32>
    %cst_40 = arith.constant 1.000000e+00 : f32
    %76 = vector.broadcast %cst_40 : f32 to vector<8x128xf32>
    %77 = arith.addf %76, %75 : vector<8x128xf32>
    %78 = arith.divf %76, %77 : vector<8x128xf32>
    %79 = vector.extract_strided_slice %72 {offsets = [0, 128], sizes = [8, 128], strides = [1, 1]} : vector<8x512xf32> to vector<8x128xf32>
    %80 = arith.negf %79 : vector<8x128xf32>
    %81 = math.exp %80 : vector<8x128xf32>
    %cst_41 = arith.constant 1.000000e+00 : f32
    %82 = vector.broadcast %cst_41 : f32 to vector<8x128xf32>
    %83 = arith.addf %82, %81 : vector<8x128xf32>
    %84 = arith.divf %82, %83 : vector<8x128xf32>
    %85 = vector.extract_strided_slice %72 {offsets = [0, 256], sizes = [8, 128], strides = [1, 1]} : vector<8x512xf32> to vector<8x128xf32>
    %86 = math.tanh %85 : vector<8x128xf32>
    %87 = vector.extract_strided_slice %72 {offsets = [0, 384], sizes = [8, 128], strides = [1, 1]} : vector<8x512xf32> to vector<8x128xf32>
    %88 = arith.negf %87 : vector<8x128xf32>
    %89 = math.exp %88 : vector<8x128xf32>
    %cst_42 = arith.constant 1.000000e+00 : f32
    %90 = vector.broadcast %cst_42 : f32 to vector<8x128xf32>
    %91 = arith.addf %90, %89 : vector<8x128xf32>
    %92 = arith.divf %90, %91 : vector<8x128xf32>
    %93 = arith.mulf %84, %34 : vector<8x128xf32>
    %94 = arith.mulf %78, %86 : vector<8x128xf32>
    %95 = arith.addf %93, %94 : vector<8x128xf32>
    %96 = math.tanh %95 : vector<8x128xf32>
    %97 = arith.mulf %92, %96 : vector<8x128xf32>
    %98 = arith.mulf %97, %26 : vector<8x128xf32>
    %cst_43 = arith.constant dense<0.000000e+00> : vector<8xf32>
    %99 = vector.multi_reduction <add>, %98, %cst_43 [1] : vector<8x128xf32> to vector<8xf32>
    %100 = vector.shape_cast %99 : vector<8xf32> to vector<8x1xf32>
    %cst_44 = arith.constant 3.125000e-02 : f32
    %101 = vector.broadcast %cst_44 : f32 to vector<8x1xf32>
    %102 = arith.mulf %100, %101 : vector<8x1xf32>
    %103 = vector.broadcast %102 : vector<8x1xf32> to vector<8x128xf32>
    %104 = arith.subf %97, %103 : vector<8x128xf32>
    %105 = arith.mulf %104, %26 : vector<8x128xf32>
    %106 = arith.mulf %105, %105 : vector<8x128xf32>
    %cst_45 = arith.constant dense<0.000000e+00> : vector<8xf32>
    %107 = vector.multi_reduction <add>, %106, %cst_45 [1] : vector<8x128xf32> to vector<8xf32>
    %108 = vector.shape_cast %107 : vector<8xf32> to vector<8x1xf32>
    %cst_46 = arith.constant 3.125000e-02 : f32
    %109 = vector.broadcast %cst_46 : f32 to vector<8x1xf32>
    %110 = arith.mulf %108, %109 : vector<8x1xf32>
    %cst_47 = arith.constant 9.99999974E-6 : f32
    %111 = vector.broadcast %cst_47 : f32 to vector<8x1xf32>
    %112 = arith.addf %110, %111 : vector<8x1xf32>
    %113 = math.rsqrt %112 : vector<8x1xf32>
    %114 = vector.broadcast %113 : vector<8x1xf32> to vector<8x128xf32>
    %115 = arith.mulf %105, %114 : vector<8x128xf32>
    %116 = arith.mulf %115, %16 : vector<8x128xf32>
    %117 = arith.addf %116, %19 : vector<8x128xf32>
    %cst_48 = arith.constant -1.000000e+02 : f32
    %cst_49 = arith.constant 1.000000e+02 : f32
    %118 = vector.broadcast %cst_48 : f32 to vector<8x128xf32>
    %119 = arith.maximumf %118, %117 : vector<8x128xf32>
    %120 = vector.broadcast %cst_49 : f32 to vector<8x128xf32>
    %121 = arith.minimumf %120, %119 : vector<8x128xf32>
    %c0_50 = arith.constant 0 : index
    %c0_51 = arith.constant 0 : index
    %122 = vector.load %arg15[%c0_50, %c0_51] : memref<64x128xf32, #tpu.memory_space<vmem>>, vector<8x128xf32>
    tpu.vector_store %arg15[%c0_50, %c0_51], %121 {strides = array<i32>} : memref<64x128xf32, #tpu.memory_space<vmem>>, vector<8x128xf32>,
    %123 = arith.truncf %67 : vector<8x128xf32> to vector<8x128xbf16>
    %c0_52 = arith.constant 0 : index
    %c0_53 = arith.constant 0 : index
    %124 = vector.load %arg4[%c0_52, %c0_53] : memref<128x512xbf16, #tpu.memory_space<vmem>>, vector<128x512xbf16>
    %cst_54 = arith.constant dense<0.000000e+00> : vector<8x512xf32>
    %125 = tpu.matmul %123, %124, %cst_54 {dimension_numbers = #tpu.dot_dimension_numbers<[1], [0], [0], [1], [0, 0, 1, 1], [], []>} : vector<8x128xbf16>, vector<128x512xbf16>, vector<8x512xf32> -> vector<8x512xf32>
    %126 = arith.truncf %97 : vector<8x128xf32> to vector<8x128xbf16>
    %c0_55 = arith.constant 0 : index
    %c0_56 = arith.constant 0 : index
    %127 = vector.load %arg7[%c0_55, %c0_56] : memref<128x512xbf16, #tpu.memory_space<vmem>>, vector<128x512xbf16>
    %cst_57 = arith.constant dense<0.000000e+00> : vector<8x512xf32>
    %128 = tpu.matmul %126, %127, %cst_57 {dimension_numbers = #tpu.dot_dimension_numbers<[1], [0], [0], [1], [0, 0, 1, 1], [], []>} : vector<8x128xbf16>, vector<128x512xbf16>, vector<8x512xf32> -> vector<8x512xf32>
    %c8 = arith.constant 8 : index
    %c0_58 = arith.constant 0 : index
    %129 = vector.load %arg14[%c8, %c0_58] : memref<64x512xf32, #tpu.memory_space<vmem>>, vector<8x512xf32>
    %130 = arith.addf %129, %125 : vector<8x512xf32>
    %131 = vector.extract_strided_slice %130 {offsets = [0, 0], sizes = [8, 128], strides = [1, 1]} : vector<8x512xf32> to vector<8x128xf32>
    %132 = arith.negf %131 : vector<8x128xf32>
    %133 = math.exp %132 : vector<8x128xf32>
    %cst_59 = arith.constant 1.000000e+00 : f32
    %134 = vector.broadcast %cst_59 : f32 to vector<8x128xf32>
    %135 = arith.addf %134, %133 : vector<8x128xf32>
    %136 = arith.divf %134, %135 : vector<8x128xf32>
    %137 = vector.extract_strided_slice %130 {offsets = [0, 128], sizes = [8, 128], strides = [1, 1]} : vector<8x512xf32> to vector<8x128xf32>
    %138 = arith.negf %137 : vector<8x128xf32>
    %139 = math.exp %138 : vector<8x128xf32>
    %cst_60 = arith.constant 1.000000e+00 : f32
    %140 = vector.broadcast %cst_60 : f32 to vector<8x128xf32>
    %141 = arith.addf %140, %139 : vector<8x128xf32>
    %142 = arith.divf %140, %141 : vector<8x128xf32>
    %143 = vector.extract_strided_slice %130 {offsets = [0, 256], sizes = [8, 128], strides = [1, 1]} : vector<8x512xf32> to vector<8x128xf32>
    %144 = math.tanh %143 : vector<8x128xf32>
    %145 = vector.extract_strided_slice %130 {offsets = [0, 384], sizes = [8, 128], strides = [1, 1]} : vector<8x512xf32> to vector<8x128xf32>
    %146 = arith.negf %145 : vector<8x128xf32>
    %147 = math.exp %146 : vector<8x128xf32>
    %cst_61 = arith.constant 1.000000e+00 : f32
    %148 = vector.broadcast %cst_61 : f32 to vector<8x128xf32>
    %149 = arith.addf %148, %147 : vector<8x128xf32>
    %150 = arith.divf %148, %149 : vector<8x128xf32>
    %151 = arith.mulf %142, %65 : vector<8x128xf32>
    %152 = arith.mulf %136, %144 : vector<8x128xf32>
    %153 = arith.addf %151, %152 : vector<8x128xf32>
    %154 = math.tanh %153 : vector<8x128xf32>
    %155 = arith.mulf %150, %154 : vector<8x128xf32>
    %156 = arith.truncf %155 : vector<8x128xf32> to vector<8x128xbf16>
    %c0_62 = arith.constant 0 : index
    %c0_63 = arith.constant 0 : index
    %157 = vector.load %arg6[%c0_62, %c0_63] : memref<128x512xbf16, #tpu.memory_space<vmem>>, vector<128x512xbf16>
    %cst_64 = arith.constant dense<0.000000e+00> : vector<8x512xf32>
    %158 = tpu.matmul %156, %157, %cst_64 {dimension_numbers = #tpu.dot_dimension_numbers<[1], [0], [0], [1], [0, 0, 1, 1], [], []>} : vector<8x128xbf16>, vector<128x512xbf16>, vector<8x512xf32> -> vector<8x512xf32>
    %159 = arith.addf %158, %128 : vector<8x512xf32>
    %160 = arith.addf %159, %13 : vector<8x512xf32>
    %161 = vector.extract_strided_slice %160 {offsets = [0, 0], sizes = [8, 128], strides = [1, 1]} : vector<8x512xf32> to vector<8x128xf32>
    %162 = arith.negf %161 : vector<8x128xf32>
    %163 = math.exp %162 : vector<8x128xf32>
    %cst_65 = arith.constant 1.000000e+00 : f32
    %164 = vector.broadcast %cst_65 : f32 to vector<8x128xf32>
    %165 = arith.addf %164, %163 : vector<8x128xf32>
    %166 = arith.divf %164, %165 : vector<8x128xf32>
    %167 = vector.extract_strided_slice %160 {offsets = [0, 128], sizes = [8, 128], strides = [1, 1]} : vector<8x512xf32> to vector<8x128xf32>
    %168 = arith.negf %167 : vector<8x128xf32>
    %169 = math.exp %168 : vector<8x128xf32>
    %cst_66 = arith.constant 1.000000e+00 : f32
    %170 = vector.broadcast %cst_66 : f32 to vector<8x128xf32>
    %171 = arith.addf %170, %169 : vector<8x128xf32>
    %172 = arith.divf %170, %171 : vector<8x128xf32>
    %173 = vector.extract_strided_slice %160 {offsets = [0, 256], sizes = [8, 128], strides = [1, 1]} : vector<8x512xf32> to vector<8x128xf32>
    %174 = math.tanh %173 : vector<8x128xf32>
    %175 = vector.extract_strided_slice %160 {offsets = [0, 384], sizes = [8, 128], strides = [1, 1]} : vector<8x512xf32> to vector<8x128xf32>
    %176 = arith.negf %175 : vector<8x128xf32>
    %177 = math.exp %176 : vector<8x128xf32>
    %cst_67 = arith.constant 1.000000e+00 : f32
    %178 = vector.broadcast %cst_67 : f32 to vector<8x128xf32>
    %179 = arith.addf %178, %177 : vector<8x128xf32>
    %180 = arith.divf %178, %179 : vector<8x128xf32>
    %181 = arith.mulf %172, %95 : vector<8x128xf32>
    %182 = arith.mulf %166, %174 : vector<8x128xf32>
    %183 = arith.addf %181, %182 : vector<8x128xf32>
    %184 = math.tanh %183 : vector<8x128xf32>
    %185 = arith.mulf %180, %184 : vector<8x128xf32>
    %186 = arith.mulf %185, %26 : vector<8x128xf32>
    %cst_68 = arith.constant dense<0.000000e+00> : vector<8xf32>
    %187 = vector.multi_reduction <add>, %186, %cst_68 [1] : vector<8x128xf32> to vector<8xf32>
    %188 = vector.shape_cast %187 : vector<8xf32> to vector<8x1xf32>
    %cst_69 = arith.constant 3.125000e-02 : f32
    %189 = vector.broadcast %cst_69 : f32 to vector<8x1xf32>
    %190 = arith.mulf %188, %189 : vector<8x1xf32>
    %191 = vector.broadcast %190 : vector<8x1xf32> to vector<8x128xf32>
    %192 = arith.subf %185, %191 : vector<8x128xf32>
    %193 = arith.mulf %192, %26 : vector<8x128xf32>
    %194 = arith.mulf %193, %193 : vector<8x128xf32>
    %cst_70 = arith.constant dense<0.000000e+00> : vector<8xf32>
    %195 = vector.multi_reduction <add>, %194, %cst_70 [1] : vector<8x128xf32> to vector<8xf32>
    %196 = vector.shape_cast %195 : vector<8xf32> to vector<8x1xf32>
    %cst_71 = arith.constant 3.125000e-02 : f32
    %197 = vector.broadcast %cst_71 : f32 to vector<8x1xf32>
    %198 = arith.mulf %196, %197 : vector<8x1xf32>
    %cst_72 = arith.constant 9.99999974E-6 : f32
    %199 = vector.broadcast %cst_72 : f32 to vector<8x1xf32>
    %200 = arith.addf %198, %199 : vector<8x1xf32>
    %201 = math.rsqrt %200 : vector<8x1xf32>
    %202 = vector.broadcast %201 : vector<8x1xf32> to vector<8x128xf32>
    %203 = arith.mulf %193, %202 : vector<8x128xf32>
    %204 = arith.mulf %203, %16 : vector<8x128xf32>
    %205 = arith.addf %204, %19 : vector<8x128xf32>
    %cst_73 = arith.constant -1.000000e+02 : f32
    %cst_74 = arith.constant 1.000000e+02 : f32
    %206 = vector.broadcast %cst_73 : f32 to vector<8x128xf32>
    %207 = arith.maximumf %206, %205 : vector<8x128xf32>
    %208 = vector.broadcast %cst_74 : f32 to vector<8x128xf32>
    %209 = arith.minimumf %208, %207 : vector<8x128xf32>
    %c8_75 = arith.constant 8 : index
    %c0_76 = arith.constant 0 : index
    %210 = vector.load %arg15[%c8_75, %c0_76] : memref<64x128xf32, #tpu.memory_space<vmem>>, vector<8x128xf32>
    tpu.vector_store %arg15[%c8_75, %c0_76], %209 {strides = array<i32>} : memref<64x128xf32, #tpu.memory_space<vmem>>, vector<8x128xf32>,
    %211 = arith.truncf %155 : vector<8x128xf32> to vector<8x128xbf16>
    %c0_77 = arith.constant 0 : index
    %c0_78 = arith.constant 0 : index
    %212 = vector.load %arg4[%c0_77, %c0_78] : memref<128x512xbf16, #tpu.memory_space<vmem>>, vector<128x512xbf16>
    %cst_79 = arith.constant dense<0.000000e+00> : vector<8x512xf32>
    %213 = tpu.matmul %211, %212, %cst_79 {dimension_numbers = #tpu.dot_dimension_numbers<[1], [0], [0], [1], [0, 0, 1, 1], [], []>} : vector<8x128xbf16>, vector<128x512xbf16>, vector<8x512xf32> -> vector<8x512xf32>
    %214 = arith.truncf %185 : vector<8x128xf32> to vector<8x128xbf16>
    %c0_80 = arith.constant 0 : index
    %c0_81 = arith.constant 0 : index
    %215 = vector.load %arg7[%c0_80, %c0_81] : memref<128x512xbf16, #tpu.memory_space<vmem>>, vector<128x512xbf16>
    %cst_82 = arith.constant dense<0.000000e+00> : vector<8x512xf32>
    %216 = tpu.matmul %214, %215, %cst_82 {dimension_numbers = #tpu.dot_dimension_numbers<[1], [0], [0], [1], [0, 0, 1, 1], [], []>} : vector<8x128xbf16>, vector<128x512xbf16>, vector<8x512xf32> -> vector<8x512xf32>
    %c16 = arith.constant 16 : index
    %c0_83 = arith.constant 0 : index
    %217 = vector.load %arg14[%c16, %c0_83] : memref<64x512xf32, #tpu.memory_space<vmem>>, vector<8x512xf32>
    %218 = arith.addf %217, %213 : vector<8x512xf32>
    %219 = vector.extract_strided_slice %218 {offsets = [0, 0], sizes = [8, 128], strides = [1, 1]} : vector<8x512xf32> to vector<8x128xf32>
    %220 = arith.negf %219 : vector<8x128xf32>
    %221 = math.exp %220 : vector<8x128xf32>
    %cst_84 = arith.constant 1.000000e+00 : f32
    %222 = vector.broadcast %cst_84 : f32 to vector<8x128xf32>
    %223 = arith.addf %222, %221 : vector<8x128xf32>
    %224 = arith.divf %222, %223 : vector<8x128xf32>
    %225 = vector.extract_strided_slice %218 {offsets = [0, 128], sizes = [8, 128], strides = [1, 1]} : vector<8x512xf32> to vector<8x128xf32>
    %226 = arith.negf %225 : vector<8x128xf32>
    %227 = math.exp %226 : vector<8x128xf32>
    %cst_85 = arith.constant 1.000000e+00 : f32
    %228 = vector.broadcast %cst_85 : f32 to vector<8x128xf32>
    %229 = arith.addf %228, %227 : vector<8x128xf32>
    %230 = arith.divf %228, %229 : vector<8x128xf32>
    %231 = vector.extract_strided_slice %218 {offsets = [0, 256], sizes = [8, 128], strides = [1, 1]} : vector<8x512xf32> to vector<8x128xf32>
    %232 = math.tanh %231 : vector<8x128xf32>
    %233 = vector.extract_strided_slice %218 {offsets = [0, 384], sizes = [8, 128], strides = [1, 1]} : vector<8x512xf32> to vector<8x128xf32>
    %234 = arith.negf %233 : vector<8x128xf32>
    %235 = math.exp %234 : vector<8x128xf32>
    %cst_86 = arith.constant 1.000000e+00 : f32
    %236 = vector.broadcast %cst_86 : f32 to vector<8x128xf32>
    %237 = arith.addf %236, %235 : vector<8x128xf32>
    %238 = arith.divf %236, %237 : vector<8x128xf32>
    %239 = arith.mulf %230, %153 : vector<8x128xf32>
    %240 = arith.mulf %224, %232 : vector<8x128xf32>
    %241 = arith.addf %239, %240 : vector<8x128xf32>
    %242 = math.tanh %241 : vector<8x128xf32>
    %243 = arith.mulf %238, %242 : vector<8x128xf32>
    %244 = arith.truncf %243 : vector<8x128xf32> to vector<8x128xbf16>
    %c0_87 = arith.constant 0 : index
    %c0_88 = arith.constant 0 : index
    %245 = vector.load %arg6[%c0_87, %c0_88] : memref<128x512xbf16, #tpu.memory_space<vmem>>, vector<128x512xbf16>
    %cst_89 = arith.constant dense<0.000000e+00> : vector<8x512xf32>
    %246 = tpu.matmul %244, %245, %cst_89 {dimension_numbers = #tpu.dot_dimension_numbers<[1], [0], [0], [1], [0, 0, 1, 1], [], []>} : vector<8x128xbf16>, vector<128x512xbf16>, vector<8x512xf32> -> vector<8x512xf32>
    %247 = arith.addf %246, %216 : vector<8x512xf32>
    %248 = arith.addf %247, %13 : vector<8x512xf32>
    %249 = vector.extract_strided_slice %248 {offsets = [0, 0], sizes = [8, 128], strides = [1, 1]} : vector<8x512xf32> to vector<8x128xf32>
    %250 = arith.negf %249 : vector<8x128xf32>
    %251 = math.exp %250 : vector<8x128xf32>
    %cst_90 = arith.constant 1.000000e+00 : f32
    %252 = vector.broadcast %cst_90 : f32 to vector<8x128xf32>
    %253 = arith.addf %252, %251 : vector<8x128xf32>
    %254 = arith.divf %252, %253 : vector<8x128xf32>
    %255 = vector.extract_strided_slice %248 {offsets = [0, 128], sizes = [8, 128], strides = [1, 1]} : vector<8x512xf32> to vector<8x128xf32>
    %256 = arith.negf %255 : vector<8x128xf32>
    %257 = math.exp %256 : vector<8x128xf32>
    %cst_91 = arith.constant 1.000000e+00 : f32
    %258 = vector.broadcast %cst_91 : f32 to vector<8x128xf32>
    %259 = arith.addf %258, %257 : vector<8x128xf32>
    %260 = arith.divf %258, %259 : vector<8x128xf32>
    %261 = vector.extract_strided_slice %248 {offsets = [0, 256], sizes = [8, 128], strides = [1, 1]} : vector<8x512xf32> to vector<8x128xf32>
    %262 = math.tanh %261 : vector<8x128xf32>
    %263 = vector.extract_strided_slice %248 {offsets = [0, 384], sizes = [8, 128], strides = [1, 1]} : vector<8x512xf32> to vector<8x128xf32>
    %264 = arith.negf %263 : vector<8x128xf32>
    %265 = math.exp %264 : vector<8x128xf32>
    %cst_92 = arith.constant 1.000000e+00 : f32
    %266 = vector.broadcast %cst_92 : f32 to vector<8x128xf32>
    %267 = arith.addf %266, %265 : vector<8x128xf32>
    %268 = arith.divf %266, %267 : vector<8x128xf32>
    %269 = arith.mulf %260, %183 : vector<8x128xf32>
    %270 = arith.mulf %254, %262 : vector<8x128xf32>
    %271 = arith.addf %269, %270 : vector<8x128xf32>
    %272 = math.tanh %271 : vector<8x128xf32>
    %273 = arith.mulf %268, %272 : vector<8x128xf32>
    %274 = arith.mulf %273, %26 : vector<8x128xf32>
    %cst_93 = arith.constant dense<0.000000e+00> : vector<8xf32>
    %275 = vector.multi_reduction <add>, %274, %cst_93 [1] : vector<8x128xf32> to vector<8xf32>
    %276 = vector.shape_cast %275 : vector<8xf32> to vector<8x1xf32>
    %cst_94 = arith.constant 3.125000e-02 : f32
    %277 = vector.broadcast %cst_94 : f32 to vector<8x1xf32>
    %278 = arith.mulf %276, %277 : vector<8x1xf32>
    %279 = vector.broadcast %278 : vector<8x1xf32> to vector<8x128xf32>
    %280 = arith.subf %273, %279 : vector<8x128xf32>
    %281 = arith.mulf %280, %26 : vector<8x128xf32>
    %282 = arith.mulf %281, %281 : vector<8x128xf32>
    %cst_95 = arith.constant dense<0.000000e+00> : vector<8xf32>
    %283 = vector.multi_reduction <add>, %282, %cst_95 [1] : vector<8x128xf32> to vector<8xf32>
    %284 = vector.shape_cast %283 : vector<8xf32> to vector<8x1xf32>
    %cst_96 = arith.constant 3.125000e-02 : f32
    %285 = vector.broadcast %cst_96 : f32 to vector<8x1xf32>
    %286 = arith.mulf %284, %285 : vector<8x1xf32>
    %cst_97 = arith.constant 9.99999974E-6 : f32
    %287 = vector.broadcast %cst_97 : f32 to vector<8x1xf32>
    %288 = arith.addf %286, %287 : vector<8x1xf32>
    %289 = math.rsqrt %288 : vector<8x1xf32>
    %290 = vector.broadcast %289 : vector<8x1xf32> to vector<8x128xf32>
    %291 = arith.mulf %281, %290 : vector<8x128xf32>
    %292 = arith.mulf %291, %16 : vector<8x128xf32>
    %293 = arith.addf %292, %19 : vector<8x128xf32>
    %cst_98 = arith.constant -1.000000e+02 : f32
    %cst_99 = arith.constant 1.000000e+02 : f32
    %294 = vector.broadcast %cst_98 : f32 to vector<8x128xf32>
    %295 = arith.maximumf %294, %293 : vector<8x128xf32>
    %296 = vector.broadcast %cst_99 : f32 to vector<8x128xf32>
    %297 = arith.minimumf %296, %295 : vector<8x128xf32>
    %c16_100 = arith.constant 16 : index
    %c0_101 = arith.constant 0 : index
    %298 = vector.load %arg15[%c16_100, %c0_101] : memref<64x128xf32, #tpu.memory_space<vmem>>, vector<8x128xf32>
    tpu.vector_store %arg15[%c16_100, %c0_101], %297 {strides = array<i32>} : memref<64x128xf32, #tpu.memory_space<vmem>>, vector<8x128xf32>,
    %299 = arith.truncf %243 : vector<8x128xf32> to vector<8x128xbf16>
    %c0_102 = arith.constant 0 : index
    %c0_103 = arith.constant 0 : index
    %300 = vector.load %arg4[%c0_102, %c0_103] : memref<128x512xbf16, #tpu.memory_space<vmem>>, vector<128x512xbf16>
    %cst_104 = arith.constant dense<0.000000e+00> : vector<8x512xf32>
    %301 = tpu.matmul %299, %300, %cst_104 {dimension_numbers = #tpu.dot_dimension_numbers<[1], [0], [0], [1], [0, 0, 1, 1], [], []>} : vector<8x128xbf16>, vector<128x512xbf16>, vector<8x512xf32> -> vector<8x512xf32>
    %302 = arith.truncf %273 : vector<8x128xf32> to vector<8x128xbf16>
    %c0_105 = arith.constant 0 : index
    %c0_106 = arith.constant 0 : index
    %303 = vector.load %arg7[%c0_105, %c0_106] : memref<128x512xbf16, #tpu.memory_space<vmem>>, vector<128x512xbf16>
    %cst_107 = arith.constant dense<0.000000e+00> : vector<8x512xf32>
    %304 = tpu.matmul %302, %303, %cst_107 {dimension_numbers = #tpu.dot_dimension_numbers<[1], [0], [0], [1], [0, 0, 1, 1], [], []>} : vector<8x128xbf16>, vector<128x512xbf16>, vector<8x512xf32> -> vector<8x512xf32>
    %c24 = arith.constant 24 : index
    %c0_108 = arith.constant 0 : index
    %305 = vector.load %arg14[%c24, %c0_108] : memref<64x512xf32, #tpu.memory_space<vmem>>, vector<8x512xf32>
    %306 = arith.addf %305, %301 : vector<8x512xf32>
    %307 = vector.extract_strided_slice %306 {offsets = [0, 0], sizes = [8, 128], strides = [1, 1]} : vector<8x512xf32> to vector<8x128xf32>
    %308 = arith.negf %307 : vector<8x128xf32>
    %309 = math.exp %308 : vector<8x128xf32>
    %cst_109 = arith.constant 1.000000e+00 : f32
    %310 = vector.broadcast %cst_109 : f32 to vector<8x128xf32>
    %311 = arith.addf %310, %309 : vector<8x128xf32>
    %312 = arith.divf %310, %311 : vector<8x128xf32>
    %313 = vector.extract_strided_slice %306 {offsets = [0, 128], sizes = [8, 128], strides = [1, 1]} : vector<8x512xf32> to vector<8x128xf32>
    %314 = arith.negf %313 : vector<8x128xf32>
    %315 = math.exp %314 : vector<8x128xf32>
    %cst_110 = arith.constant 1.000000e+00 : f32
    %316 = vector.broadcast %cst_110 : f32 to vector<8x128xf32>
    %317 = arith.addf %316, %315 : vector<8x128xf32>
    %318 = arith.divf %316, %317 : vector<8x128xf32>
    %319 = vector.extract_strided_slice %306 {offsets = [0, 256], sizes = [8, 128], strides = [1, 1]} : vector<8x512xf32> to vector<8x128xf32>
    %320 = math.tanh %319 : vector<8x128xf32>
    %321 = vector.extract_strided_slice %306 {offsets = [0, 384], sizes = [8, 128], strides = [1, 1]} : vector<8x512xf32> to vector<8x128xf32>
    %322 = arith.negf %321 : vector<8x128xf32>
    %323 = math.exp %322 : vector<8x128xf32>
    %cst_111 = arith.constant 1.000000e+00 : f32
    %324 = vector.broadcast %cst_111 : f32 to vector<8x128xf32>
    %325 = arith.addf %324, %323 : vector<8x128xf32>
    %326 = arith.divf %324, %325 : vector<8x128xf32>
    %327 = arith.mulf %318, %241 : vector<8x128xf32>
    %328 = arith.mulf %312, %320 : vector<8x128xf32>
    %329 = arith.addf %327, %328 : vector<8x128xf32>
    %330 = math.tanh %329 : vector<8x128xf32>
    %331 = arith.mulf %326, %330 : vector<8x128xf32>
    %332 = arith.truncf %331 : vector<8x128xf32> to vector<8x128xbf16>
    %c0_112 = arith.constant 0 : index
    %c0_113 = arith.constant 0 : index
    %333 = vector.load %arg6[%c0_112, %c0_113] : memref<128x512xbf16, #tpu.memory_space<vmem>>, vector<128x512xbf16>
    %cst_114 = arith.constant dense<0.000000e+00> : vector<8x512xf32>
    %334 = tpu.matmul %332, %333, %cst_114 {dimension_numbers = #tpu.dot_dimension_numbers<[1], [0], [0], [1], [0, 0, 1, 1], [], []>} : vector<8x128xbf16>, vector<128x512xbf16>, vector<8x512xf32> -> vector<8x512xf32>
    %335 = arith.addf %334, %304 : vector<8x512xf32>
    %336 = arith.addf %335, %13 : vector<8x512xf32>
    %337 = vector.extract_strided_slice %336 {offsets = [0, 0], sizes = [8, 128], strides = [1, 1]} : vector<8x512xf32> to vector<8x128xf32>
    %338 = arith.negf %337 : vector<8x128xf32>
    %339 = math.exp %338 : vector<8x128xf32>
    %cst_115 = arith.constant 1.000000e+00 : f32
    %340 = vector.broadcast %cst_115 : f32 to vector<8x128xf32>
    %341 = arith.addf %340, %339 : vector<8x128xf32>
    %342 = arith.divf %340, %341 : vector<8x128xf32>
    %343 = vector.extract_strided_slice %336 {offsets = [0, 128], sizes = [8, 128], strides = [1, 1]} : vector<8x512xf32> to vector<8x128xf32>
    %344 = arith.negf %343 : vector<8x128xf32>
    %345 = math.exp %344 : vector<8x128xf32>
    %cst_116 = arith.constant 1.000000e+00 : f32
    %346 = vector.broadcast %cst_116 : f32 to vector<8x128xf32>
    %347 = arith.addf %346, %345 : vector<8x128xf32>
    %348 = arith.divf %346, %347 : vector<8x128xf32>
    %349 = vector.extract_strided_slice %336 {offsets = [0, 256], sizes = [8, 128], strides = [1, 1]} : vector<8x512xf32> to vector<8x128xf32>
    %350 = math.tanh %349 : vector<8x128xf32>
    %351 = vector.extract_strided_slice %336 {offsets = [0, 384], sizes = [8, 128], strides = [1, 1]} : vector<8x512xf32> to vector<8x128xf32>
    %352 = arith.negf %351 : vector<8x128xf32>
    %353 = math.exp %352 : vector<8x128xf32>
    %cst_117 = arith.constant 1.000000e+00 : f32
    %354 = vector.broadcast %cst_117 : f32 to vector<8x128xf32>
    %355 = arith.addf %354, %353 : vector<8x128xf32>
    %356 = arith.divf %354, %355 : vector<8x128xf32>
    %357 = arith.mulf %348, %271 : vector<8x128xf32>
    %358 = arith.mulf %342, %350 : vector<8x128xf32>
    %359 = arith.addf %357, %358 : vector<8x128xf32>
    %360 = math.tanh %359 : vector<8x128xf32>
    %361 = arith.mulf %356, %360 : vector<8x128xf32>
    %362 = arith.mulf %361, %26 : vector<8x128xf32>
    %cst_118 = arith.constant dense<0.000000e+00> : vector<8xf32>
    %363 = vector.multi_reduction <add>, %362, %cst_118 [1] : vector<8x128xf32> to vector<8xf32>
    %364 = vector.shape_cast %363 : vector<8xf32> to vector<8x1xf32>
    %cst_119 = arith.constant 3.125000e-02 : f32
    %365 = vector.broadcast %cst_119 : f32 to vector<8x1xf32>
    %366 = arith.mulf %364, %365 : vector<8x1xf32>
    %367 = vector.broadcast %366 : vector<8x1xf32> to vector<8x128xf32>
    %368 = arith.subf %361, %367 : vector<8x128xf32>
    %369 = arith.mulf %368, %26 : vector<8x128xf32>
    %370 = arith.mulf %369, %369 : vector<8x128xf32>
    %cst_120 = arith.constant dense<0.000000e+00> : vector<8xf32>
    %371 = vector.multi_reduction <add>, %370, %cst_120 [1] : vector<8x128xf32> to vector<8xf32>
    %372 = vector.shape_cast %371 : vector<8xf32> to vector<8x1xf32>
    %cst_121 = arith.constant 3.125000e-02 : f32
    %373 = vector.broadcast %cst_121 : f32 to vector<8x1xf32>
    %374 = arith.mulf %372, %373 : vector<8x1xf32>
    %cst_122 = arith.constant 9.99999974E-6 : f32
    %375 = vector.broadcast %cst_122 : f32 to vector<8x1xf32>
    %376 = arith.addf %374, %375 : vector<8x1xf32>
    %377 = math.rsqrt %376 : vector<8x1xf32>
    %378 = vector.broadcast %377 : vector<8x1xf32> to vector<8x128xf32>
    %379 = arith.mulf %369, %378 : vector<8x128xf32>
    %380 = arith.mulf %379, %16 : vector<8x128xf32>
    %381 = arith.addf %380, %19 : vector<8x128xf32>
    %cst_123 = arith.constant -1.000000e+02 : f32
    %cst_124 = arith.constant 1.000000e+02 : f32
    %382 = vector.broadcast %cst_123 : f32 to vector<8x128xf32>
    %383 = arith.maximumf %382, %381 : vector<8x128xf32>
    %384 = vector.broadcast %cst_124 : f32 to vector<8x128xf32>
    %385 = arith.minimumf %384, %383 : vector<8x128xf32>
    %c24_125 = arith.constant 24 : index
    %c0_126 = arith.constant 0 : index
    %386 = vector.load %arg15[%c24_125, %c0_126] : memref<64x128xf32, #tpu.memory_space<vmem>>, vector<8x128xf32>
    tpu.vector_store %arg15[%c24_125, %c0_126], %385 {strides = array<i32>} : memref<64x128xf32, #tpu.memory_space<vmem>>, vector<8x128xf32>,
    %387 = arith.truncf %331 : vector<8x128xf32> to vector<8x128xbf16>
    %c0_127 = arith.constant 0 : index
    %c0_128 = arith.constant 0 : index
    %388 = vector.load %arg4[%c0_127, %c0_128] : memref<128x512xbf16, #tpu.memory_space<vmem>>, vector<128x512xbf16>
    %cst_129 = arith.constant dense<0.000000e+00> : vector<8x512xf32>
    %389 = tpu.matmul %387, %388, %cst_129 {dimension_numbers = #tpu.dot_dimension_numbers<[1], [0], [0], [1], [0, 0, 1, 1], [], []>} : vector<8x128xbf16>, vector<128x512xbf16>, vector<8x512xf32> -> vector<8x512xf32>
    %390 = arith.truncf %361 : vector<8x128xf32> to vector<8x128xbf16>
    %c0_130 = arith.constant 0 : index
    %c0_131 = arith.constant 0 : index
    %391 = vector.load %arg7[%c0_130, %c0_131] : memref<128x512xbf16, #tpu.memory_space<vmem>>, vector<128x512xbf16>
    %cst_132 = arith.constant dense<0.000000e+00> : vector<8x512xf32>
    %392 = tpu.matmul %390, %391, %cst_132 {dimension_numbers = #tpu.dot_dimension_numbers<[1], [0], [0], [1], [0, 0, 1, 1], [], []>} : vector<8x128xbf16>, vector<128x512xbf16>, vector<8x512xf32> -> vector<8x512xf32>
    %c32 = arith.constant 32 : index
    %c0_133 = arith.constant 0 : index
    %393 = vector.load %arg14[%c32, %c0_133] : memref<64x512xf32, #tpu.memory_space<vmem>>, vector<8x512xf32>
    %394 = arith.addf %393, %389 : vector<8x512xf32>
    %395 = vector.extract_strided_slice %394 {offsets = [0, 0], sizes = [8, 128], strides = [1, 1]} : vector<8x512xf32> to vector<8x128xf32>
    %396 = arith.negf %395 : vector<8x128xf32>
    %397 = math.exp %396 : vector<8x128xf32>
    %cst_134 = arith.constant 1.000000e+00 : f32
    %398 = vector.broadcast %cst_134 : f32 to vector<8x128xf32>
    %399 = arith.addf %398, %397 : vector<8x128xf32>
    %400 = arith.divf %398, %399 : vector<8x128xf32>
    %401 = vector.extract_strided_slice %394 {offsets = [0, 128], sizes = [8, 128], strides = [1, 1]} : vector<8x512xf32> to vector<8x128xf32>
    %402 = arith.negf %401 : vector<8x128xf32>
    %403 = math.exp %402 : vector<8x128xf32>
    %cst_135 = arith.constant 1.000000e+00 : f32
    %404 = vector.broadcast %cst_135 : f32 to vector<8x128xf32>
    %405 = arith.addf %404, %403 : vector<8x128xf32>
    %406 = arith.divf %404, %405 : vector<8x128xf32>
    %407 = vector.extract_strided_slice %394 {offsets = [0, 256], sizes = [8, 128], strides = [1, 1]} : vector<8x512xf32> to vector<8x128xf32>
    %408 = math.tanh %407 : vector<8x128xf32>
    %409 = vector.extract_strided_slice %394 {offsets = [0, 384], sizes = [8, 128], strides = [1, 1]} : vector<8x512xf32> to vector<8x128xf32>
    %410 = arith.negf %409 : vector<8x128xf32>
    %411 = math.exp %410 : vector<8x128xf32>
    %cst_136 = arith.constant 1.000000e+00 : f32
    %412 = vector.broadcast %cst_136 : f32 to vector<8x128xf32>
    %413 = arith.addf %412, %411 : vector<8x128xf32>
    %414 = arith.divf %412, %413 : vector<8x128xf32>
    %415 = arith.mulf %406, %329 : vector<8x128xf32>
    %416 = arith.mulf %400, %408 : vector<8x128xf32>
    %417 = arith.addf %415, %416 : vector<8x128xf32>
    %418 = math.tanh %417 : vector<8x128xf32>
    %419 = arith.mulf %414, %418 : vector<8x128xf32>
    %420 = arith.truncf %419 : vector<8x128xf32> to vector<8x128xbf16>
    %c0_137 = arith.constant 0 : index
    %c0_138 = arith.constant 0 : index
    %421 = vector.load %arg6[%c0_137, %c0_138] : memref<128x512xbf16, #tpu.memory_space<vmem>>, vector<128x512xbf16>
    %cst_139 = arith.constant dense<0.000000e+00> : vector<8x512xf32>
    %422 = tpu.matmul %420, %421, %cst_139 {dimension_numbers = #tpu.dot_dimension_numbers<[1], [0], [0], [1], [0, 0, 1, 1], [], []>} : vector<8x128xbf16>, vector<128x512xbf16>, vector<8x512xf32> -> vector<8x512xf32>
    %423 = arith.addf %422, %392 : vector<8x512xf32>
    %424 = arith.addf %423, %13 : vector<8x512xf32>
    %425 = vector.extract_strided_slice %424 {offsets = [0, 0], sizes = [8, 128], strides = [1, 1]} : vector<8x512xf32> to vector<8x128xf32>
    %426 = arith.negf %425 : vector<8x128xf32>
    %427 = math.exp %426 : vector<8x128xf32>
    %cst_140 = arith.constant 1.000000e+00 : f32
    %428 = vector.broadcast %cst_140 : f32 to vector<8x128xf32>
    %429 = arith.addf %428, %427 : vector<8x128xf32>
    %430 = arith.divf %428, %429 : vector<8x128xf32>
    %431 = vector.extract_strided_slice %424 {offsets = [0, 128], sizes = [8, 128], strides = [1, 1]} : vector<8x512xf32> to vector<8x128xf32>
    %432 = arith.negf %431 : vector<8x128xf32>
    %433 = math.exp %432 : vector<8x128xf32>
    %cst_141 = arith.constant 1.000000e+00 : f32
    %434 = vector.broadcast %cst_141 : f32 to vector<8x128xf32>
    %435 = arith.addf %434, %433 : vector<8x128xf32>
    %436 = arith.divf %434, %435 : vector<8x128xf32>
    %437 = vector.extract_strided_slice %424 {offsets = [0, 256], sizes = [8, 128], strides = [1, 1]} : vector<8x512xf32> to vector<8x128xf32>
    %438 = math.tanh %437 : vector<8x128xf32>
    %439 = vector.extract_strided_slice %424 {offsets = [0, 384], sizes = [8, 128], strides = [1, 1]} : vector<8x512xf32> to vector<8x128xf32>
    %440 = arith.negf %439 : vector<8x128xf32>
    %441 = math.exp %440 : vector<8x128xf32>
    %cst_142 = arith.constant 1.000000e+00 : f32
    %442 = vector.broadcast %cst_142 : f32 to vector<8x128xf32>
    %443 = arith.addf %442, %441 : vector<8x128xf32>
    %444 = arith.divf %442, %443 : vector<8x128xf32>
    %445 = arith.mulf %436, %359 : vector<8x128xf32>
    %446 = arith.mulf %430, %438 : vector<8x128xf32>
    %447 = arith.addf %445, %446 : vector<8x128xf32>
    %448 = math.tanh %447 : vector<8x128xf32>
    %449 = arith.mulf %444, %448 : vector<8x128xf32>
    %450 = arith.mulf %449, %26 : vector<8x128xf32>
    %cst_143 = arith.constant dense<0.000000e+00> : vector<8xf32>
    %451 = vector.multi_reduction <add>, %450, %cst_143 [1] : vector<8x128xf32> to vector<8xf32>
    %452 = vector.shape_cast %451 : vector<8xf32> to vector<8x1xf32>
    %cst_144 = arith.constant 3.125000e-02 : f32
    %453 = vector.broadcast %cst_144 : f32 to vector<8x1xf32>
    %454 = arith.mulf %452, %453 : vector<8x1xf32>
    %455 = vector.broadcast %454 : vector<8x1xf32> to vector<8x128xf32>
    %456 = arith.subf %449, %455 : vector<8x128xf32>
    %457 = arith.mulf %456, %26 : vector<8x128xf32>
    %458 = arith.mulf %457, %457 : vector<8x128xf32>
    %cst_145 = arith.constant dense<0.000000e+00> : vector<8xf32>
    %459 = vector.multi_reduction <add>, %458, %cst_145 [1] : vector<8x128xf32> to vector<8xf32>
    %460 = vector.shape_cast %459 : vector<8xf32> to vector<8x1xf32>
    %cst_146 = arith.constant 3.125000e-02 : f32
    %461 = vector.broadcast %cst_146 : f32 to vector<8x1xf32>
    %462 = arith.mulf %460, %461 : vector<8x1xf32>
    %cst_147 = arith.constant 9.99999974E-6 : f32
    %463 = vector.broadcast %cst_147 : f32 to vector<8x1xf32>
    %464 = arith.addf %462, %463 : vector<8x1xf32>
    %465 = math.rsqrt %464 : vector<8x1xf32>
    %466 = vector.broadcast %465 : vector<8x1xf32> to vector<8x128xf32>
    %467 = arith.mulf %457, %466 : vector<8x128xf32>
    %468 = arith.mulf %467, %16 : vector<8x128xf32>
    %469 = arith.addf %468, %19 : vector<8x128xf32>
    %cst_148 = arith.constant -1.000000e+02 : f32
    %cst_149 = arith.constant 1.000000e+02 : f32
    %470 = vector.broadcast %cst_148 : f32 to vector<8x128xf32>
    %471 = arith.maximumf %470, %469 : vector<8x128xf32>
    %472 = vector.broadcast %cst_149 : f32 to vector<8x128xf32>
    %473 = arith.minimumf %472, %471 : vector<8x128xf32>
    %c32_150 = arith.constant 32 : index
    %c0_151 = arith.constant 0 : index
    %474 = vector.load %arg15[%c32_150, %c0_151] : memref<64x128xf32, #tpu.memory_space<vmem>>, vector<8x128xf32>
    tpu.vector_store %arg15[%c32_150, %c0_151], %473 {strides = array<i32>} : memref<64x128xf32, #tpu.memory_space<vmem>>, vector<8x128xf32>,
    %475 = arith.truncf %419 : vector<8x128xf32> to vector<8x128xbf16>
    %c0_152 = arith.constant 0 : index
    %c0_153 = arith.constant 0 : index
    %476 = vector.load %arg4[%c0_152, %c0_153] : memref<128x512xbf16, #tpu.memory_space<vmem>>, vector<128x512xbf16>
    %cst_154 = arith.constant dense<0.000000e+00> : vector<8x512xf32>
    %477 = tpu.matmul %475, %476, %cst_154 {dimension_numbers = #tpu.dot_dimension_numbers<[1], [0], [0], [1], [0, 0, 1, 1], [], []>} : vector<8x128xbf16>, vector<128x512xbf16>, vector<8x512xf32> -> vector<8x512xf32>
    %478 = arith.truncf %449 : vector<8x128xf32> to vector<8x128xbf16>
    %c0_155 = arith.constant 0 : index
    %c0_156 = arith.constant 0 : index
    %479 = vector.load %arg7[%c0_155, %c0_156] : memref<128x512xbf16, #tpu.memory_space<vmem>>, vector<128x512xbf16>
    %cst_157 = arith.constant dense<0.000000e+00> : vector<8x512xf32>
    %480 = tpu.matmul %478, %479, %cst_157 {dimension_numbers = #tpu.dot_dimension_numbers<[1], [0], [0], [1], [0, 0, 1, 1], [], []>} : vector<8x128xbf16>, vector<128x512xbf16>, vector<8x512xf32> -> vector<8x512xf32>
    %c40 = arith.constant 40 : index
    %c0_158 = arith.constant 0 : index
    %481 = vector.load %arg14[%c40, %c0_158] : memref<64x512xf32, #tpu.memory_space<vmem>>, vector<8x512xf32>
    %482 = arith.addf %481, %477 : vector<8x512xf32>
    %483 = vector.extract_strided_slice %482 {offsets = [0, 0], sizes = [8, 128], strides = [1, 1]} : vector<8x512xf32> to vector<8x128xf32>
    %484 = arith.negf %483 : vector<8x128xf32>
    %485 = math.exp %484 : vector<8x128xf32>
    %cst_159 = arith.constant 1.000000e+00 : f32
    %486 = vector.broadcast %cst_159 : f32 to vector<8x128xf32>
    %487 = arith.addf %486, %485 : vector<8x128xf32>
    %488 = arith.divf %486, %487 : vector<8x128xf32>
    %489 = vector.extract_strided_slice %482 {offsets = [0, 128], sizes = [8, 128], strides = [1, 1]} : vector<8x512xf32> to vector<8x128xf32>
    %490 = arith.negf %489 : vector<8x128xf32>
    %491 = math.exp %490 : vector<8x128xf32>
    %cst_160 = arith.constant 1.000000e+00 : f32
    %492 = vector.broadcast %cst_160 : f32 to vector<8x128xf32>
    %493 = arith.addf %492, %491 : vector<8x128xf32>
    %494 = arith.divf %492, %493 : vector<8x128xf32>
    %495 = vector.extract_strided_slice %482 {offsets = [0, 256], sizes = [8, 128], strides = [1, 1]} : vector<8x512xf32> to vector<8x128xf32>
    %496 = math.tanh %495 : vector<8x128xf32>
    %497 = vector.extract_strided_slice %482 {offsets = [0, 384], sizes = [8, 128], strides = [1, 1]} : vector<8x512xf32> to vector<8x128xf32>
    %498 = arith.negf %497 : vector<8x128xf32>
    %499 = math.exp %498 : vector<8x128xf32>
    %cst_161 = arith.constant 1.000000e+00 : f32
    %500 = vector.broadcast %cst_161 : f32 to vector<8x128xf32>
    %501 = arith.addf %500, %499 : vector<8x128xf32>
    %502 = arith.divf %500, %501 : vector<8x128xf32>
    %503 = arith.mulf %494, %417 : vector<8x128xf32>
    %504 = arith.mulf %488, %496 : vector<8x128xf32>
    %505 = arith.addf %503, %504 : vector<8x128xf32>
    %506 = math.tanh %505 : vector<8x128xf32>
    %507 = arith.mulf %502, %506 : vector<8x128xf32>
    %508 = arith.truncf %507 : vector<8x128xf32> to vector<8x128xbf16>
    %c0_162 = arith.constant 0 : index
    %c0_163 = arith.constant 0 : index
    %509 = vector.load %arg6[%c0_162, %c0_163] : memref<128x512xbf16, #tpu.memory_space<vmem>>, vector<128x512xbf16>
    %cst_164 = arith.constant dense<0.000000e+00> : vector<8x512xf32>
    %510 = tpu.matmul %508, %509, %cst_164 {dimension_numbers = #tpu.dot_dimension_numbers<[1], [0], [0], [1], [0, 0, 1, 1], [], []>} : vector<8x128xbf16>, vector<128x512xbf16>, vector<8x512xf32> -> vector<8x512xf32>
    %511 = arith.addf %510, %480 : vector<8x512xf32>
    %512 = arith.addf %511, %13 : vector<8x512xf32>
    %513 = vector.extract_strided_slice %512 {offsets = [0, 0], sizes = [8, 128], strides = [1, 1]} : vector<8x512xf32> to vector<8x128xf32>
    %514 = arith.negf %513 : vector<8x128xf32>
    %515 = math.exp %514 : vector<8x128xf32>
    %cst_165 = arith.constant 1.000000e+00 : f32
    %516 = vector.broadcast %cst_165 : f32 to vector<8x128xf32>
    %517 = arith.addf %516, %515 : vector<8x128xf32>
    %518 = arith.divf %516, %517 : vector<8x128xf32>
    %519 = vector.extract_strided_slice %512 {offsets = [0, 128], sizes = [8, 128], strides = [1, 1]} : vector<8x512xf32> to vector<8x128xf32>
    %520 = arith.negf %519 : vector<8x128xf32>
    %521 = math.exp %520 : vector<8x128xf32>
    %cst_166 = arith.constant 1.000000e+00 : f32
    %522 = vector.broadcast %cst_166 : f32 to vector<8x128xf32>
    %523 = arith.addf %522, %521 : vector<8x128xf32>
    %524 = arith.divf %522, %523 : vector<8x128xf32>
    %525 = vector.extract_strided_slice %512 {offsets = [0, 256], sizes = [8, 128], strides = [1, 1]} : vector<8x512xf32> to vector<8x128xf32>
    %526 = math.tanh %525 : vector<8x128xf32>
    %527 = vector.extract_strided_slice %512 {offsets = [0, 384], sizes = [8, 128], strides = [1, 1]} : vector<8x512xf32> to vector<8x128xf32>
    %528 = arith.negf %527 : vector<8x128xf32>
    %529 = math.exp %528 : vector<8x128xf32>
    %cst_167 = arith.constant 1.000000e+00 : f32
    %530 = vector.broadcast %cst_167 : f32 to vector<8x128xf32>
    %531 = arith.addf %530, %529 : vector<8x128xf32>
    %532 = arith.divf %530, %531 : vector<8x128xf32>
    %533 = arith.mulf %524, %447 : vector<8x128xf32>
    %534 = arith.mulf %518, %526 : vector<8x128xf32>
    %535 = arith.addf %533, %534 : vector<8x128xf32>
    %536 = math.tanh %535 : vector<8x128xf32>
    %537 = arith.mulf %532, %536 : vector<8x128xf32>
    %538 = arith.mulf %537, %26 : vector<8x128xf32>
    %cst_168 = arith.constant dense<0.000000e+00> : vector<8xf32>
    %539 = vector.multi_reduction <add>, %538, %cst_168 [1] : vector<8x128xf32> to vector<8xf32>
    %540 = vector.shape_cast %539 : vector<8xf32> to vector<8x1xf32>
    %cst_169 = arith.constant 3.125000e-02 : f32
    %541 = vector.broadcast %cst_169 : f32 to vector<8x1xf32>
    %542 = arith.mulf %540, %541 : vector<8x1xf32>
    %543 = vector.broadcast %542 : vector<8x1xf32> to vector<8x128xf32>
    %544 = arith.subf %537, %543 : vector<8x128xf32>
    %545 = arith.mulf %544, %26 : vector<8x128xf32>
    %546 = arith.mulf %545, %545 : vector<8x128xf32>
    %cst_170 = arith.constant dense<0.000000e+00> : vector<8xf32>
    %547 = vector.multi_reduction <add>, %546, %cst_170 [1] : vector<8x128xf32> to vector<8xf32>
    %548 = vector.shape_cast %547 : vector<8xf32> to vector<8x1xf32>
    %cst_171 = arith.constant 3.125000e-02 : f32
    %549 = vector.broadcast %cst_171 : f32 to vector<8x1xf32>
    %550 = arith.mulf %548, %549 : vector<8x1xf32>
    %cst_172 = arith.constant 9.99999974E-6 : f32
    %551 = vector.broadcast %cst_172 : f32 to vector<8x1xf32>
    %552 = arith.addf %550, %551 : vector<8x1xf32>
    %553 = math.rsqrt %552 : vector<8x1xf32>
    %554 = vector.broadcast %553 : vector<8x1xf32> to vector<8x128xf32>
    %555 = arith.mulf %545, %554 : vector<8x128xf32>
    %556 = arith.mulf %555, %16 : vector<8x128xf32>
    %557 = arith.addf %556, %19 : vector<8x128xf32>
    %cst_173 = arith.constant -1.000000e+02 : f32
    %cst_174 = arith.constant 1.000000e+02 : f32
    %558 = vector.broadcast %cst_173 : f32 to vector<8x128xf32>
    %559 = arith.maximumf %558, %557 : vector<8x128xf32>
    %560 = vector.broadcast %cst_174 : f32 to vector<8x128xf32>
    %561 = arith.minimumf %560, %559 : vector<8x128xf32>
    %c40_175 = arith.constant 40 : index
    %c0_176 = arith.constant 0 : index
    %562 = vector.load %arg15[%c40_175, %c0_176] : memref<64x128xf32, #tpu.memory_space<vmem>>, vector<8x128xf32>
    tpu.vector_store %arg15[%c40_175, %c0_176], %561 {strides = array<i32>} : memref<64x128xf32, #tpu.memory_space<vmem>>, vector<8x128xf32>,
    %563 = arith.truncf %507 : vector<8x128xf32> to vector<8x128xbf16>
    %c0_177 = arith.constant 0 : index
    %c0_178 = arith.constant 0 : index
    %564 = vector.load %arg4[%c0_177, %c0_178] : memref<128x512xbf16, #tpu.memory_space<vmem>>, vector<128x512xbf16>
    %cst_179 = arith.constant dense<0.000000e+00> : vector<8x512xf32>
    %565 = tpu.matmul %563, %564, %cst_179 {dimension_numbers = #tpu.dot_dimension_numbers<[1], [0], [0], [1], [0, 0, 1, 1], [], []>} : vector<8x128xbf16>, vector<128x512xbf16>, vector<8x512xf32> -> vector<8x512xf32>
    %566 = arith.truncf %537 : vector<8x128xf32> to vector<8x128xbf16>
    %c0_180 = arith.constant 0 : index
    %c0_181 = arith.constant 0 : index
    %567 = vector.load %arg7[%c0_180, %c0_181] : memref<128x512xbf16, #tpu.memory_space<vmem>>, vector<128x512xbf16>
    %cst_182 = arith.constant dense<0.000000e+00> : vector<8x512xf32>
    %568 = tpu.matmul %566, %567, %cst_182 {dimension_numbers = #tpu.dot_dimension_numbers<[1], [0], [0], [1], [0, 0, 1, 1], [], []>} : vector<8x128xbf16>, vector<128x512xbf16>, vector<8x512xf32> -> vector<8x512xf32>
    %c48 = arith.constant 48 : index
    %c0_183 = arith.constant 0 : index
    %569 = vector.load %arg14[%c48, %c0_183] : memref<64x512xf32, #tpu.memory_space<vmem>>, vector<8x512xf32>
    %570 = arith.addf %569, %565 : vector<8x512xf32>
    %571 = vector.extract_strided_slice %570 {offsets = [0, 0], sizes = [8, 128], strides = [1, 1]} : vector<8x512xf32> to vector<8x128xf32>
    %572 = arith.negf %571 : vector<8x128xf32>
    %573 = math.exp %572 : vector<8x128xf32>
    %cst_184 = arith.constant 1.000000e+00 : f32
    %574 = vector.broadcast %cst_184 : f32 to vector<8x128xf32>
    %575 = arith.addf %574, %573 : vector<8x128xf32>
    %576 = arith.divf %574, %575 : vector<8x128xf32>
    %577 = vector.extract_strided_slice %570 {offsets = [0, 128], sizes = [8, 128], strides = [1, 1]} : vector<8x512xf32> to vector<8x128xf32>
    %578 = arith.negf %577 : vector<8x128xf32>
    %579 = math.exp %578 : vector<8x128xf32>
    %cst_185 = arith.constant 1.000000e+00 : f32
    %580 = vector.broadcast %cst_185 : f32 to vector<8x128xf32>
    %581 = arith.addf %580, %579 : vector<8x128xf32>
    %582 = arith.divf %580, %581 : vector<8x128xf32>
    %583 = vector.extract_strided_slice %570 {offsets = [0, 256], sizes = [8, 128], strides = [1, 1]} : vector<8x512xf32> to vector<8x128xf32>
    %584 = math.tanh %583 : vector<8x128xf32>
    %585 = vector.extract_strided_slice %570 {offsets = [0, 384], sizes = [8, 128], strides = [1, 1]} : vector<8x512xf32> to vector<8x128xf32>
    %586 = arith.negf %585 : vector<8x128xf32>
    %587 = math.exp %586 : vector<8x128xf32>
    %cst_186 = arith.constant 1.000000e+00 : f32
    %588 = vector.broadcast %cst_186 : f32 to vector<8x128xf32>
    %589 = arith.addf %588, %587 : vector<8x128xf32>
    %590 = arith.divf %588, %589 : vector<8x128xf32>
    %591 = arith.mulf %582, %505 : vector<8x128xf32>
    %592 = arith.mulf %576, %584 : vector<8x128xf32>
    %593 = arith.addf %591, %592 : vector<8x128xf32>
    %594 = math.tanh %593 : vector<8x128xf32>
    %595 = arith.mulf %590, %594 : vector<8x128xf32>
    %596 = arith.truncf %595 : vector<8x128xf32> to vector<8x128xbf16>
    %c0_187 = arith.constant 0 : index
    %c0_188 = arith.constant 0 : index
    %597 = vector.load %arg6[%c0_187, %c0_188] : memref<128x512xbf16, #tpu.memory_space<vmem>>, vector<128x512xbf16>
    %cst_189 = arith.constant dense<0.000000e+00> : vector<8x512xf32>
    %598 = tpu.matmul %596, %597, %cst_189 {dimension_numbers = #tpu.dot_dimension_numbers<[1], [0], [0], [1], [0, 0, 1, 1], [], []>} : vector<8x128xbf16>, vector<128x512xbf16>, vector<8x512xf32> -> vector<8x512xf32>
    %599 = arith.addf %598, %568 : vector<8x512xf32>
    %600 = arith.addf %599, %13 : vector<8x512xf32>
    %601 = vector.extract_strided_slice %600 {offsets = [0, 0], sizes = [8, 128], strides = [1, 1]} : vector<8x512xf32> to vector<8x128xf32>
    %602 = arith.negf %601 : vector<8x128xf32>
    %603 = math.exp %602 : vector<8x128xf32>
    %cst_190 = arith.constant 1.000000e+00 : f32
    %604 = vector.broadcast %cst_190 : f32 to vector<8x128xf32>
    %605 = arith.addf %604, %603 : vector<8x128xf32>
    %606 = arith.divf %604, %605 : vector<8x128xf32>
    %607 = vector.extract_strided_slice %600 {offsets = [0, 128], sizes = [8, 128], strides = [1, 1]} : vector<8x512xf32> to vector<8x128xf32>
    %608 = arith.negf %607 : vector<8x128xf32>
    %609 = math.exp %608 : vector<8x128xf32>
    %cst_191 = arith.constant 1.000000e+00 : f32
    %610 = vector.broadcast %cst_191 : f32 to vector<8x128xf32>
    %611 = arith.addf %610, %609 : vector<8x128xf32>
    %612 = arith.divf %610, %611 : vector<8x128xf32>
    %613 = vector.extract_strided_slice %600 {offsets = [0, 256], sizes = [8, 128], strides = [1, 1]} : vector<8x512xf32> to vector<8x128xf32>
    %614 = math.tanh %613 : vector<8x128xf32>
    %615 = vector.extract_strided_slice %600 {offsets = [0, 384], sizes = [8, 128], strides = [1, 1]} : vector<8x512xf32> to vector<8x128xf32>
    %616 = arith.negf %615 : vector<8x128xf32>
    %617 = math.exp %616 : vector<8x128xf32>
    %cst_192 = arith.constant 1.000000e+00 : f32
    %618 = vector.broadcast %cst_192 : f32 to vector<8x128xf32>
    %619 = arith.addf %618, %617 : vector<8x128xf32>
    %620 = arith.divf %618, %619 : vector<8x128xf32>
    %621 = arith.mulf %612, %535 : vector<8x128xf32>
    %622 = arith.mulf %606, %614 : vector<8x128xf32>
    %623 = arith.addf %621, %622 : vector<8x128xf32>
    %624 = math.tanh %623 : vector<8x128xf32>
    %625 = arith.mulf %620, %624 : vector<8x128xf32>
    %626 = arith.mulf %625, %26 : vector<8x128xf32>
    %cst_193 = arith.constant dense<0.000000e+00> : vector<8xf32>
    %627 = vector.multi_reduction <add>, %626, %cst_193 [1] : vector<8x128xf32> to vector<8xf32>
    %628 = vector.shape_cast %627 : vector<8xf32> to vector<8x1xf32>
    %cst_194 = arith.constant 3.125000e-02 : f32
    %629 = vector.broadcast %cst_194 : f32 to vector<8x1xf32>
    %630 = arith.mulf %628, %629 : vector<8x1xf32>
    %631 = vector.broadcast %630 : vector<8x1xf32> to vector<8x128xf32>
    %632 = arith.subf %625, %631 : vector<8x128xf32>
    %633 = arith.mulf %632, %26 : vector<8x128xf32>
    %634 = arith.mulf %633, %633 : vector<8x128xf32>
    %cst_195 = arith.constant dense<0.000000e+00> : vector<8xf32>
    %635 = vector.multi_reduction <add>, %634, %cst_195 [1] : vector<8x128xf32> to vector<8xf32>
    %636 = vector.shape_cast %635 : vector<8xf32> to vector<8x1xf32>
    %cst_196 = arith.constant 3.125000e-02 : f32
    %637 = vector.broadcast %cst_196 : f32 to vector<8x1xf32>
    %638 = arith.mulf %636, %637 : vector<8x1xf32>
    %cst_197 = arith.constant 9.99999974E-6 : f32
    %639 = vector.broadcast %cst_197 : f32 to vector<8x1xf32>
    %640 = arith.addf %638, %639 : vector<8x1xf32>
    %641 = math.rsqrt %640 : vector<8x1xf32>
    %642 = vector.broadcast %641 : vector<8x1xf32> to vector<8x128xf32>
    %643 = arith.mulf %633, %642 : vector<8x128xf32>
    %644 = arith.mulf %643, %16 : vector<8x128xf32>
    %645 = arith.addf %644, %19 : vector<8x128xf32>
    %cst_198 = arith.constant -1.000000e+02 : f32
    %cst_199 = arith.constant 1.000000e+02 : f32
    %646 = vector.broadcast %cst_198 : f32 to vector<8x128xf32>
    %647 = arith.maximumf %646, %645 : vector<8x128xf32>
    %648 = vector.broadcast %cst_199 : f32 to vector<8x128xf32>
    %649 = arith.minimumf %648, %647 : vector<8x128xf32>
    %c48_200 = arith.constant 48 : index
    %c0_201 = arith.constant 0 : index
    %650 = vector.load %arg15[%c48_200, %c0_201] : memref<64x128xf32, #tpu.memory_space<vmem>>, vector<8x128xf32>
    tpu.vector_store %arg15[%c48_200, %c0_201], %649 {strides = array<i32>} : memref<64x128xf32, #tpu.memory_space<vmem>>, vector<8x128xf32>,
    %651 = arith.truncf %595 : vector<8x128xf32> to vector<8x128xbf16>
    %c0_202 = arith.constant 0 : index
    %c0_203 = arith.constant 0 : index
    %652 = vector.load %arg4[%c0_202, %c0_203] : memref<128x512xbf16, #tpu.memory_space<vmem>>, vector<128x512xbf16>
    %cst_204 = arith.constant dense<0.000000e+00> : vector<8x512xf32>
    %653 = tpu.matmul %651, %652, %cst_204 {dimension_numbers = #tpu.dot_dimension_numbers<[1], [0], [0], [1], [0, 0, 1, 1], [], []>} : vector<8x128xbf16>, vector<128x512xbf16>, vector<8x512xf32> -> vector<8x512xf32>
    %654 = arith.truncf %625 : vector<8x128xf32> to vector<8x128xbf16>
    %c0_205 = arith.constant 0 : index
    %c0_206 = arith.constant 0 : index
    %655 = vector.load %arg7[%c0_205, %c0_206] : memref<128x512xbf16, #tpu.memory_space<vmem>>, vector<128x512xbf16>
    %cst_207 = arith.constant dense<0.000000e+00> : vector<8x512xf32>
    %656 = tpu.matmul %654, %655, %cst_207 {dimension_numbers = #tpu.dot_dimension_numbers<[1], [0], [0], [1], [0, 0, 1, 1], [], []>} : vector<8x128xbf16>, vector<128x512xbf16>, vector<8x512xf32> -> vector<8x512xf32>
    %c56 = arith.constant 56 : index
    %c0_208 = arith.constant 0 : index
    %657 = vector.load %arg14[%c56, %c0_208] : memref<64x512xf32, #tpu.memory_space<vmem>>, vector<8x512xf32>
    %658 = arith.addf %657, %653 : vector<8x512xf32>
    %659 = vector.extract_strided_slice %658 {offsets = [0, 0], sizes = [8, 128], strides = [1, 1]} : vector<8x512xf32> to vector<8x128xf32>
    %660 = arith.negf %659 : vector<8x128xf32>
    %661 = math.exp %660 : vector<8x128xf32>
    %cst_209 = arith.constant 1.000000e+00 : f32
    %662 = vector.broadcast %cst_209 : f32 to vector<8x128xf32>
    %663 = arith.addf %662, %661 : vector<8x128xf32>
    %664 = arith.divf %662, %663 : vector<8x128xf32>
    %665 = vector.extract_strided_slice %658 {offsets = [0, 128], sizes = [8, 128], strides = [1, 1]} : vector<8x512xf32> to vector<8x128xf32>
    %666 = arith.negf %665 : vector<8x128xf32>
    %667 = math.exp %666 : vector<8x128xf32>
    %cst_210 = arith.constant 1.000000e+00 : f32
    %668 = vector.broadcast %cst_210 : f32 to vector<8x128xf32>
    %669 = arith.addf %668, %667 : vector<8x128xf32>
    %670 = arith.divf %668, %669 : vector<8x128xf32>
    %671 = vector.extract_strided_slice %658 {offsets = [0, 256], sizes = [8, 128], strides = [1, 1]} : vector<8x512xf32> to vector<8x128xf32>
    %672 = math.tanh %671 : vector<8x128xf32>
    %673 = vector.extract_strided_slice %658 {offsets = [0, 384], sizes = [8, 128], strides = [1, 1]} : vector<8x512xf32> to vector<8x128xf32>
    %674 = arith.negf %673 : vector<8x128xf32>
    %675 = math.exp %674 : vector<8x128xf32>
    %cst_211 = arith.constant 1.000000e+00 : f32
    %676 = vector.broadcast %cst_211 : f32 to vector<8x128xf32>
    %677 = arith.addf %676, %675 : vector<8x128xf32>
    %678 = arith.divf %676, %677 : vector<8x128xf32>
    %679 = arith.mulf %670, %593 : vector<8x128xf32>
    %680 = arith.mulf %664, %672 : vector<8x128xf32>
    %681 = arith.addf %679, %680 : vector<8x128xf32>
    %682 = math.tanh %681 : vector<8x128xf32>
    %683 = arith.mulf %678, %682 : vector<8x128xf32>
    %684 = arith.truncf %683 : vector<8x128xf32> to vector<8x128xbf16>
    %c0_212 = arith.constant 0 : index
    %c0_213 = arith.constant 0 : index
    %685 = vector.load %arg6[%c0_212, %c0_213] : memref<128x512xbf16, #tpu.memory_space<vmem>>, vector<128x512xbf16>
    %cst_214 = arith.constant dense<0.000000e+00> : vector<8x512xf32>
    %686 = tpu.matmul %684, %685, %cst_214 {dimension_numbers = #tpu.dot_dimension_numbers<[1], [0], [0], [1], [0, 0, 1, 1], [], []>} : vector<8x128xbf16>, vector<128x512xbf16>, vector<8x512xf32> -> vector<8x512xf32>
    %687 = arith.addf %686, %656 : vector<8x512xf32>
    %688 = arith.addf %687, %13 : vector<8x512xf32>
    %689 = vector.extract_strided_slice %688 {offsets = [0, 0], sizes = [8, 128], strides = [1, 1]} : vector<8x512xf32> to vector<8x128xf32>
    %690 = arith.negf %689 : vector<8x128xf32>
    %691 = math.exp %690 : vector<8x128xf32>
    %cst_215 = arith.constant 1.000000e+00 : f32
    %692 = vector.broadcast %cst_215 : f32 to vector<8x128xf32>
    %693 = arith.addf %692, %691 : vector<8x128xf32>
    %694 = arith.divf %692, %693 : vector<8x128xf32>
    %695 = vector.extract_strided_slice %688 {offsets = [0, 128], sizes = [8, 128], strides = [1, 1]} : vector<8x512xf32> to vector<8x128xf32>
    %696 = arith.negf %695 : vector<8x128xf32>
    %697 = math.exp %696 : vector<8x128xf32>
    %cst_216 = arith.constant 1.000000e+00 : f32
    %698 = vector.broadcast %cst_216 : f32 to vector<8x128xf32>
    %699 = arith.addf %698, %697 : vector<8x128xf32>
    %700 = arith.divf %698, %699 : vector<8x128xf32>
    %701 = vector.extract_strided_slice %688 {offsets = [0, 256], sizes = [8, 128], strides = [1, 1]} : vector<8x512xf32> to vector<8x128xf32>
    %702 = math.tanh %701 : vector<8x128xf32>
    %703 = vector.extract_strided_slice %688 {offsets = [0, 384], sizes = [8, 128], strides = [1, 1]} : vector<8x512xf32> to vector<8x128xf32>
    %704 = arith.negf %703 : vector<8x128xf32>
    %705 = math.exp %704 : vector<8x128xf32>
    %cst_217 = arith.constant 1.000000e+00 : f32
    %706 = vector.broadcast %cst_217 : f32 to vector<8x128xf32>
    %707 = arith.addf %706, %705 : vector<8x128xf32>
    %708 = arith.divf %706, %707 : vector<8x128xf32>
    %709 = arith.mulf %700, %623 : vector<8x128xf32>
    %710 = arith.mulf %694, %702 : vector<8x128xf32>
    %711 = arith.addf %709, %710 : vector<8x128xf32>
    %712 = math.tanh %711 : vector<8x128xf32>
    %713 = arith.mulf %708, %712 : vector<8x128xf32>
    %714 = arith.mulf %713, %26 : vector<8x128xf32>
    %cst_218 = arith.constant dense<0.000000e+00> : vector<8xf32>
    %715 = vector.multi_reduction <add>, %714, %cst_218 [1] : vector<8x128xf32> to vector<8xf32>
    %716 = vector.shape_cast %715 : vector<8xf32> to vector<8x1xf32>
    %cst_219 = arith.constant 3.125000e-02 : f32
    %717 = vector.broadcast %cst_219 : f32 to vector<8x1xf32>
    %718 = arith.mulf %716, %717 : vector<8x1xf32>
    %719 = vector.broadcast %718 : vector<8x1xf32> to vector<8x128xf32>
    %720 = arith.subf %713, %719 : vector<8x128xf32>
    %721 = arith.mulf %720, %26 : vector<8x128xf32>
    %722 = arith.mulf %721, %721 : vector<8x128xf32>
    %cst_220 = arith.constant dense<0.000000e+00> : vector<8xf32>
    %723 = vector.multi_reduction <add>, %722, %cst_220 [1] : vector<8x128xf32> to vector<8xf32>
    %724 = vector.shape_cast %723 : vector<8xf32> to vector<8x1xf32>
    %cst_221 = arith.constant 3.125000e-02 : f32
    %725 = vector.broadcast %cst_221 : f32 to vector<8x1xf32>
    %726 = arith.mulf %724, %725 : vector<8x1xf32>
    %cst_222 = arith.constant 9.99999974E-6 : f32
    %727 = vector.broadcast %cst_222 : f32 to vector<8x1xf32>
    %728 = arith.addf %726, %727 : vector<8x1xf32>
    %729 = math.rsqrt %728 : vector<8x1xf32>
    %730 = vector.broadcast %729 : vector<8x1xf32> to vector<8x128xf32>
    %731 = arith.mulf %721, %730 : vector<8x128xf32>
    %732 = arith.mulf %731, %16 : vector<8x128xf32>
    %733 = arith.addf %732, %19 : vector<8x128xf32>
    %cst_223 = arith.constant -1.000000e+02 : f32
    %cst_224 = arith.constant 1.000000e+02 : f32
    %734 = vector.broadcast %cst_223 : f32 to vector<8x128xf32>
    %735 = arith.maximumf %734, %733 : vector<8x128xf32>
    %736 = vector.broadcast %cst_224 : f32 to vector<8x128xf32>
    %737 = arith.minimumf %736, %735 : vector<8x128xf32>
    %c56_225 = arith.constant 56 : index
    %c0_226 = arith.constant 0 : index
    %738 = vector.load %arg15[%c56_225, %c0_226] : memref<64x128xf32, #tpu.memory_space<vmem>>, vector<8x128xf32>
    tpu.vector_store %arg15[%c56_225, %c0_226], %737 {strides = array<i32>} : memref<64x128xf32, #tpu.memory_space<vmem>>, vector<8x128xf32>,
    %c0_227 = arith.constant 0 : index
    %c0_228 = arith.constant 0 : index
    %739 = vector.load %arg15[%c0_227, %c0_228] : memref<64x128xf32, #tpu.memory_space<vmem>>, vector<64x128xf32>
    %740 = arith.truncf %739 : vector<64x128xf32> to vector<64x128xbf16>
    %c0_229 = arith.constant 0 : index
    %c0_230 = arith.constant 0 : index
    %c0_231 = arith.constant 0 : index
    %741 = vector.load %arg11[%c0_229, %c0_230, %c0_231] : memref<1x64x128xbf16, #tpu.memory_space<vmem>>, vector<1x64x128xbf16>
    %742 = vector.shape_cast %741 : vector<1x64x128xbf16> to vector<64x128xbf16>
    %743 = vector.shape_cast %740 : vector<64x128xbf16> to vector<1x64x128xbf16>
    tpu.vector_store %arg11[%c0_229, %c0_230, %c0_231], %743 {strides = array<i32>} : memref<1x64x128xbf16, #tpu.memory_space<vmem>>, vector<1x64x128xbf16>,
    %c0_232 = arith.constant 0 : index
    %c0_233 = arith.constant 0 : index
    %c0_234 = arith.constant 0 : index
    %744 = vector.load %arg12[%c0_232, %c0_233, %c0_234] : memref<2x8x128xf32, #tpu.memory_space<vmem>>, vector<1x8x128xf32>
    %745 = vector.shape_cast %744 : vector<1x8x128xf32> to vector<8x128xf32>
    %746 = vector.shape_cast %683 : vector<8x128xf32> to vector<1x8x128xf32>
    tpu.vector_store %arg12[%c0_232, %c0_233, %c0_234], %746 {strides = array<i32>} : memref<2x8x128xf32, #tpu.memory_space<vmem>>, vector<1x8x128xf32>,
    %c0_235 = arith.constant 0 : index
    %c0_236 = arith.constant 0 : index
    %c0_237 = arith.constant 0 : index
    %747 = vector.load %arg13[%c0_235, %c0_236, %c0_237] : memref<2x8x128xf32, #tpu.memory_space<vmem>>, vector<1x8x128xf32>
    %748 = vector.shape_cast %747 : vector<1x8x128xf32> to vector<8x128xf32>
    %749 = vector.shape_cast %681 : vector<8x128xf32> to vector<1x8x128xf32>
    tpu.vector_store %arg13[%c0_235, %c0_236, %c0_237], %749 {strides = array<i32>} : memref<2x8x128xf32, #tpu.memory_space<vmem>>, vector<1x8x128xf32>,
    %c1_238 = arith.constant 1 : index
    %c0_239 = arith.constant 0 : index
    %c0_240 = arith.constant 0 : index
    %750 = vector.load %arg12[%c1_238, %c0_239, %c0_240] : memref<2x8x128xf32, #tpu.memory_space<vmem>>, vector<1x8x128xf32>
    %751 = vector.shape_cast %750 : vector<1x8x128xf32> to vector<8x128xf32>
    %752 = vector.shape_cast %713 : vector<8x128xf32> to vector<1x8x128xf32>
    tpu.vector_store %arg12[%c1_238, %c0_239, %c0_240], %752 {strides = array<i32>} : memref<2x8x128xf32, #tpu.memory_space<vmem>>, vector<1x8x128xf32>,
    %c1_241 = arith.constant 1 : index
    %c0_242 = arith.constant 0 : index
    %c0_243 = arith.constant 0 : index
    %753 = vector.load %arg13[%c1_241, %c0_242, %c0_243] : memref<2x8x128xf32, #tpu.memory_space<vmem>>, vector<1x8x128xf32>
    %754 = vector.shape_cast %753 : vector<1x8x128xf32> to vector<8x128xf32>
    %755 = vector.shape_cast %711 : vector<8x128xf32> to vector<1x8x128xf32>
    tpu.vector_store %arg13[%c1_241, %c0_242, %c0_243], %755 {strides = array<i32>} : memref<2x8x128xf32, #tpu.memory_space<vmem>>, vector<1x8x128xf32>,
    return
  }
  func.func @transform_0(%arg0: i32, %arg1: i32) -> (i32, i32, i32) {
    %c0_i32 = arith.constant 0 : i32
    %c0_i32_0 = arith.constant 0 : i32
    return %arg0, %arg1, %c0_i32 : i32, i32, i32
  }
  func.func @transform_1(%arg0: i32, %arg1: i32) -> (i32, i32) {
    %c0_i32 = arith.constant 0 : i32
    %c0_i32_0 = arith.constant 0 : i32
    %c0_i32_1 = arith.constant 0 : i32
    return %c0_i32, %c0_i32_0 : i32, i32
  }
  func.func @transform_2(%arg0: i32, %arg1: i32) -> (i32, i32) {
    %c0_i32 = arith.constant 0 : i32
    %c0_i32_0 = arith.constant 0 : i32
    %c0_i32_1 = arith.constant 0 : i32
    return %c0_i32, %c0_i32_0 : i32, i32
  }
  func.func @transform_3(%arg0: i32, %arg1: i32) -> (i32, i32) {
    %c0_i32 = arith.constant 0 : i32
    %c0_i32_0 = arith.constant 0 : i32
    %c0_i32_1 = arith.constant 0 : i32
    return %c0_i32, %c0_i32_0 : i32, i32
  }
  func.func @transform_4(%arg0: i32, %arg1: i32) -> (i32, i32) {
    %c0_i32 = arith.constant 0 : i32
    %c0_i32_0 = arith.constant 0 : i32
    %c0_i32_1 = arith.constant 0 : i32
    return %c0_i32, %c0_i32_0 : i32, i32
  }
  func.func @transform_5(%arg0: i32, %arg1: i32) -> (i32, i32) {
    %c0_i32 = arith.constant 0 : i32
    %c0_i32_0 = arith.constant 0 : i32
    %c0_i32_1 = arith.constant 0 : i32
    return %c0_i32, %c0_i32_0 : i32, i32
  }
  func.func @transform_6(%arg0: i32, %arg1: i32) -> (i32, i32) {
    %c0_i32 = arith.constant 0 : i32
    %c0_i32_0 = arith.constant 0 : i32
    %c0_i32_1 = arith.constant 0 : i32
    return %c0_i32, %c0_i32_0 : i32, i32
  }
  func.func @transform_7(%arg0: i32, %arg1: i32) -> (i32, i32) {
    %c0_i32 = arith.constant 0 : i32
    %c0_i32_0 = arith.constant 0 : i32
    %c0_i32_1 = arith.constant 0 : i32
    return %c0_i32, %c0_i32_0 : i32, i32
  }
  func.func @transform_8(%arg0: i32, %arg1: i32) -> (i32, i32) {
    %c0_i32 = arith.constant 0 : i32
    %c0_i32_0 = arith.constant 0 : i32
    %c0_i32_1 = arith.constant 0 : i32
    return %c0_i32, %c0_i32_0 : i32, i32
  }
  func.func @transform_9(%arg0: i32, %arg1: i32) -> (i32, i32, i32) {
    %c0_i32 = arith.constant 0 : i32
    %c0_i32_0 = arith.constant 0 : i32
    return %arg0, %arg1, %c0_i32 : i32, i32, i32
  }
  func.func @transform_10(%arg0: i32, %arg1: i32) -> (i32, i32, i32) {
    %c0_i32 = arith.constant 0 : i32
    %c0_i32_0 = arith.constant 0 : i32
    %c0_i32_1 = arith.constant 0 : i32
    return %c0_i32, %arg0, %c0_i32_0 : i32, i32, i32
  }
  func.func @transform_11(%arg0: i32, %arg1: i32) -> (i32, i32, i32) {
    %c0_i32 = arith.constant 0 : i32
    %c0_i32_0 = arith.constant 0 : i32
    %c0_i32_1 = arith.constant 0 : i32
    return %c0_i32, %arg0, %c0_i32_0 : i32, i32, i32
  }
}

</mosaic_0001>

<bundles_post_ra>
// kernel: transducer_predictor_forward.1
= control target key start
LH: loop header
LB: loop body
LE: loop exit
PB: predicated region body
PF: predicated region fallthrough
CT: control target
= control target key end

     0   :  { %v12915_v1 = vmov 0   ;;  %s12901_s1 = inlined_call_operand.vmem [shape: bf16[128,512], index: 1, kind: input, shape index: {}]   ;;  %s12902_s0 = inlined_call_operand.vmem [shape: bf16[1,64,128], index: 0, kind: input, shape index: {}]   ;;  %s12903_s2 = inlined_call_operand.vmem [shape: bf16[128,512], index: 2, kind: input, shape index: {}]   ;;  %s12904_s5 = inlined_call_operand.vmem [shape: bf16[128,512], index: 5, kind: input, shape index: {}]   ;;  %s12905_s4 = inlined_call_operand.vmem [shape: bf16[128,512], index: 4, kind: input, shape index: {}]   ;;  %s12906_s3 = inlined_call_operand.vmem [shape: f32[1,512], index: 3, kind: input, shape index: {}]   ;;  %s12907_s6 = inlined_call_operand.vmem [shape: f32[1,512], index: 6, kind: input, shape index: {}]   ;;  %s12908_s11 = inlined_call_operand.vmem [shape: f32[2,8,128], index: 11, kind: output, shape index: {2}]   ;;  %s12909_s10 = inlined_call_operand.vmem [shape: f32[2,8,128], index: 10, kind: output, shape index: {1}]   ;;  %s12910_s7 = inlined_call_operand.vmem [shape: f32[1,128], index: 7, kind: input, shape index: {}]   ;;  %s12911_s8 = inlined_call_operand.vmem [shape: f32[1,128], index: 8, kind: input, shape index: {}]   ;;  %s12912_s9 = inlined_call_operand.vmem [shape: bf16[1,64,128], index: 9, kind: output, shape index: {0}]  }
   0x1   :  { %v8704_v0 = vld [vmem:[%s12901_s1 + $0x4] ss:$16 sps:$4 sm:$0xff]   ;;  %322 = vmatprep.mubr.bf16.mxu0 %v12915_v1  ;;  %395 = vmatprep.mubr.bf16.mxu1 %v12915_v1  ;;  %v8706_v2 = vld [vmem:[%s12901_s1 + $0xc] ss:$16 sps:$4 sm:$0xff]   ;;  %v8708_v3 = vld [vmem:[%s12901_s1] ss:$16 sps:$4 sm:$0xff]  }
   0x2   :  { %290 = vmatprep.subr.bf16.mxu0 %v8704_v0  ;;  %v8709_v4 = vld [vmem:[%s12901_s1 + $0x8] ss:$16 sps:$4 sm:$0xff]   ;;  %363 = vmatprep.subr.bf16.mxu1 %v8706_v2  ;;  %v8710_v5 = vld [vmem:[%s12901_s1 + $0x24] ss:$16 sps:$4 sm:$0xff]   ;;  %v8712_v6 = vld [vmem:[%s12901_s1 + $0x2c] ss:$16 sps:$4 sm:$0xff]  }
   0x3   :  { %291 = vmatpush1.bf16.msra.mxu0 %v8708_v3  ;;  %364 = vmatpush1.bf16.msra.mxu1 %v8709_v4  ;;  %v8714_v7 = vld [vmem:[%s12901_s1 + $0x20] ss:$16 sps:$4 sm:$0xff]   ;;  %v8715_v8 = vld [vmem:[%s12901_s1 + $0x28] ss:$16 sps:$4 sm:$0xff]   ;;  %v8716_v9 = vld [vmem:[%s12901_s1 + $0x44] ss:$16 sps:$4 sm:$0xff]  }
   0x4   :  { %292 = vmatprep.subr.bf16.mxu0 %v8710_v5  ;;  %365 = vmatprep.subr.bf16.mxu1 %v8712_v6  ;;  %v8718_v10 = vld [vmem:[%s12901_s1 + $0x4c] ss:$16 sps:$4 sm:$0xff]   ;;  %v8720_v11 = vld [vmem:[%s12901_s1 + $0x40] ss:$16 sps:$4 sm:$0xff]   ;;  %v8721_v12 = vld [vmem:[%s12901_s1 + $0x48] ss:$16 sps:$4 sm:$0xff]  }
   0x5   :  { %v8722_v13 = vld [vmem:[%s12901_s1 + $0x64] ss:$16 sps:$4 sm:$0xff]   ;;  %v8724_v14 = vld [vmem:[%s12901_s1 + $0x6c] ss:$16 sps:$4 sm:$0xff]   ;;  %v8726_v15 = vld [vmem:[%s12901_s1 + $0x60] ss:$16 sps:$4 sm:$0xff]  }
   0x6   :  { %v8727_v16 = vld [vmem:[%s12901_s1 + $0x68] ss:$16 sps:$4 sm:$0xff]   ;;  %v8728_v17 = vld [vmem:[%s12901_s1 + $0x84] ss:$16 sps:$4 sm:$0xff]   ;;  %v8730_v18 = vld [vmem:[%s12901_s1 + $0x8c] ss:$16 sps:$4 sm:$0xff]  }
   0x7   :  { %293 = vmatpush1.bf16.msra.mxu0 %v8714_v7  ;;  %366 = vmatpush1.bf16.msra.mxu1 %v8715_v8  ;;  %v8732_v19 = vld [vmem:[%s12901_s1 + $0x80] ss:$16 sps:$4 sm:$0xff]   ;;  %v8733_v20 = vld [vmem:[%s12901_s1 + $0x88] ss:$16 sps:$4 sm:$0xff]   ;;  %v8734_v21 = vld [vmem:[%s12901_s1 + $0xa4] ss:$16 sps:$4 sm:$0xff]  }
   0x8   :  { %294 = vmatprep.subr.bf16.mxu0 %v8716_v9  ;;  %367 = vmatprep.subr.bf16.mxu1 %v8718_v10  ;;  %v8736_v22 = vld [vmem:[%s12901_s1 + $0xac] ss:$16 sps:$4 sm:$0xff]   ;;  %v8738_v23 = vld [vmem:[%s12901_s1 + $0xa0] ss:$16 sps:$4 sm:$0xff]   ;;  %v8739_v24 = vld [vmem:[%s12901_s1 + $0xa8] ss:$16 sps:$4 sm:$0xff]  }
   0x9   :  { %v8740_v25 = vld [vmem:[%s12901_s1 + $0xc4] ss:$16 sps:$4 sm:$0xff]   ;;  %v8742_v26 = vld [vmem:[%s12901_s1 + $0xcc] ss:$16 sps:$4 sm:$0xff]   ;;  %v8744_v27 = vld [vmem:[%s12901_s1 + $0xc0] ss:$16 sps:$4 sm:$0xff]  }
   0xa   :  { %v8745_v28 = vld [vmem:[%s12901_s1 + $0xc8] ss:$16 sps:$4 sm:$0xff]   ;;  %v8746_v29 = vld [vmem:[%s12901_s1 + $0xe4] ss:$16 sps:$4 sm:$0xff]   ;;  %v8748_v30 = vld [vmem:[%s12901_s1 + $0xec] ss:$16 sps:$4 sm:$0xff]  }
   0xb   :  { %295 = vmatpush1.bf16.msra.mxu0 %v8720_v11  ;;  %368 = vmatpush1.bf16.msra.mxu1 %v8721_v12  ;;  %v8750_v31 = vld [vmem:[%s12901_s1 + $0xe0] ss:$16 sps:$4 sm:$0xff]   ;;  %v8751_v32 = vld [vmem:[%s12901_s1 + $0xe8] ss:$16 sps:$4 sm:$0xff]   ;;  %v9816_v33 = vld [vmem:[%s12903_s2 + $0x4] ss:$16 sps:$4 sm:$0xff]  }
   0xc   :  { %296 = vmatprep.subr.bf16.mxu0 %v8722_v13  ;;  %369 = vmatprep.subr.bf16.mxu1 %v8724_v14  ;;  %v9821_v34 = vld [vmem:[%s12903_s2 + $0xc] ss:$16 sps:$4 sm:$0xff]   ;;  %v8752_v35 = vld [vmem:[%s12902_s0] sm:$0xff]   ;;  %v8756_v37 = vld [vmem:[%s12903_s2 + $0x8] ss:$16 sps:$4 sm:$0xff]   ;;  %v9653_v6 = vmov 0.0|0.0  }
   0xd   :  { %v8753_v36 = vld [vmem:[%s12903_s2] ss:$16 sps:$4 sm:$0xff]   ;;  %v8761_v38 = vld [vmem:[%s12903_s2 + $0x24] ss:$16 sps:$4 sm:$0xff]   ;;  %v8764_v39 = vld [vmem:[%s12903_s2 + $0x2c] ss:$16 sps:$4 sm:$0xff]  }
   0xe   :  { %v8759_v40 = vld [vmem:[%s12903_s2 + $0x20] ss:$16 sps:$4 sm:$0xff]   ;;  %v8762_v41 = vld [vmem:[%s12903_s2 + $0x28] ss:$16 sps:$4 sm:$0xff]   ;;  %v8768_v42 = vld [vmem:[%s12903_s2 + $0x44] ss:$16 sps:$4 sm:$0xff]  }
   0xf   :  { %297 = vmatpush1.bf16.msra.mxu0 %v8726_v15  ;;  %370 = vmatpush1.bf16.msra.mxu1 %v8727_v16  ;;  %v8771_v43 = vld [vmem:[%s12903_s2 + $0x4c] ss:$16 sps:$4 sm:$0xff]   ;;  %v8766_v45 = vld [vmem:[%s12903_s2 + $0x40] ss:$16 sps:$4 sm:$0xff]   ;;  %v8769_v46 = vld [vmem:[%s12903_s2 + $0x48] ss:$16 sps:$4 sm:$0xff]  }
  0x10   :  { %298 = vmatprep.subr.bf16.mxu0 %v8728_v17  ;;  %371 = vmatprep.subr.bf16.mxu1 %v8730_v18  ;;  %v8765_v44 = vld [vmem:[%s12902_s0 + $0x8] sm:$0xff]   ;;  %v8774_v47 = vld [vmem:[%s12903_s2 + $0x64] ss:$16 sps:$4 sm:$0xff]   ;;  %v8772_v49 = vld [vmem:[%s12903_s2 + $0x60] ss:$16 sps:$4 sm:$0xff]  }
  0x11   :  { %v8777_v48 = vld [vmem:[%s12903_s2 + $0x6c] ss:$16 sps:$4 sm:$0xff]   ;;  %v8775_v50 = vld [vmem:[%s12903_s2 + $0x68] ss:$16 sps:$4 sm:$0xff]   ;;  %v8781_v51 = vld [vmem:[%s12903_s2 + $0x84] ss:$16 sps:$4 sm:$0xff]  }
  0x12   :  { %v8784_v52 = vld [vmem:[%s12903_s2 + $0x8c] ss:$16 sps:$4 sm:$0xff]   ;;  %v8778_v53 = vld [vmem:[%s12902_s0 + $0x10] sm:$0xff]   ;;  %v8782_v55 = vld [vmem:[%s12903_s2 + $0x88] ss:$16 sps:$4 sm:$0xff]  }
  0x13   :  { %299 = vmatpush1.bf16.msra.mxu0 %v8732_v19  ;;  %372 = vmatpush1.bf16.msra.mxu1 %v8733_v20  ;;  %v8779_v54 = vld [vmem:[%s12903_s2 + $0x80] ss:$16 sps:$4 sm:$0xff]   ;;  %v8787_v56 = vld [vmem:[%s12903_s2 + $0xa4] ss:$16 sps:$4 sm:$0xff]   ;;  %v8790_v57 = vld [vmem:[%s12903_s2 + $0xac] ss:$16 sps:$4 sm:$0xff]  }
  0x14   :  { %300 = vmatprep.subr.bf16.mxu0 %v8734_v21  ;;  %373 = vmatprep.subr.bf16.mxu1 %v8736_v22  ;;  %v8785_v58 = vld [vmem:[%s12903_s2 + $0xa0] ss:$16 sps:$4 sm:$0xff]   ;;  %v8788_v59 = vld [vmem:[%s12903_s2 + $0xa8] ss:$16 sps:$4 sm:$0xff]   ;;  %v8794_v60 = vld [vmem:[%s12903_s2 + $0xc4] ss:$16 sps:$4 sm:$0xff]  }
  0x15   :  { %v8797_v61 = vld [vmem:[%s12903_s2 + $0xcc] ss:$16 sps:$4 sm:$0xff]   ;;  %v8792_v63 = vld [vmem:[%s12903_s2 + $0xc0] ss:$16 sps:$4 sm:$0xff]   ;;  %v8795_v0 = vld [vmem:[%s12903_s2 + $0xc8] ss:$16 sps:$4 sm:$0xff]  }
  0x16   :  { %v8791_v62 = vld [vmem:[%s12902_s0 + $0x18] sm:$0xff]   ;;  %v8800_v2 = vld [vmem:[%s12903_s2 + $0xe4] ss:$16 sps:$4 sm:$0xff]   ;;  %v8798_v4 = vld [vmem:[%s12903_s2 + $0xe0] ss:$16 sps:$4 sm:$0xff]  }
  0x17   :  { %301 = vmatpush1.bf16.msra.mxu0 %v8738_v23  ;;  %374 = vmatpush1.bf16.msra.mxu1 %v8739_v24  ;;  %v8803_v3 = vld [vmem:[%s12903_s2 + $0xec] ss:$16 sps:$4 sm:$0xff]   ;;  %v8801_v5 = vld [vmem:[%s12903_s2 + $0xe8] ss:$16 sps:$4 sm:$0xff]   ;;  %v8806_v7 = vld [vmem:[%s12904_s5 + $0x4] ss:$16 sps:$4 sm:$0xff]  }
  0x18   :  { %302 = vmatprep.subr.bf16.mxu0 %v8740_v25  ;;  %375 = vmatprep.subr.bf16.mxu1 %v8742_v26  ;;  %v8804_v8 = vld [vmem:[%s12904_s5] ss:$16 sps:$4 sm:$0xff]   ;;  %v8807_v9 = vld [vmem:[%s12904_s5 + $0x8] ss:$16 sps:$4 sm:$0xff]   ;;  %v8809_v10 = vld [vmem:[%s12904_s5 + $0xc] ss:$16 sps:$4 sm:$0xff]  }
  0x19   :  { %v8812_v11 = vld [vmem:[%s12904_s5 + $0x24] ss:$16 sps:$4 sm:$0xff]   ;;  %v8810_v12 = vld [vmem:[%s12904_s5 + $0x20] ss:$16 sps:$4 sm:$0xff]   ;;  %v8815_v13 = vld [vmem:[%s12904_s5 + $0x2c] ss:$16 sps:$4 sm:$0xff]  }
  0x1a   :  { %v8813_v14 = vld [vmem:[%s12904_s5 + $0x28] ss:$16 sps:$4 sm:$0xff]   ;;  %v8818_v15 = vld [vmem:[%s12904_s5 + $0x44] ss:$16 sps:$4 sm:$0xff]   ;;  %v8816_v16 = vld [vmem:[%s12904_s5 + $0x40] ss:$16 sps:$4 sm:$0xff]  }
  0x1b   :  { %303 = vmatpush1.bf16.msra.mxu0 %v8744_v27  ;;  %376 = vmatpush1.bf16.msra.mxu1 %v8745_v28  ;;  %v8821_v17 = vld [vmem:[%s12904_s5 + $0x4c] ss:$16 sps:$4 sm:$0xff]   ;;  %v8819_v18 = vld [vmem:[%s12904_s5 + $0x48] ss:$16 sps:$4 sm:$0xff]   ;;  %v9978_v19 = vld [vmem:[%s12904_s5 + $0x64] ss:$16 sps:$4 sm:$0xff]  }
  0x1c   :  { %304 = vmatprep.subr.bf16.mxu0 %v8746_v29  ;;  %377 = vmatprep.subr.bf16.mxu1 %v8748_v30  ;;  %v9983_v20 = vld [vmem:[%s12904_s5 + $0x60] ss:$16 sps:$4 sm:$0xff]   ;;  %v9988_v21 = vld [vmem:[%s12904_s5 + $0x6c] ss:$16 sps:$4 sm:$0xff]   ;;  %v9994_v22 = vld [vmem:[%s12904_s5 + $0x68] ss:$16 sps:$4 sm:$0xff]  }
  0x1d   :  { %v10001_v23 = vld [vmem:[%s12904_s5 + $0x84] ss:$16 sps:$4 sm:$0xff]   ;;  %v10007_v24 = vld [vmem:[%s12904_s5 + $0x80] ss:$16 sps:$4 sm:$0xff]   ;;  %v10012_v25 = vld [vmem:[%s12904_s5 + $0x8c] ss:$16 sps:$4 sm:$0xff]  }
  0x1e   :  { %v10018_v26 = vld [vmem:[%s12904_s5 + $0x88] ss:$16 sps:$4 sm:$0xff]   ;;  %v10026_v27 = vld [vmem:[%s12904_s5 + $0xa4] ss:$16 sps:$4 sm:$0xff]   ;;  %v10031_v28 = vld [vmem:[%s12904_s5 + $0xa0] ss:$16 sps:$4 sm:$0xff]  }
  0x1f   :  { %305 = vmatpush1.bf16.msra.mxu0 %v8750_v31  ;;  %378 = vmatpush1.bf16.msra.mxu1 %v8751_v32  ;;  %v10036_v29 = vld [vmem:[%s12904_s5 + $0xac] ss:$16 sps:$4 sm:$0xff]   ;;  %v10042_v30 = vld [vmem:[%s12904_s5 + $0xa8] ss:$16 sps:$4 sm:$0xff]   ;;  %v10050_v31 = vld [vmem:[%s12904_s5 + $0xc4] ss:$16 sps:$4 sm:$0xff]  }
  0x20   :  { %708 = vmatprep.subr.bf16.mxu0 %v9816_v33  ;;  %749 = vmatprep.subr.bf16.mxu1 %v9821_v34  ;;  %v10055_v32 = vld [vmem:[%s12904_s5 + $0xc0] ss:$16 sps:$4 sm:$0xff]  }
  0x22   :  { %323 = vmatmul.mubr.bf16.vlgmr.msra.gmra.mrb[0].mxu0 %v8752_v35  ;;  %396 = vmatmul.mubr.bf16.vlgmr.msra.gmra.mrb[0].mxu1 %v8752_v35  ;;  %v10060_v35 = vld [vmem:[%s12904_s5 + $0xcc] ss:$16 sps:$4 sm:$0xff]  }
  0x23   :  { %709 = vmatpush1.bf16.msra.mxu0 %v8753_v36  ;;  %750 = vmatpush1.bf16.msra.mxu1 %v8756_v37  ;;  %v10066_v36 = vld [vmem:[%s12904_s5 + $0xc8] ss:$16 sps:$4 sm:$0xff]   ;;  %v10074_v37 = vld [vmem:[%s12904_s5 + $0xe4] ss:$16 sps:$4 sm:$0xff]  }
  0x24   :  { %710 = vmatprep.subr.bf16.mxu0 %v8761_v38  ;;  %751 = vmatprep.subr.bf16.mxu1 %v8764_v39  ;;  %v10079_v38 = vld [vmem:[%s12904_s5 + $0xe0] ss:$16 sps:$4 sm:$0xff]   ;;  %v10084_v39 = vld [vmem:[%s12904_s5 + $0xec] ss:$16 sps:$4 sm:$0xff]  }
  0x25   :  { %332 = vmatprep.mubr.bf16.mxu0 %v12915_v1  ;;  %405 = vmatprep.mubr.bf16.mxu1 %v12915_v1 }
  0x27   :  { %711 = vmatpush1.bf16.msra.mxu0 %v8759_v40  ;;  %752 = vmatpush1.bf16.msra.mxu1 %v8762_v41  ;;  %v10090_v40 = vld [vmem:[%s12904_s5 + $0xe8] ss:$16 sps:$4 sm:$0xff]   ;;  %v10098_v41 = vld [vmem:[%s12905_s4 + $0x4] ss:$16 sps:$4 sm:$0xff]  }
  0x28   :  { %712 = vmatprep.subr.bf16.mxu0 %v8768_v42  ;;  %753 = vmatprep.subr.bf16.mxu1 %v8771_v43  ;;  %v8852_v42 = vld [vmem:[%s12905_s4] ss:$16 sps:$4 sm:$0xff]   ;;  %v8855_v43 = vld [vmem:[%s12905_s4 + $0x8] ss:$16 sps:$4 sm:$0xff]  }
  0x2a   :  { %333 = vmatmul.mubr.bf16.gmra.mrb[4].mxu0 %v8765_v44  ;;  %406 = vmatmul.mubr.bf16.gmra.mrb[4].mxu1 %v8765_v44  ;;  %v10111_v44 = vld [vmem:[%s12905_s4 + $0xc] ss:$16 sps:$4 sm:$0xff]  }
  0x2b   :  { %713 = vmatpush1.bf16.msra.mxu0 %v8766_v45  ;;  %754 = vmatpush1.bf16.msra.mxu1 %v8769_v46  ;;  %v8860_v45 = vld [vmem:[%s12905_s4 + $0x24] ss:$16 sps:$4 sm:$0xff]   ;;  %v8863_v46 = vld [vmem:[%s12905_s4 + $0x2c] ss:$16 sps:$4 sm:$0xff]  }
  0x2c   :  { %714 = vmatprep.subr.bf16.mxu0 %v8774_v47  ;;  %755 = vmatprep.subr.bf16.mxu1 %v8777_v48  ;;  %v8858_v47 = vld [vmem:[%s12905_s4 + $0x20] ss:$16 sps:$4 sm:$0xff]   ;;  %v8861_v48 = vld [vmem:[%s12905_s4 + $0x28] ss:$16 sps:$4 sm:$0xff]  }
  0x2d   :  { %342 = vmatprep.mubr.bf16.mxu0 %v12915_v1  ;;  %415 = vmatprep.mubr.bf16.mxu1 %v12915_v1 }
  0x2f   :  { %715 = vmatpush1.bf16.msra.mxu0 %v8772_v49  ;;  %756 = vmatpush1.bf16.msra.mxu1 %v8775_v50  ;;  %v10132_v49 = vld [vmem:[%s12905_s4 + $0x44] ss:$16 sps:$4 sm:$0xff]   ;;  %v10137_v50 = vld [vmem:[%s12905_s4 + $0x4c] ss:$16 sps:$4 sm:$0xff]  }
  0x30   :  { %716 = vmatprep.subr.bf16.mxu0 %v8781_v51  ;;  %757 = vmatprep.subr.bf16.mxu1 %v8784_v52  ;;  %v10142_v51 = vld [vmem:[%s12905_s4 + $0x40] ss:$16 sps:$4 sm:$0xff]   ;;  %v10147_v52 = vld [vmem:[%s12905_s4 + $0x48] ss:$16 sps:$4 sm:$0xff]  }
  0x32   :  { %343 = vmatmul.mubr.bf16.gmra.mrb[8].mxu0 %v8778_v53  ;;  %416 = vmatmul.mubr.bf16.gmra.mrb[8].mxu1 %v8778_v53  ;;  %v10155_v53 = vld [vmem:[%s12905_s4 + $0x64] ss:$16 sps:$4 sm:$0xff]  }
  0x33   :  { %717 = vmatpush1.bf16.msra.mxu0 %v8779_v54  ;;  %758 = vmatpush1.bf16.msra.mxu1 %v8782_v55  ;;  %v10160_v54 = vld [vmem:[%s12905_s4 + $0x6c] ss:$16 sps:$4 sm:$0xff]   ;;  %v10166_v55 = vld [vmem:[%s12905_s4 + $0x60] ss:$16 sps:$4 sm:$0xff]  }
  0x34   :  { %718 = vmatprep.subr.bf16.mxu0 %v8787_v56  ;;  %759 = vmatprep.subr.bf16.mxu1 %v8790_v57  ;;  %v10171_v56 = vld [vmem:[%s12905_s4 + $0x68] ss:$16 sps:$4 sm:$0xff]   ;;  %v10179_v57 = vld [vmem:[%s12905_s4 + $0x84] ss:$16 sps:$4 sm:$0xff]  }
  0x35   :  { %352 = vmatprep.mubr.bf16.mxu0 %v12915_v1  ;;  %425 = vmatprep.mubr.bf16.mxu1 %v12915_v1 }
  0x37   :  { %719 = vmatpush1.bf16.msra.mxu0 %v8785_v58  ;;  %760 = vmatpush1.bf16.msra.mxu1 %v8788_v59  ;;  %v10184_v58 = vld [vmem:[%s12905_s4 + $0x8c] ss:$16 sps:$4 sm:$0xff]   ;;  %v10190_v59 = vld [vmem:[%s12905_s4 + $0x80] ss:$16 sps:$4 sm:$0xff]  }
  0x38   :  { %720 = vmatprep.subr.bf16.mxu0 %v8794_v60  ;;  %761 = vmatprep.subr.bf16.mxu1 %v8797_v61  ;;  %v10195_v60 = vld [vmem:[%s12905_s4 + $0x88] ss:$16 sps:$4 sm:$0xff]   ;;  %v10202_v61 = vld [vmem:[%s12905_s4 + $0xa4] ss:$16 sps:$4 sm:$0xff]  }
  0x39   :  { %13070 = vst [vmem:[#allocation4_spill] sm:$0xff] %v10202_v61 }
  0x3a   :  { %353 = vmatmul.mubr.bf16.gmra.mrb[12].mxu0 %v8791_v62  ;;  %426 = vmatmul.mubr.bf16.gmra.mrb[12].mxu1 %v8791_v62  ;;  %v10207_v62 = vld [vmem:[%s12905_s4 + $0xac] ss:$16 sps:$4 sm:$0xff]  }
  0x3b   :  { %721 = vmatpush1.bf16.msra.mxu0 %v8792_v63  ;;  %762 = vmatpush1.bf16.msra.mxu1 %v8795_v0  ;;  %13071 = vst [vmem:[#allocation5_spill] sm:$0xff] %v10207_v62  ;;  %v10213_v63 = vld [vmem:[%s12905_s4 + $0xa0] ss:$16 sps:$4 sm:$0xff]   ;;  %v10219_v0 = vld [vmem:[%s12905_s4 + $0xa8] ss:$16 sps:$4 sm:$0xff]  }
  0x3c   :  { %722 = vmatprep.subr.bf16.mxu0 %v8800_v2  ;;  %763 = vmatprep.subr.bf16.mxu1 %v8803_v3  ;;  %13072 = vst [vmem:[#allocation6_spill] sm:$0xff] %v10213_v63  ;;  %13073 = vst [vmem:[#allocation7_spill] sm:$0xff] %v10219_v0  ;;  %v10224_v2 = vld [vmem:[%s12905_s4 + $0xc4] ss:$16 sps:$4 sm:$0xff]   ;;  %v10230_v3 = vld [vmem:[%s12905_s4 + $0xc0] ss:$16 sps:$4 sm:$0xff]  }
  0x3d   :  { %740 = vmatprep.mubr.bf16.mxu0 %v12915_v1  ;;  %781 = vmatprep.mubr.bf16.mxu1 %v12915_v1  ;;  %13074 = vst [vmem:[#allocation8_spill] sm:$0xff] %v10224_v2  ;;  %13075 = vst [vmem:[#allocation9_spill] sm:$0xff] %v10230_v3 }
  0x3f   :  { %723 = vmatpush1.bf16.msra.mxu0 %v8798_v4  ;;  %764 = vmatpush1.bf16.msra.mxu1 %v8801_v5  ;;  %v10235_v4 = vld [vmem:[%s12905_s4 + $0xcc] ss:$16 sps:$4 sm:$0xff]   ;;  %v10241_v5 = vld [vmem:[%s12905_s4 + $0xe4] ss:$16 sps:$4 sm:$0xff]  }
  0x40   :  { %983 = vmatprep.subr.bf16.mxu0 %v8806_v7  ;;  %1024 = vmatprep.subr.bf16.mxu1 %v8809_v10  ;;  %13076 = vst [vmem:[#allocation10_spill] sm:$0xff] %v10235_v4  ;;  %13077 = vst [vmem:[#allocation11_spill] sm:$0xff] %v10241_v5  ;;  %v10253_v7 = vld [vmem:[%s12905_s4 + $0xec] ss:$16 sps:$4 sm:$0xff]   ;;  %v12913_v10 = vlaneseq }
  0x41   :  { %13079 = vst [vmem:[#allocation13_spill] sm:$0xff] %v10253_v7 }
  0x42   :  { %741 = vmatmul.mubr.bf16.vlgmr.msra.gmra.mrb[16].mxu0 %v9653_v6  ;;  %782 = vmatmul.mubr.bf16.vlgmr.msra.gmra.mrb[16].mxu1 %v9653_v6 }
  0x43   :  { %1015 = vmatprep.mubr.bf16.mxu0 %v12915_v1  ;;  %1056 = vmatprep.mubr.bf16.mxu1 %v12915_v1 }
  0x44   :  { %984 = vmatpush1.bf16.msra.mxu0 %v8804_v8  ;;  %1025 = vmatpush1.bf16.msra.mxu1 %v8807_v9  ;;  %v10259_v8 = vld [vmem:[%s12905_s4 + $0xe0] ss:$16 sps:$4 sm:$0xff]   ;;  %v10266_v9 = vld [vmem:[%s12905_s4 + $0xe8] ss:$16 sps:$4 sm:$0xff]  }
  0x45   :  { %985 = vmatprep.subr.bf16.mxu0 %v8812_v11  ;;  %1026 = vmatprep.subr.bf16.mxu1 %v8815_v13  ;;  %13080 = vst [vmem:[#allocation14_spill] sm:$0xff] %v10259_v8  ;;  %13081 = vst [vmem:[#allocation15_spill] sm:$0xff] %v10266_v9  ;;  %v10276_v11 = vshrl.u32 %v12913_v10, 7 }
  0x47   :  { %v12919_v13 = vsub.s32 3, %v10276_v11 }
  0x48   :  { %986 = vmatpush1.bf16.msra.mxu0 %v8810_v12  ;;  %1027 = vmatpush1.bf16.msra.mxu1 %v8813_v14  ;;  %v12914_v12 = vsub.s32 2, %v10276_v11  ;;  %v12920_v14 = vsub.s32 0, %v10276_v11 }
  0x49   :  { %987 = vmatprep.subr.bf16.mxu0 %v8818_v15  ;;  %1028 = vmatprep.subr.bf16.mxu1 %v8821_v17  ;;  %v84_v15 = vld [vmem:[%s12906_s3] sm:$0xf] }
  0x4c   :  { %988 = vmatpush1.bf16.msra.mxu0 %v8816_v16  ;;  %1029 = vmatpush1.bf16.msra.mxu1 %v8819_v18  ;;  %v10287_v16 = vrot.slane %v84_v15, %v12914_v12  ;;  %v10295_v18 = vrot.slane %v84_v15, %v12919_v13 }
  0x4d   :  { %989 = vmatprep.subr.bf16.mxu0 %v9978_v19  ;;  %1030 = vmatprep.subr.bf16.mxu1 %v9988_v21 }
  0x50   :  { %990 = vmatpush1.bf16.msra.mxu0 %v9983_v20  ;;  %1031 = vmatpush1.bf16.msra.mxu1 %v9994_v22 }
  0x51   :  { %991 = vmatprep.subr.bf16.mxu0 %v10001_v23  ;;  %1032 = vmatprep.subr.bf16.mxu1 %v10012_v25 }
  0x54   :  { %992 = vmatpush1.bf16.msra.mxu0 %v10007_v24  ;;  %1033 = vmatpush1.bf16.msra.mxu1 %v10018_v26 }
  0x55   :  { %993 = vmatprep.subr.bf16.mxu0 %v10026_v27  ;;  %1034 = vmatprep.subr.bf16.mxu1 %v10036_v29 }
  0x58   :  { %994 = vmatpush1.bf16.msra.mxu0 %v10031_v28  ;;  %1035 = vmatpush1.bf16.msra.mxu1 %v10042_v30 }
  0x59   :  { %995 = vmatprep.subr.bf16.mxu0 %v10050_v31  ;;  %1036 = vmatprep.subr.bf16.mxu1 %v10060_v35 }
  0x5c   :  { %996 = vmatpush1.bf16.msra.mxu0 %v10055_v32  ;;  %1037 = vmatpush1.bf16.msra.mxu1 %v10066_v36 }
  0x5d   :  { %997 = vmatprep.subr.bf16.mxu0 %v10074_v37  ;;  %1038 = vmatprep.subr.bf16.mxu1 %v10084_v39 }
  0x60   :  { %998 = vmatpush1.bf16.msra.mxu0 %v10079_v38  ;;  %1039 = vmatpush1.bf16.msra.mxu1 %v10090_v40 }
  0x61   :  { %1290 = vmatprep.subr.bf16.mxu0 %v10098_v41  ;;  %1331 = vmatprep.subr.bf16.mxu1 %v10111_v44 }
  0x63   :  { %1016 = vmatmul.mubr.bf16.vlgmr.msra.gmra.mrb[20].mxu0 %v9653_v6  ;;  %1057 = vmatmul.mubr.bf16.vlgmr.msra.gmra.mrb[20].mxu1 %v9653_v6  ;;  %v10247_v6 = vld [vmem:[%s12905_s4 + $0xc8] ss:$16 sps:$4 sm:$0xff]  }
  0x64   :  { %1291 = vmatpush1.bf16.msra.mxu0 %v8852_v42  ;;  %1322 = vmatprep.mubr.bf16.mxu0 %v12915_v1  ;;  %13078 = vst [vmem:[#allocation12_spill] sm:$0xff] %v10247_v6  ;;  %v89_v42 = vrot.slane %v84_v15, %v12920_v14 }
  0x65   :  { %1363 = vmatprep.mubr.bf16.mxu1 %v12915_v1  ;;  %1332 = vmatpush1.bf16.msra.mxu1 %v8855_v43 }
  0x66   :  { %1292 = vmatprep.subr.bf16.mxu0 %v8860_v45  ;;  %1333 = vmatprep.subr.bf16.mxu1 %v8863_v46 }
  0x68   :  { %1293 = vmatpush1.bf16.msra.mxu0 %v8858_v47 }
  0x69   :  { %1334 = vmatpush1.bf16.msra.mxu1 %v8861_v48  ;;  %1294 = vmatprep.subr.bf16.mxu0 %v10132_v49 }
  0x6a   :  { %1335 = vmatprep.subr.bf16.mxu1 %v10137_v50 }
  0x6c   :  { %1295 = vmatpush1.bf16.msra.mxu0 %v10142_v51 }
  0x6d   :  { %1336 = vmatpush1.bf16.msra.mxu1 %v10147_v52  ;;  %1296 = vmatprep.subr.bf16.mxu0 %v10155_v53 }
  0x6e   :  { %1337 = vmatprep.subr.bf16.mxu1 %v10160_v54 }
  0x70   :  { %1297 = vmatpush1.bf16.msra.mxu0 %v10166_v55 }
  0x71   :  { %1338 = vmatpush1.bf16.msra.mxu1 %v10171_v56  ;;  %1298 = vmatprep.subr.bf16.mxu0 %v10179_v57 }
  0x72   :  { %1339 = vmatprep.subr.bf16.mxu1 %v10184_v58 }
  0x74   :  { %1299 = vmatpush1.bf16.msra.mxu0 %v10190_v59 }
  0x75   :  { %1300 = vmatprep.subr.bf16.mxu0 %v10202_v61  ;;  %1340 = vmatpush1.bf16.msra.mxu1 %v10195_v60 }
  0x76   :  { %1341 = vmatprep.subr.bf16.mxu1 %v10207_v62 }
  0x78   :  { %1301 = vmatpush1.bf16.msra.mxu0 %v10213_v63 }
  0x79   :  { %1302 = vmatprep.subr.bf16.mxu0 %v10224_v2  ;;  %1342 = vmatpush1.bf16.msra.mxu1 %v10219_v0 }
  0x7a   :  { %1343 = vmatprep.subr.bf16.mxu1 %v10235_v4 }
  0x7c   :  { %1303 = vmatpush1.bf16.msra.mxu0 %v10230_v3 }
  0x7d   :  { %1304 = vmatprep.subr.bf16.mxu0 %v10241_v5  ;;  %1344 = vmatpush1.bf16.msra.mxu1 %v10247_v6 }
  0x7e   :  { %1345 = vmatprep.subr.bf16.mxu1 %v10253_v7 }
  0x80   :  { %1305 = vmatpush1.bf16.msra.mxu0 %v10259_v8 }
  0x81   :  { %1610 = vmatprep.subr.bf16.mxu0 %v9816_v33  ;;  %1346 = vmatpush1.bf16.msra.mxu1 %v10266_v9  ;;  %v12924_v33 = vsub.s32 1, %v10276_v11 }
  0x82   :  { %1651 = vmatprep.subr.bf16.mxu1 %v9821_v34 }
  0x83   :  { %v93_v46 = vrot.slane %v84_v15, %v12924_v33 }
  0xf5   :  { %v10289_v34 = vpop.f32.mrb[0].mxu0  ;;  %v10291_v17 = vpop.f32.mrb[0].mxu1 }
  0xf6   :  { %v326_v43 = vpop.f32.mrb[1].mxu0  ;;  %v399_v45 = vpop.f32.mrb[1].mxu1 }
  0xf7   :  { %v328_v47 = vpop.f32.mrb[2].mxu0  ;;  %v401_v48 = vpop.f32.mrb[2].mxu1 }
  0xf8   :  { %v10301_v10 = vadd.f32 %v328_v47, %v89_v42  ;;  %v330_v12 = vpop.f32.mrb[3].mxu0  ;;  %v10304_v1 = vadd.f32 %v401_v48, %v10287_v16  ;;  %v403_v9 = vpop.f32.mrb[3].mxu1 }
  0xf9   :  { %v10306_v8 = vadd.f32 %v330_v12, %v93_v46  ;;  %v10309_v13 = vadd.f32 %v403_v9, %v10295_v18 }
  0xfd   :  { %v334_v14 = vpop.f32.mrb[4].mxu0  ;;  %v407_v7 = vpop.f32.mrb[4].mxu1 }
  0xfe   :  { %v10311_v5 = vadd.f32 %v334_v14, %v89_v42  ;;  %v336_v6 = vpop.f32.mrb[5].mxu0  ;;  %v10314_v15 = vadd.f32 %v407_v7, %v10287_v16  ;;  %v409_v47 = vpop.f32.mrb[5].mxu1 }
  0xff   :  { %v10316_v33 = vadd.f32 %v336_v6, %v93_v46  ;;  %v338_v3 = vpop.f32.mrb[6].mxu0  ;;  %v10319_v48 = vadd.f32 %v409_v47, %v10295_v18  ;;  %v411_v12 = vpop.f32.mrb[6].mxu1 }
 0x100   :  { %13082 = vst [vmem:[#allocation16_spill] sm:$0xff] %v10311_v5  ;;  %13083 = vst [vmem:[#allocation17_spill] sm:$0xff] %v10314_v15  ;;  %v10321_v4 = vadd.f32 %v338_v3, %v89_v42  ;;  %v340_v9 = vpop.f32.mrb[7].mxu0  ;;  %v10324_v2 = vadd.f32 %v411_v12, %v10287_v16  ;;  %v413_v14 = vpop.f32.mrb[7].mxu1 }
 0x101   :  { %13084 = vst [vmem:[#allocation18_spill] sm:$0xff] %v10316_v33  ;;  %13085 = vst [vmem:[#allocation19_spill] sm:$0xff] %v10319_v48  ;;  %v10326_v5 = vadd.f32 %v340_v9, %v93_v46  ;;  %v10329_v7 = vadd.f32 %v413_v14, %v10295_v18 }
 0x102   :  { %13086 = vst [vmem:[#allocation20_spill] sm:$0xff] %v10321_v4  ;;  %13087 = vst [vmem:[#allocation21_spill] sm:$0xff] %v10324_v2 }
 0x103   :  { %13088 = vst [vmem:[#allocation22_spill] sm:$0xff] %v10326_v5  ;;  %13089 = vst [vmem:[#allocation23_spill] sm:$0xff] %v10329_v7 }
 0x105   :  { %v344_v15 = vpop.f32.mrb[8].mxu0  ;;  %v417_v6 = vpop.f32.mrb[8].mxu1 }
 0x106   :  { %v10331_v33 = vadd.f32 %v344_v15, %v89_v42  ;;  %v346_v0 = vpop.f32.mrb[9].mxu0  ;;  %v10334_v47 = vadd.f32 %v417_v6, %v10287_v16  ;;  %v419_v3 = vpop.f32.mrb[9].mxu1 }
 0x107   :  { %v10336_v4 = vadd.f32 %v346_v0, %v93_v46  ;;  %v348_v48 = vpop.f32.mrb[10].mxu0  ;;  %v10339_v12 = vadd.f32 %v419_v3, %v10295_v18  ;;  %v421_v9 = vpop.f32.mrb[10].mxu1 }
 0x108   :  { %13090 = vst [vmem:[#allocation24_spill] sm:$0xff] %v10331_v33  ;;  %13091 = vst [vmem:[#allocation25_spill] sm:$0xff] %v10334_v47  ;;  %v10341_v5 = vadd.f32 %v348_v48, %v89_v42  ;;  %v350_v14 = vpop.f32.mrb[11].mxu0  ;;  %v10344_v7 = vadd.f32 %v421_v9, %v10287_v16  ;;  %v423_v15 = vpop.f32.mrb[11].mxu1 }
 0x109   :  { %13092 = vst [vmem:[#allocation26_spill] sm:$0xff] %v10336_v4  ;;  %13093 = vst [vmem:[#allocation27_spill] sm:$0xff] %v10339_v12  ;;  %v10346_v33 = vadd.f32 %v350_v14, %v93_v46  ;;  %v10349_v6 = vadd.f32 %v423_v15, %v10295_v18 }
 0x10a   :  { %13094 = vst [vmem:[#allocation28_spill] sm:$0xff] %v10341_v5  ;;  %13095 = vst [vmem:[#allocation29_spill] sm:$0xff] %v10344_v7 }
 0x10b   :  { %13096 = vst [vmem:[#allocation30_spill] sm:$0xff] %v10346_v33  ;;  %13097 = vst [vmem:[#allocation31_spill] sm:$0xff] %v10349_v6 }
 0x10d   :  { %v354_v47 = vpop.f32.mrb[12].mxu0  ;;  %v427_v0 = vpop.f32.mrb[12].mxu1 }
 0x10e   :  { %v10351_v4 = vadd.f32 %v354_v47, %v89_v42  ;;  %v356_v2 = vpop.f32.mrb[13].mxu0  ;;  %v10354_v3 = vadd.f32 %v427_v0, %v10287_v16  ;;  %v429_v48 = vpop.f32.mrb[13].mxu1 }
 0x10f   :  { %v10356_v5 = vadd.f32 %v356_v2, %v93_v46  ;;  %v358_v12 = vpop.f32.mrb[14].mxu0  ;;  %v10359_v9 = vadd.f32 %v429_v48, %v10295_v18  ;;  %v431_v14 = vpop.f32.mrb[14].mxu1  ;;  %v325_v2 = vadd.f32 %v10289_v34, %v89_v42  ;;  %v327_v48 = vadd.f32 %v326_v43, %v93_v46 }
 0x110   :  { %13098 = vst [vmem:[#allocation32_spill] sm:$0xff] %v10351_v4  ;;  %13099 = vst [vmem:[#allocation33_spill] sm:$0xff] %v10354_v3  ;;  %v10361_v33 = vadd.f32 %v358_v12, %v89_v42  ;;  %v360_v15 = vpop.f32.mrb[15].mxu0  ;;  %v10364_v6 = vadd.f32 %v431_v14, %v10287_v16  ;;  %v433_v47 = vpop.f32.mrb[15].mxu1 }
 0x111   :  { %13100 = vst [vmem:[#allocation34_spill] sm:$0xff] %v10356_v5  ;;  %13101 = vst [vmem:[#allocation35_spill] sm:$0xff] %v10359_v9  ;;  %v10366_v4 = vadd.f32 %v360_v15, %v93_v46  ;;  %v10369_v0 = vadd.f32 %v433_v47, %v10295_v18  ;;  %v398_v5 = vadd.f32 %v10291_v17, %v10287_v16 }
 0x112   :  { %13102 = vst [vmem:[#allocation36_spill] sm:$0xff] %v10361_v33  ;;  %13103 = vst [vmem:[#allocation37_spill] sm:$0xff] %v10364_v6  ;;  %v400_v9 = vadd.f32 %v399_v45, %v10295_v18 }
 0x113   :  { %13104 = vst [vmem:[#allocation38_spill] sm:$0xff] %v10366_v4  ;;  %13105 = vst [vmem:[#allocation39_spill] sm:$0xff] %v10369_v0 }
 0x115   :  { %v742_v12 = vpop.f32.mrb[16].mxu0  ;;  %v783_v33 = vpop.f32.mrb[16].mxu1 }
 0x116   :  { %v1069_v3 = vadd.f32 %v742_v12, %v325_v2  ;;  %v1071_v7 = vadd.f32 %v783_v33, %v398_v5  ;;  %v744_v14 = vpop.f32.mrb[17].mxu0  ;;  %v785_v6 = vpop.f32.mrb[17].mxu1  ;;  %v9605_v2 = vld [vmem:[%s12903_s2 + $0x8] ss:$16 sps:$4 sm:$0xff]   ;;  %v9607_v12 = vld [vmem:[%s12903_s2 + $0x2c] ss:$16 sps:$4 sm:$0xff]  }
 0x117   :  { %v1070_v63 = vadd.f32 %v744_v14, %v327_v48  ;;  %v1072_v15 = vadd.f32 %v785_v6, %v400_v9  ;;  %v746_v4 = vpop.f32.mrb[18].mxu0  ;;  %v787_v62 = vpop.f32.mrb[18].mxu1  ;;  %v9606_v48 = vld [vmem:[%s12903_s2 + $0x24] ss:$16 sps:$4 sm:$0xff]   ;;  %v13106_v14 = vmov 0  }
 0x118   :  { %v7901_v47 = vmul.f32 -1.442695, %v1069_v3  ;;  %v747_v0 = vpop.f32.mrb[19].mxu0  ;;  %v788_v61 = vpop.f32.mrb[19].mxu1 }
 0x119   :  { %v7902_v34 = vmul.f32 -1.442695, %v1070_v63  ;;  %v7903_v16 = vmul.f32 -1.442695, %v1072_v15  ;;  %v9608_v15 = vld [vmem:[%s12903_s2 + $0x20] ss:$16 sps:$4 sm:$0xff]  }
 0x11a   :  { %9332 = vpow2.f32 %v7901_v47  ;;  %v9609_v47 = vld [vmem:[%s12903_s2 + $0x28] ss:$16 sps:$4 sm:$0xff]  }
 0x11b   :  { %9334 = vpow2.f32 %v7902_v34  ;;  %v9610_v34 = vld [vmem:[%s12903_s2 + $0x44] ss:$16 sps:$4 sm:$0xff]  }
 0x11c   :  { %9336 = vpow2.f32 %v7903_v16  ;;  %v9611_v16 = vld [vmem:[%s12903_s2 + $0x4c] ss:$16 sps:$4 sm:$0xff]  }
 0x11d   :  { %9338 = vtanh.f32 %v1071_v7  ;;  %v9604_v7 = vld [vmem:[%s12903_s2] ss:$16 sps:$4 sm:$0xff]  }
 0x124   :  { %v9333_v17 = vpop.eup %9332 }
 0x125   :  { %v9335_v42 = vpop.eup %9334  ;;  %v1076_v18 = vadd.f32 1.0, %v9333_v17  ;;  %v9612_v17 = vld [vmem:[%s12903_s2 + $0x40] ss:$16 sps:$4 sm:$0xff]  }
 0x126   :  { %v1082_v43 = vadd.f32 1.0, %v9335_v42  ;;  %v9337_v5 = vpop.eup %9336  ;;  %v9613_v42 = vld [vmem:[%s12903_s2 + $0x48] ss:$16 sps:$4 sm:$0xff]  }
 0x127   :  { %9340 = vrcp.f32 %v1076_v18  ;;  %v9339_v33 = vpop.eup %9338  ;;  %v1089_v46 = vadd.f32 1.0, %v9337_v5  ;;  %v9614_v18 = vld [vmem:[%s12903_s2 + $0x64] ss:$16 sps:$4 sm:$0xff]   ;;  %v9616_v5 = vld [vmem:[%s12903_s2 + $0x60] ss:$16 sps:$4 sm:$0xff]  }
 0x128   :  { %9342 = vrcp.f32 %v1082_v43  ;;  %v9615_v43 = vld [vmem:[%s12903_s2 + $0x6c] ss:$16 sps:$4 sm:$0xff]  }
 0x129   :  { %9344 = vrcp.f32 %v1089_v46  ;;  %v9621_v46 = vld [vmem:[%s12903_s2 + $0x88] ss:$16 sps:$4 sm:$0xff]  }
 0x131   :  { %v9341_v45 = vpop.eup %9340 }
 0x132   :  { %v9343_v4 = vpop.eup %9342  ;;  %v1093_v62 = vmul.f32 %v9341_v45, %v9339_v33  ;;  %v9617_v33 = vld [vmem:[%s12903_s2 + $0x68] ss:$16 sps:$4 sm:$0xff]   ;;  %v9618_v45 = vld [vmem:[%s12903_s2 + $0x84] ss:$16 sps:$4 sm:$0xff]  }
 0x133   :  { %v1092_v6 = vmul.f32 0.0, %v9343_v4  ;;  %v9345_v63 = vpop.eup %9344  ;;  %v9619_v4 = vld [vmem:[%s12903_s2 + $0x8c] ss:$16 sps:$4 sm:$0xff]  }
 0x135   :  { %v10375_v61 = vadd.f32 %v1093_v62, %v1092_v6  ;;  %v9620_v62 = vld [vmem:[%s12903_s2 + $0x80] ss:$16 sps:$4 sm:$0xff]   ;;  %v9622_v6 = vld [vmem:[%s12903_s2 + $0xa4] ss:$16 sps:$4 sm:$0xff]  }
 0x137   :  { %9346 = vtanh.f32 %v10375_v61 }
 0x141   :  { %v9347_v3 = vpop.eup %9346 }
 0x142   :  { %v1096_v9 = vmul.f32 %v9347_v3, %v9345_v63  ;;  %v9623_v63 = vld [vmem:[%s12903_s2 + $0xac] ss:$16 sps:$4 sm:$0xff]   ;;  %v9624_v3 = vld [vmem:[%s12903_s2 + $0xa0] ss:$16 sps:$4 sm:$0xff]  }
 0x144   :  { %v10378_v0 = vpack.c.bf16 %v1096_v9, %v1096_v9  ;;  %v9625_v9 = vld [vmem:[%s12903_s2 + $0xa8] ss:$16 sps:$4 sm:$0xff]  }
 0x146   :  { %1323 = vmatmul.mubr.bf16.vlgmr.msra.gmra.mrb[24].mxu0 %v10378_v0  ;;  %1364 = vmatmul.mubr.bf16.vlgmr.msra.gmra.mrb[24].mxu1 %v10378_v0 }
 0x147   :  { %1611 = vmatpush1.bf16.msra.mxu0 %v9604_v7  ;;  %1652 = vmatpush1.bf16.msra.mxu1 %v9605_v2  ;;  %v9626_v7 = vld [vmem:[%s12903_s2 + $0xc4] ss:$16 sps:$4 sm:$0xff]   ;;  %v9627_v2 = vld [vmem:[%s12903_s2 + $0xcc] ss:$16 sps:$4 sm:$0xff]  }
 0x148   :  { %1612 = vmatprep.subr.bf16.mxu0 %v9606_v48  ;;  %1653 = vmatprep.subr.bf16.mxu1 %v9607_v12  ;;  %v9628_v48 = vld [vmem:[%s12903_s2 + $0xc0] ss:$16 sps:$4 sm:$0xff]   ;;  %v9629_v12 = vld [vmem:[%s12903_s2 + $0xc8] ss:$16 sps:$4 sm:$0xff]  }
 0x149   :  { %1642 = vmatprep.mubr.bf16.mxu0 %v13106_v14  ;;  %1683 = vmatprep.mubr.bf16.mxu1 %v13106_v14 }
 0x14b   :  { %1613 = vmatpush1.bf16.msra.mxu0 %v9608_v15  ;;  %1654 = vmatpush1.bf16.msra.mxu1 %v9609_v47  ;;  %v9630_v15 = vld [vmem:[%s12903_s2 + $0xe4] ss:$16 sps:$4 sm:$0xff]   ;;  %v9631_v47 = vld [vmem:[%s12903_s2 + $0xec] ss:$16 sps:$4 sm:$0xff]  }
 0x14c   :  { %1614 = vmatprep.subr.bf16.mxu0 %v9610_v34  ;;  %1655 = vmatprep.subr.bf16.mxu1 %v9611_v16  ;;  %v9632_v34 = vld [vmem:[%s12903_s2 + $0xe0] ss:$16 sps:$4 sm:$0xff]   ;;  %v9633_v16 = vld [vmem:[%s12903_s2 + $0xe8] ss:$16 sps:$4 sm:$0xff]  }
 0x14f   :  { %1615 = vmatpush1.bf16.msra.mxu0 %v9612_v17  ;;  %1656 = vmatpush1.bf16.msra.mxu1 %v9613_v42  ;;  %v9634_v17 = vld [vmem:[%s12904_s5 + $0x4] ss:$16 sps:$4 sm:$0xff]   ;;  %v9635_v42 = vld [vmem:[%s12904_s5 + $0xc] ss:$16 sps:$4 sm:$0xff]  }
 0x150   :  { %1616 = vmatprep.subr.bf16.mxu0 %v9614_v18  ;;  %1657 = vmatprep.subr.bf16.mxu1 %v9615_v43  ;;  %v9636_v18 = vld [vmem:[%s12904_s5] ss:$16 sps:$4 sm:$0xff]   ;;  %v9637_v43 = vld [vmem:[%s12904_s5 + $0x8] ss:$16 sps:$4 sm:$0xff]  }
 0x153   :  { %1617 = vmatpush1.bf16.msra.mxu0 %v9616_v5  ;;  %1658 = vmatpush1.bf16.msra.mxu1 %v9617_v33  ;;  %v9638_v5 = vld [vmem:[%s12904_s5 + $0x24] ss:$16 sps:$4 sm:$0xff]   ;;  %v9639_v33 = vld [vmem:[%s12904_s5 + $0x2c] ss:$16 sps:$4 sm:$0xff]  }
 0x154   :  { %1618 = vmatprep.subr.bf16.mxu0 %v9618_v45  ;;  %1659 = vmatprep.subr.bf16.mxu1 %v9619_v4  ;;  %v9641_v45 = vld [vmem:[%s12904_s5 + $0x28] ss:$16 sps:$4 sm:$0xff]   ;;  %v9642_v4 = vld [vmem:[%s12904_s5 + $0x44] ss:$16 sps:$4 sm:$0xff]  }
 0x157   :  { %1619 = vmatpush1.bf16.msra.mxu0 %v9620_v62  ;;  %1660 = vmatpush1.bf16.msra.mxu1 %v9621_v46  ;;  %v9643_v62 = vld [vmem:[%s12904_s5 + $0x4c] ss:$16 sps:$4 sm:$0xff]   ;;  %v9644_v46 = vld [vmem:[%s12904_s5 + $0x40] ss:$16 sps:$4 sm:$0xff]  }
 0x158   :  { %1620 = vmatprep.subr.bf16.mxu0 %v9622_v6  ;;  %1661 = vmatprep.subr.bf16.mxu1 %v9623_v63  ;;  %v9645_v6 = vld [vmem:[%s12904_s5 + $0x48] ss:$16 sps:$4 sm:$0xff]   ;;  %v1017_v63 = vpop.f32.mrb[20].mxu0 }
 0x15b   :  { %1621 = vmatpush1.bf16.msra.mxu0 %v9624_v3  ;;  %1662 = vmatpush1.bf16.msra.mxu1 %v9625_v9  ;;  %v1058_v3 = vpop.f32.mrb[20].mxu1 }
 0x15c   :  { %1622 = vmatprep.subr.bf16.mxu0 %v9626_v7  ;;  %1663 = vmatprep.subr.bf16.mxu1 %v9627_v2  ;;  %v1060_v9 = vpop.f32.mrb[21].mxu1 }
 0x15d   :  { %v1062_v7 = vpop.f32.mrb[22].mxu1 }
 0x15f   :  { %1623 = vmatpush1.bf16.msra.mxu0 %v9628_v48  ;;  %1664 = vmatpush1.bf16.msra.mxu1 %v9629_v12 }
 0x160   :  { %1624 = vmatprep.subr.bf16.mxu0 %v9630_v15  ;;  %1665 = vmatprep.subr.bf16.mxu1 %v9631_v47  ;;  %v13109_v15 = vsub.s32 3, %v10276_v11 }
 0x163   :  { %1625 = vmatpush1.bf16.msra.mxu0 %v9632_v34  ;;  %1666 = vmatpush1.bf16.msra.mxu1 %v9633_v16  ;;  %v13110_v16 = vsub.s32 2, %v10276_v11 }
 0x164   :  { %1885 = vmatprep.subr.bf16.mxu0 %v9634_v17  ;;  %1926 = vmatprep.subr.bf16.mxu1 %v9635_v42 }
 0x166   :  { %1643 = vmatmul.mubr.bf16.vlgmr.msra.gmra.mrb[28].mxu0 %v10378_v0  ;;  %1684 = vmatmul.mubr.bf16.vlgmr.msra.gmra.mrb[28].mxu1 %v10378_v0  ;;  %v9640_v0 = vld [vmem:[%s12904_s5 + $0x20] ss:$16 sps:$4 sm:$0xff]  }
 0x167   :  { %1886 = vmatpush1.bf16.msra.mxu0 %v9636_v18  ;;  %1927 = vmatpush1.bf16.msra.mxu1 %v9637_v43 }
 0x168   :  { %1887 = vmatprep.subr.bf16.mxu0 %v9638_v5  ;;  %1928 = vmatprep.subr.bf16.mxu1 %v9639_v33 }
 0x169   :  { %1917 = vmatprep.mubr.bf16.mxu0 %v13106_v14  ;;  %1958 = vmatprep.mubr.bf16.mxu1 %v13106_v14 }
 0x16b   :  { %1888 = vmatpush1.bf16.msra.mxu0 %v9640_v0  ;;  %1929 = vmatpush1.bf16.msra.mxu1 %v9641_v45 }
 0x16c   :  { %1889 = vmatprep.subr.bf16.mxu0 %v9642_v4  ;;  %1930 = vmatprep.subr.bf16.mxu1 %v9643_v62 }
 0x16f   :  { %1890 = vmatpush1.bf16.msra.mxu0 %v9644_v46  ;;  %1931 = vmatpush1.bf16.msra.mxu1 %v9645_v6 }
 0x170   :  { %1891 = vmatprep.subr.bf16.mxu0 %v9978_v19  ;;  %1932 = vmatprep.subr.bf16.mxu1 %v9988_v21  ;;  %v1019_v19 = vpop.f32.mrb[21].mxu0 }
 0x171   :  { %v1021_v21 = vpop.f32.mrb[22].mxu0 }
 0x173   :  { %1892 = vmatpush1.bf16.msra.mxu0 %v9983_v20  ;;  %1933 = vmatpush1.bf16.msra.mxu1 %v9994_v22  ;;  %v1022_v20 = vpop.f32.mrb[23].mxu0  ;;  %v1063_v22 = vpop.f32.mrb[23].mxu1 }
 0x174   :  { %1893 = vmatprep.subr.bf16.mxu0 %v10001_v23  ;;  %1934 = vmatprep.subr.bf16.mxu1 %v10012_v25  ;;  %v468_v23 = vld [vmem:[%s12907_s6] sm:$0xf] }
 0x175   :  { %v10551_v47 = vrot.slane %v468_v23, %v13109_v15  ;;  %v10556_v17 = vrot.slane %v468_v23, %v13110_v16  ;;  %v9647_v15 = vld [vmem:[%s12905_s4 + $0x8] ss:$16 sps:$4 sm:$0xff]   ;;  %v9649_v16 = vld [vmem:[%s12905_s4 + $0x2c] ss:$16 sps:$4 sm:$0xff]  }
 0x177   :  { %1894 = vmatpush1.bf16.msra.mxu0 %v10007_v24  ;;  %1935 = vmatpush1.bf16.msra.mxu1 %v10018_v26  ;;  %v13107_v24 = vsub.s32 0, %v10276_v11 }
 0x178   :  { %1895 = vmatprep.subr.bf16.mxu0 %v10026_v27  ;;  %1936 = vmatprep.subr.bf16.mxu1 %v10036_v29 }
 0x179   :  { %v10541_v25 = vrot.slane %v468_v23, %v13107_v24 }
 0x17b   :  { %1896 = vmatpush1.bf16.msra.mxu0 %v10031_v28  ;;  %1937 = vmatpush1.bf16.msra.mxu1 %v10042_v30  ;;  %v13108_v28 = vsub.s32 1, %v10276_v11 }
 0x17c   :  { %1897 = vmatprep.subr.bf16.mxu0 %v10050_v31  ;;  %1938 = vmatprep.subr.bf16.mxu1 %v10060_v35 }
 0x17d   :  { %v10545_v29 = vrot.slane %v468_v23, %v13108_v28 }
 0x17f   :  { %1898 = vmatpush1.bf16.msra.mxu0 %v10055_v32  ;;  %1939 = vmatpush1.bf16.msra.mxu1 %v10066_v36 }
 0x180   :  { %1899 = vmatprep.subr.bf16.mxu0 %v10074_v37  ;;  %1940 = vmatprep.subr.bf16.mxu1 %v10084_v39 }
 0x183   :  { %1900 = vmatpush1.bf16.msra.mxu0 %v10079_v38  ;;  %1941 = vmatpush1.bf16.msra.mxu1 %v10090_v40 }
 0x184   :  { %2192 = vmatprep.subr.bf16.mxu0 %v10098_v41  ;;  %2233 = vmatprep.subr.bf16.mxu1 %v10111_v44 }
 0x219   :  { %v1324_v26 = vpop.f32.mrb[24].mxu0  ;;  %v1365_v27 = vpop.f32.mrb[24].mxu1 }
 0x21a   :  { %v1325_v30 = vadd.f32 %v1324_v26, %v1017_v63  ;;  %v1366_v31 = vadd.f32 %v1365_v27, %v1058_v3  ;;  %v1326_v32 = vpop.f32.mrb[25].mxu0  ;;  %v1367_v35 = vpop.f32.mrb[25].mxu1 }
 0x21b   :  { %v1327_v36 = vadd.f32 %v1326_v32, %v1019_v19  ;;  %v1368_v37 = vadd.f32 %v1367_v35, %v1060_v9  ;;  %v1328_v38 = vpop.f32.mrb[26].mxu0  ;;  %v1369_v39 = vpop.f32.mrb[26].mxu1 }
 0x21c   :  { %v1372_v40 = vadd.f32 %v1325_v30, %v10541_v25  ;;  %v1329_v41 = vpop.f32.mrb[27].mxu0  ;;  %v1370_v44 = vpop.f32.mrb[27].mxu1  ;;  %v1374_v18 = vadd.f32 %v1366_v31, %v10556_v17 }
 0x21d   :  { %v1373_v2 = vadd.f32 %v1327_v36, %v10545_v29  ;;  %v1375_v34 = vadd.f32 %v1368_v37, %v10551_v47 }
 0x21e   :  { %v7936_v48 = vmul.f32 -1.442695, %v1372_v40 }
 0x21f   :  { %v7937_v12 = vmul.f32 -1.442695, %v1373_v2  ;;  %v7938_v42 = vmul.f32 -1.442695, %v1375_v34  ;;  %v9648_v34 = vld [vmem:[%s12905_s4 + $0x24] ss:$16 sps:$4 sm:$0xff]  }
 0x220   :  { %9348 = vpow2.f32 %v7936_v48 }
 0x221   :  { %9350 = vpow2.f32 %v7937_v12  ;;  %v9646_v12 = vld [vmem:[%s12905_s4] ss:$16 sps:$4 sm:$0xff]  }
 0x222   :  { %9352 = vpow2.f32 %v7938_v42  ;;  %v9650_v42 = vld [vmem:[%s12905_s4 + $0x20] ss:$16 sps:$4 sm:$0xff]  }
 0x223   :  { %9354 = vtanh.f32 %v1374_v18  ;;  %v9651_v18 = vld [vmem:[%s12905_s4 + $0x28] ss:$16 sps:$4 sm:$0xff]  }
 0x22a   :  { %v9349_v43 = vpop.eup %9348 }
 0x22b   :  { %v9351_v5 = vpop.eup %9350  ;;  %v1379_v33 = vadd.f32 1.0, %v9349_v43 }
 0x22c   :  { %v1385_v0 = vadd.f32 1.0, %v9351_v5  ;;  %v9353_v45 = vpop.eup %9352 }
 0x22d   :  { %9356 = vrcp.f32 %v1379_v33  ;;  %v9355_v4 = vpop.eup %9354  ;;  %v1392_v63 = vadd.f32 1.0, %v9353_v45 }
 0x22e   :  { %9358 = vrcp.f32 %v1385_v0 }
 0x22f   :  { %9360 = vrcp.f32 %v1392_v63  ;;  %v10629_v63 = vld [vmem:[%s12903_s2 + $0xc] ss:$16 sps:$4 sm:$0xff]  }
 0x237   :  { %v9357_v62 = vpop.eup %9356 }
 0x238   :  { %v9359_v46 = vpop.eup %9358  ;;  %v1396_v6 = vmul.f32 %v9357_v62, %v9355_v4 }
 0x239   :  { %v1395_v11 = vmul.f32 0.0, %v9359_v46  ;;  %v1644_v19 = vpop.f32.mrb[28].mxu0  ;;  %v1685_v3 = vpop.f32.mrb[28].mxu1 }
 0x23a   :  { %v1971_v21 = vadd.f32 %v1644_v19, %v10301_v10  ;;  %v1973_v9 = vadd.f32 %v1685_v3, %v10304_v1  ;;  %v1646_v20 = vpop.f32.mrb[29].mxu0  ;;  %v1687_v7 = vpop.f32.mrb[29].mxu1  ;;  %v13111_v1 = vlaneseq  ;;  %v13124_v19 = vld [vmem:[#allocation15_spill] sm:$0xff]  ;;  %v10636_v3 = vld [vmem:[%s12903_s2] ss:$16 sps:$4 sm:$0xff]  }
 0x23b   :  { %v10561_v22 = vadd.f32 %v1396_v6, %v1395_v11  ;;  %v1972_v23 = vadd.f32 %v1646_v20, %v10306_v8  ;;  %v1974_v24 = vadd.f32 %v1687_v7, %v10309_v13  ;;  %v1648_v26 = vpop.f32.mrb[30].mxu0  ;;  %v1689_v27 = vpop.f32.mrb[30].mxu1  ;;  %v9654_v8 = vmov 0.0   ;;  %v10624_v6 = vld [vmem:[%s12903_s2 + $0x4] ss:$16 sps:$4 sm:$0xff]  }
 0x23c   :  { %v8004_v28 = vmul.f32 -1.442695, %v1971_v21  ;;  %v1649_v30 = vpop.f32.mrb[31].mxu0  ;;  %v1690_v31 = vpop.f32.mrb[31].mxu1  ;;  %v505_v10 = vand.u32 127, %v13111_v1  ;;  %v13123_v11 = vld [vmem:[#allocation14_spill] sm:$0xff] }
 0x23d   :  { %9362 = vtanh.f32 %v10561_v22  ;;  %v8005_v32 = vmul.f32 -1.442695, %v1972_v23  ;;  %v8006_v35 = vmul.f32 -1.442695, %v1974_v24  ;;  %v9361_v36 = vpop.eup %9360  ;;  %v10641_v21 = vld [vmem:[%s12903_s2 + $0x8] ss:$16 sps:$4 sm:$0xff]  }
 0x23e   :  { %9364 = vpow2.f32 %v8004_v28  ;;  %vm506_vm0 = vcmp.lt.s32.totalorder %v505_v10, 32  ;;  %v10650_v20 = vld [vmem:[%s12903_s2 + $0x24] ss:$16 sps:$4 sm:$0xff]   ;;  %v10655_v7 = vld [vmem:[%s12903_s2 + $0x2c] ss:$16 sps:$4 sm:$0xff]  }
 0x23f   :  { %9366 = vpow2.f32 %v8005_v32  ;;  %v10567_v38 = vsel %vm506_vm0, 1.0, %v9654_v8  ;;  %v10664_v23 = vld [vmem:[%s12903_s2 + $0x20] ss:$16 sps:$4 sm:$0xff]   ;;  %v10669_v24 = vld [vmem:[%s12903_s2 + $0x28] ss:$16 sps:$4 sm:$0xff]  }
 0x240   :  { %9368 = vpow2.f32 %v8006_v35  ;;  %v10676_v26 = vld [vmem:[%s12903_s2 + $0x44] ss:$16 sps:$4 sm:$0xff]   ;;  %v10681_v27 = vld [vmem:[%s12903_s2 + $0x4c] ss:$16 sps:$4 sm:$0xff]   ;;  %v10690_v28 = vld [vmem:[%s12903_s2 + $0x40] ss:$16 sps:$4 sm:$0xff]  }
 0x241   :  { %9370 = vtanh.f32 %v1973_v9  ;;  %v10695_v30 = vld [vmem:[%s12903_s2 + $0x48] ss:$16 sps:$4 sm:$0xff]   ;;  %v10702_v31 = vld [vmem:[%s12903_s2 + $0x64] ss:$16 sps:$4 sm:$0xff]   ;;  %v10707_v32 = vld [vmem:[%s12903_s2 + $0x6c] ss:$16 sps:$4 sm:$0xff]  }
 0x242   :  { %v10714_v1 = vld [vmem:[%s12903_s2 + $0x60] ss:$16 sps:$4 sm:$0xff]   ;;  %v10719_v10 = vld [vmem:[%s12903_s2 + $0x68] ss:$16 sps:$4 sm:$0xff]   ;;  %v10726_v35 = vld [vmem:[%s12903_s2 + $0x84] ss:$16 sps:$4 sm:$0xff]  }
 0x243   :  { %v10743_v8 = vld [vmem:[%s12903_s2 + $0x88] ss:$16 sps:$4 sm:$0xff]  }
 0x247   :  { %v9363_v37 = vpop.eup %9362 }
 0x248   :  { %v9365_v13 = vpop.eup %9364  ;;  %v10569_v39 = vmul.f32 %v9363_v37, %v9361_v36  ;;  %v10731_v36 = vld [vmem:[%s12903_s2 + $0x8c] ss:$16 sps:$4 sm:$0xff]   ;;  %v10738_v37 = vld [vmem:[%s12903_s2 + $0x80] ss:$16 sps:$4 sm:$0xff]  }
 0x249   :  { %v9367_v40 = vpop.eup %9366  ;;  %v1978_v41 = vadd.f32 1.0, %v9365_v13  ;;  %v10750_v13 = vld [vmem:[%s12903_s2 + $0xa4] ss:$16 sps:$4 sm:$0xff]  }
 0x24a   :  { %13112 = vst [vmem:[#allocation40_spill] sm:$0xff] %v10569_v39  ;;  %v1984_v44 = vadd.f32 1.0, %v9367_v40  ;;  %v1692_v2 = vpack.c.bf16 %v10569_v39, %v10569_v39  ;;  %v1400_v48 = vmul.f32 %v10567_v38, %v10569_v39  ;;  %v9369_v43 = vpop.eup %9368  ;;  %v10755_v40 = vld [vmem:[%s12903_s2 + $0xac] ss:$16 sps:$4 sm:$0xff]   ;;  %v10963_v39 = vld [vmem:[%s12904_s5 + $0xa8] ss:$16 sps:$4 sm:$0xff]  }
 0x24b   :  { %9372 = vrcp.f32 %v1978_v41  ;;  %v9371_v5 = vpop.eup %9370  ;;  %v1991_v4 = vadd.f32 1.0, %v9369_v43  ;;  %v10762_v41 = vld [vmem:[%s12903_s2 + $0xa0] ss:$16 sps:$4 sm:$0xff]   ;;  %v10828_v43 = vld [vmem:[%s12904_s5 + $0x4] ss:$16 sps:$4 sm:$0xff]   ;;  %13146 = vst [vmem:[#allocation50_spill] sm:$0xff] %v10963_v39 }
 0x24c   :  { %9374 = vrcp.f32 %v1984_v44  ;;  %1918 = vmatmul.mubr.bf16.vlgmr.msra.gmra.mrb[32].mxu0 %v1692_v2  ;;  %1959 = vmatmul.mubr.bf16.vlgmr.msra.gmra.mrb[32].mxu1 %v1692_v2  ;;  %v10767_v44 = vld [vmem:[%s12903_s2 + $0xa8] ss:$16 sps:$4 sm:$0xff]   ;;  %v10774_v2 = vld [vmem:[%s12903_s2 + $0xc4] ss:$16 sps:$4 sm:$0xff]  }
 0x24d   :  { %2193 = vmatpush1.bf16.msra.mxu0 %v9646_v12  ;;  %2234 = vmatpush1.bf16.msra.mxu1 %v9647_v15  ;;  %9376 = vrcp.f32 %v1991_v4  ;;  %v10786_v12 = vld [vmem:[%s12903_s2 + $0xc0] ss:$16 sps:$4 sm:$0xff]   ;;  %v10791_v15 = vld [vmem:[%s12903_s2 + $0xc8] ss:$16 sps:$4 sm:$0xff]   ;;  %v10857_v4 = vld [vmem:[%s12904_s5 + $0x2c] ss:$16 sps:$4 sm:$0xff]  }
 0x24e   :  { %1401 = vadd.xlane.f32.xlu0 %v1400_v48  ;;  %2194 = vmatprep.subr.bf16.mxu0 %v9648_v34  ;;  %v10779_v48 = vld [vmem:[%s12903_s2 + $0xcc] ss:$16 sps:$4 sm:$0xff]   ;;  %v10798_v34 = vld [vmem:[%s12903_s2 + $0xe4] ss:$16 sps:$4 sm:$0xff]  }
 0x24f   :  { %2235 = vmatprep.subr.bf16.mxu1 %v9649_v16  ;;  %2224 = vmatprep.mubr.bf16.mxu0 %v13106_v14  ;;  %v10803_v16 = vld [vmem:[%s12903_s2 + $0xec] ss:$16 sps:$4 sm:$0xff]  }
 0x250   :  { %2265 = vmatprep.mubr.bf16.mxu1 %v13106_v14 }
 0x251   :  { %2195 = vmatpush1.bf16.msra.mxu0 %v9650_v42  ;;  %2236 = vmatpush1.bf16.msra.mxu1 %v9651_v18  ;;  %v10810_v42 = vld [vmem:[%s12903_s2 + $0xe0] ss:$16 sps:$4 sm:$0xff]   ;;  %v10815_v18 = vld [vmem:[%s12903_s2 + $0xe8] ss:$16 sps:$4 sm:$0xff]  }
 0x252   :  { %2196 = vmatprep.subr.bf16.mxu0 %v10132_v49  ;;  %2237 = vmatprep.subr.bf16.mxu1 %v10137_v50  ;;  %v13113_v49 = vld [vmem:[#allocation4_spill] sm:$0xff]  ;;  %v13114_v50 = vld [vmem:[#allocation5_spill] sm:$0xff] }
 0x255   :  { %v9373_v33 = vpop.eup %9372  ;;  %2197 = vmatpush1.bf16.msra.mxu0 %v10142_v51  ;;  %2238 = vmatpush1.bf16.msra.mxu1 %v10147_v52  ;;  %v13115_v51 = vld [vmem:[#allocation6_spill] sm:$0xff]  ;;  %v13116_v52 = vld [vmem:[#allocation7_spill] sm:$0xff] }
 0x256   :  { %v9375_v0 = vpop.eup %9374  ;;  %v1995_v45 = vmul.f32 %v9373_v33, %v9371_v5  ;;  %2198 = vmatprep.subr.bf16.mxu0 %v10155_v53  ;;  %2239 = vmatprep.subr.bf16.mxu1 %v10160_v54  ;;  %v13117_v53 = vld [vmem:[#allocation8_spill] sm:$0xff]  ;;  %v13118_v54 = vld [vmem:[#allocation10_spill] sm:$0xff]  ;;  %v10833_v5 = vld [vmem:[%s12904_s5 + $0xc] ss:$16 sps:$4 sm:$0xff]   ;;  %13128 = vst [vmem:[#allocation7_spill] sm:$0xff] %v10857_v4 }
 0x257   :  { %v1994_v62 = vmul.f32 %v9375_v0, %v10375_v61  ;;  %v10838_v33 = vld [vmem:[%s12904_s5] ss:$16 sps:$4 sm:$0xff]   ;;  %v10843_v0 = vld [vmem:[%s12904_s5 + $0x8] ss:$16 sps:$4 sm:$0xff]  }
 0x258   :  { %13125 = vst [vmem:[#allocation4_spill] sm:$0xff] %v10838_v33  ;;  %13126 = vst [vmem:[#allocation5_spill] sm:$0xff] %v10843_v0 }
 0x259   :  { %v10602_v46 = vadd.f32 %v1995_v45, %v1994_v62  ;;  %2199 = vmatpush1.bf16.msra.mxu0 %v10166_v55  ;;  %2240 = vmatpush1.bf16.msra.mxu1 %v10171_v56  ;;  %v9377_v55 = vpop.eup %9376  ;;  %v10852_v45 = vld [vmem:[%s12904_s5 + $0x24] ss:$16 sps:$4 sm:$0xff]   ;;  %v10862_v62 = vld [vmem:[%s12904_s5 + $0x20] ss:$16 sps:$4 sm:$0xff]  }
 0x25a   :  { %2200 = vmatprep.subr.bf16.mxu0 %v10179_v57  ;;  %2241 = vmatprep.subr.bf16.mxu1 %v10184_v58  ;;  %v13119_v57 = vld [vmem:[#allocation9_spill] sm:$0xff]  ;;  %v13120_v58 = vld [vmem:[#allocation12_spill] sm:$0xff]  ;;  %13127 = vst [vmem:[#allocation6_spill] sm:$0xff] %v10852_v45  ;;  %13129 = vst [vmem:[#allocation8_spill] sm:$0xff] %v10862_v62 }
 0x25b   :  { %9378 = vtanh.f32 %v10602_v46 }
 0x25d   :  { %2201 = vmatpush1.bf16.msra.mxu0 %v10190_v59  ;;  %2242 = vmatpush1.bf16.msra.mxu1 %v10195_v60  ;;  %v13121_v59 = vld [vmem:[#allocation11_spill] sm:$0xff]  ;;  %v13122_v60 = vld [vmem:[#allocation13_spill] sm:$0xff] }
 0x25e   :  { %2202 = vmatprep.subr.bf16.mxu0 %v13113_v49  ;;  %2243 = vmatprep.subr.bf16.mxu1 %v13114_v50  ;;  %v10867_v49 = vld [vmem:[%s12904_s5 + $0x28] ss:$16 sps:$4 sm:$0xff]   ;;  %v10876_v50 = vld [vmem:[%s12904_s5 + $0x44] ss:$16 sps:$4 sm:$0xff]  }
 0x25f   :  { %13130 = vst [vmem:[#allocation10_spill] sm:$0xff] %v10867_v49  ;;  %13131 = vst [vmem:[#allocation9_spill] sm:$0xff] %v10876_v50 }
 0x261   :  { %2203 = vmatpush1.bf16.msra.mxu0 %v13115_v51  ;;  %2244 = vmatpush1.bf16.msra.mxu1 %v13116_v52  ;;  %v10881_v51 = vld [vmem:[%s12904_s5 + $0x4c] ss:$16 sps:$4 sm:$0xff]   ;;  %v10886_v52 = vld [vmem:[%s12904_s5 + $0x40] ss:$16 sps:$4 sm:$0xff]  }
 0x262   :  { %2204 = vmatprep.subr.bf16.mxu0 %v13117_v53  ;;  %2245 = vmatprep.subr.bf16.mxu1 %v13118_v54  ;;  %13132 = vst [vmem:[#allocation12_spill] sm:$0xff] %v10881_v51  ;;  %13133 = vst [vmem:[#allocation11_spill] sm:$0xff] %v10886_v52  ;;  %v10891_v53 = vld [vmem:[%s12904_s5 + $0x48] ss:$16 sps:$4 sm:$0xff]   ;;  %v10900_v54 = vld [vmem:[%s12904_s5 + $0x64] ss:$16 sps:$4 sm:$0xff]  }
 0x263   :  { %13134 = vst [vmem:[#allocation13_spill] sm:$0xff] %v10891_v53  ;;  %13135 = vst [vmem:[#allocation14_spill] sm:$0xff] %v10900_v54 }
 0x265   :  { %v9379_v56 = vpop.eup %9378  ;;  %2205 = vmatpush1.bf16.msra.mxu0 %v13119_v57  ;;  %2246 = vmatpush1.bf16.msra.mxu1 %v13120_v58  ;;  %v10915_v57 = vld [vmem:[%s12904_s5 + $0x68] ss:$16 sps:$4 sm:$0xff]   ;;  %v10924_v58 = vld [vmem:[%s12904_s5 + $0x84] ss:$16 sps:$4 sm:$0xff]  }
 0x266   :  { %2206 = vmatprep.subr.bf16.mxu0 %v13121_v59  ;;  %2247 = vmatprep.subr.bf16.mxu1 %v13122_v60  ;;  %v1998_v61 = vmul.f32 %v9379_v56, %v9377_v55  ;;  %v10905_v55 = vld [vmem:[%s12904_s5 + $0x6c] ss:$16 sps:$4 sm:$0xff]   ;;  %v10910_v56 = vld [vmem:[%s12904_s5 + $0x60] ss:$16 sps:$4 sm:$0xff]   ;;  %13138 = vst [vmem:[#allocation42_spill] sm:$0xff] %v10915_v57  ;;  %13139 = vst [vmem:[#allocation43_spill] sm:$0xff] %v10924_v58 }
 0x267   :  { %13136 = vst [vmem:[#allocation15_spill] sm:$0xff] %v10905_v55  ;;  %13137 = vst [vmem:[#allocation41_spill] sm:$0xff] %v10910_v56  ;;  %v10929_v59 = vld [vmem:[%s12904_s5 + $0x8c] ss:$16 sps:$4 sm:$0xff]   ;;  %v10934_v60 = vld [vmem:[%s12904_s5 + $0x80] ss:$16 sps:$4 sm:$0xff]  }
 0x268   :  { %v10643_v9 = vpack.c.bf16 %v1998_v61, %v1998_v61  ;;  %13140 = vst [vmem:[#allocation44_spill] sm:$0xff] %v10929_v59  ;;  %13141 = vst [vmem:[#allocation45_spill] sm:$0xff] %v10934_v60  ;;  %v10939_v61 = vld [vmem:[%s12904_s5 + $0x88] ss:$16 sps:$4 sm:$0xff]  }
 0x269   :  { %2207 = vmatpush1.bf16.msra.mxu0 %v13123_v11  ;;  %2248 = vmatpush1.bf16.msra.mxu1 %v13124_v19  ;;  %13142 = vst [vmem:[#allocation46_spill] sm:$0xff] %v10939_v61  ;;  %v10948_v11 = vld [vmem:[%s12904_s5 + $0xa4] ss:$16 sps:$4 sm:$0xff]   ;;  %v10953_v19 = vld [vmem:[%s12904_s5 + $0xac] ss:$16 sps:$4 sm:$0xff]  }
 0x26a   :  { %2512 = vmatprep.subr.bf16.mxu0 %v10624_v6  ;;  %2553 = vmatprep.subr.bf16.mxu1 %v10629_v63  ;;  %13143 = vst [vmem:[#allocation47_spill] sm:$0xff] %v10948_v11  ;;  %13144 = vst [vmem:[#allocation48_spill] sm:$0xff] %v10953_v19 }
 0x26c   :  { %2225 = vmatmul.mubr.bf16.vlgmr.msra.gmra.mrb[36].mxu0 %v10643_v9  ;;  %2266 = vmatmul.mubr.bf16.vlgmr.msra.gmra.mrb[36].mxu1 %v10643_v9 }
 0x26d   :  { %2513 = vmatpush1.bf16.msra.mxu0 %v10636_v3  ;;  %2554 = vmatpush1.bf16.msra.mxu1 %v10641_v21 }
 0x26e   :  { %2514 = vmatprep.subr.bf16.mxu0 %v10650_v20  ;;  %2555 = vmatprep.subr.bf16.mxu1 %v10655_v7 }
 0x26f   :  { %2544 = vmatprep.mubr.bf16.mxu0 %v13106_v14  ;;  %2585 = vmatprep.mubr.bf16.mxu1 %v13106_v14 }
 0x271   :  { %2515 = vmatpush1.bf16.msra.mxu0 %v10664_v23  ;;  %2556 = vmatpush1.bf16.msra.mxu1 %v10669_v24 }
 0x272   :  { %2516 = vmatprep.subr.bf16.mxu0 %v10676_v26  ;;  %2557 = vmatprep.subr.bf16.mxu1 %v10681_v27 }
 0x275   :  { %2517 = vmatpush1.bf16.msra.mxu0 %v10690_v28  ;;  %2558 = vmatpush1.bf16.msra.mxu1 %v10695_v30 }
 0x276   :  { %2518 = vmatprep.subr.bf16.mxu0 %v10702_v31  ;;  %2559 = vmatprep.subr.bf16.mxu1 %v10707_v32 }
 0x279   :  { %2519 = vmatpush1.bf16.msra.mxu0 %v10714_v1  ;;  %2560 = vmatpush1.bf16.msra.mxu1 %v10719_v10 }
 0x27a   :  { %2520 = vmatprep.subr.bf16.mxu0 %v10726_v35  ;;  %2561 = vmatprep.subr.bf16.mxu1 %v10731_v36 }
 0x27d   :  { %2521 = vmatpush1.bf16.msra.mxu0 %v10738_v37  ;;  %2562 = vmatpush1.bf16.msra.mxu1 %v10743_v8 }
 0x27e   :  { %2522 = vmatprep.subr.bf16.mxu0 %v10750_v13  ;;  %2563 = vmatprep.subr.bf16.mxu1 %v10755_v40 }
 0x281   :  { %2523 = vmatpush1.bf16.msra.mxu0 %v10762_v41  ;;  %2564 = vmatpush1.bf16.msra.mxu1 %v10767_v44 }
 0x282   :  { %2524 = vmatprep.subr.bf16.mxu0 %v10774_v2  ;;  %2565 = vmatprep.subr.bf16.mxu1 %v10779_v48 }
 0x285   :  { %2525 = vmatpush1.bf16.msra.mxu0 %v10786_v12  ;;  %2566 = vmatpush1.bf16.msra.mxu1 %v10791_v15 }
 0x286   :  { %2526 = vmatprep.subr.bf16.mxu0 %v10798_v34  ;;  %2567 = vmatprep.subr.bf16.mxu1 %v10803_v16 }
 0x289   :  { %2527 = vmatpush1.bf16.msra.mxu0 %v10810_v42  ;;  %2568 = vmatpush1.bf16.msra.mxu1 %v10815_v18 }
 0x28a   :  { %2787 = vmatprep.subr.bf16.mxu0 %v10828_v43  ;;  %2828 = vmatprep.subr.bf16.mxu1 %v10833_v5 }
 0x28c   :  { %2545 = vmatmul.mubr.bf16.vlgmr.msra.gmra.mrb[40].mxu0 %v10643_v9  ;;  %2586 = vmatmul.mubr.bf16.vlgmr.msra.gmra.mrb[40].mxu1 %v10643_v9  ;;  %v10958_v9 = vld [vmem:[%s12904_s5 + $0xa0] ss:$16 sps:$4 sm:$0xff]  }
 0x28d   :  { %2819 = vmatprep.mubr.bf16.mxu0 %v13106_v14  ;;  %2860 = vmatprep.mubr.bf16.mxu1 %v13106_v14  ;;  %13145 = vst [vmem:[#allocation49_spill] sm:$0xff] %v10958_v9 }
 0x28e   :  { %2788 = vmatpush1.bf16.msra.mxu0 %v10838_v33  ;;  %2829 = vmatpush1.bf16.msra.mxu1 %v10843_v0 }
 0x28f   :  { %2789 = vmatprep.subr.bf16.mxu0 %v10852_v45  ;;  %2830 = vmatprep.subr.bf16.mxu1 %v10857_v4 }
 0x292   :  { %2790 = vmatpush1.bf16.msra.mxu0 %v10862_v62  ;;  %2831 = vmatpush1.bf16.msra.mxu1 %v10867_v49 }
 0x293   :  { %2791 = vmatprep.subr.bf16.mxu0 %v10876_v50  ;;  %2832 = vmatprep.subr.bf16.mxu1 %v10881_v51 }
 0x296   :  { %2792 = vmatpush1.bf16.msra.mxu0 %v10886_v52  ;;  %2833 = vmatpush1.bf16.msra.mxu1 %v10891_v53 }
 0x297   :  { %2793 = vmatprep.subr.bf16.mxu0 %v10900_v54  ;;  %2834 = vmatprep.subr.bf16.mxu1 %v10905_v55 }
 0x29a   :  { %2794 = vmatpush1.bf16.msra.mxu0 %v10910_v56  ;;  %2835 = vmatpush1.bf16.msra.mxu1 %v10915_v57 }
 0x29b   :  { %2795 = vmatprep.subr.bf16.mxu0 %v10924_v58  ;;  %2836 = vmatprep.subr.bf16.mxu1 %v10929_v59 }
 0x29e   :  { %2796 = vmatpush1.bf16.msra.mxu0 %v10934_v60  ;;  %2837 = vmatpush1.bf16.msra.mxu1 %v10939_v61  ;;  %v10972_v61 = vld [vmem:[%s12904_s5 + $0xc4] ss:$16 sps:$4 sm:$0xff]   ;;  %v10977_v60 = vld [vmem:[%s12904_s5 + $0xcc] ss:$16 sps:$4 sm:$0xff]  }
 0x29f   :  { %2797 = vmatprep.subr.bf16.mxu0 %v10948_v11  ;;  %2838 = vmatprep.subr.bf16.mxu1 %v10953_v19  ;;  %13147 = vst [vmem:[#allocation51_spill] sm:$0xff] %v10972_v61  ;;  %13148 = vst [vmem:[#allocation52_spill] sm:$0xff] %v10977_v60  ;;  %v10982_v11 = vld [vmem:[%s12904_s5 + $0xc0] ss:$16 sps:$4 sm:$0xff]   ;;  %v11001_v19 = vld [vmem:[%s12904_s5 + $0xec] ss:$16 sps:$4 sm:$0xff]  }
 0x2a0   :  { %13149 = vst [vmem:[#allocation53_spill] sm:$0xff] %v10982_v11  ;;  %13152 = vst [vmem:[#allocation56_spill] sm:$0xff] %v11001_v19 }
 0x2a2   :  { %2798 = vmatpush1.bf16.msra.mxu0 %v10958_v9  ;;  %2839 = vmatpush1.bf16.msra.mxu1 %v10963_v39  ;;  %v10987_v9 = vld [vmem:[%s12904_s5 + $0xc8] ss:$16 sps:$4 sm:$0xff]   ;;  %v10996_v39 = vld [vmem:[%s12904_s5 + $0xe4] ss:$16 sps:$4 sm:$0xff]  }
 0x2a3   :  { %13150 = vst [vmem:[#allocation54_spill] sm:$0xff] %v10987_v9  ;;  %2799 = vmatprep.subr.bf16.mxu0 %v10972_v61  ;;  %2840 = vmatprep.subr.bf16.mxu1 %v10977_v60  ;;  %13151 = vst [vmem:[#allocation55_spill] sm:$0xff] %v10996_v39  ;;  %v11006_v61 = vld [vmem:[%s12904_s5 + $0xe0] ss:$16 sps:$4 sm:$0xff]   ;;  %v11025_v60 = vld [vmem:[%s12905_s4 + $0xc] ss:$16 sps:$4 sm:$0xff]  }
 0x2a4   :  { %13153 = vst [vmem:[#allocation57_spill] sm:$0xff] %v11006_v61  ;;  %13156 = vst [vmem:[#allocation60_spill] sm:$0xff] %v11025_v60 }
 0x2a6   :  { %2800 = vmatpush1.bf16.msra.mxu0 %v10982_v11  ;;  %2841 = vmatpush1.bf16.msra.mxu1 %v10987_v9  ;;  %v11011_v11 = vld [vmem:[%s12904_s5 + $0xe8] ss:$16 sps:$4 sm:$0xff]   ;;  %v11020_v9 = vld [vmem:[%s12905_s4 + $0x4] ss:$16 sps:$4 sm:$0xff]  }
 0x2a7   :  { %13154 = vst [vmem:[#allocation58_spill] sm:$0xff] %v11011_v11  ;;  %2801 = vmatprep.subr.bf16.mxu0 %v10996_v39  ;;  %2842 = vmatprep.subr.bf16.mxu1 %v11001_v19  ;;  %13155 = vst [vmem:[#allocation59_spill] sm:$0xff] %v11020_v9 }
 0x2aa   :  { %2802 = vmatpush1.bf16.msra.mxu0 %v11006_v61  ;;  %2843 = vmatpush1.bf16.msra.mxu1 %v11011_v11 }
 0x2ab   :  { %3094 = vmatprep.subr.bf16.mxu0 %v11020_v9  ;;  %3135 = vmatprep.subr.bf16.mxu1 %v11025_v60 }
 0x31f   :  { %v1919_v39 = vpop.f32.mrb[32].mxu0  ;;  %v1960_v19 = vpop.f32.mrb[32].mxu1 }
 0x320   :  { %v1921_v59 = vpop.f32.mrb[33].mxu0  ;;  %v1962_v61 = vpop.f32.mrb[33].mxu1 }
 0x321   :  { %v1923_v58 = vpop.f32.mrb[34].mxu0  ;;  %v1964_v11 = vpop.f32.mrb[34].mxu1 }
 0x322   :  { %v1924_v57 = vpop.f32.mrb[35].mxu0  ;;  %v1965_v56 = vpop.f32.mrb[35].mxu1 }
 0x33f   :  { %v2226_v55 = vpop.f32.mrb[36].mxu0  ;;  %v2267_v54 = vpop.f32.mrb[36].mxu1 }
 0x340   :  { %v2227_v53 = vadd.f32 %v2226_v55, %v1919_v39  ;;  %v2268_v52 = vadd.f32 %v2267_v54, %v1960_v19  ;;  %v2228_v51 = vpop.f32.mrb[37].mxu0  ;;  %v2269_v50 = vpop.f32.mrb[37].mxu1  ;;  %v13158_v19 = vld [vmem:[#allocation17_spill] sm:$0xff] }
 0x341   :  { %v2229_v49 = vadd.f32 %v2228_v51, %v1921_v59  ;;  %v2270_v62 = vadd.f32 %v2269_v50, %v1962_v61  ;;  %v2230_v4 = vpop.f32.mrb[38].mxu0  ;;  %v2271_v9 = vpop.f32.mrb[38].mxu1  ;;  %v13157_v61 = vld [vmem:[#allocation16_spill] sm:$0xff] }
 0x342   :  { %v2274_v60 = vadd.f32 %v2227_v53, %v10541_v25  ;;  %v2231_v45 = vpop.f32.mrb[39].mxu0  ;;  %v2272_v0 = vpop.f32.mrb[39].mxu1  ;;  %v2276_v54 = vadd.f32 %v2268_v52, %v10556_v17 }
 0x343   :  { %v2275_v33 = vadd.f32 %v2229_v49, %v10545_v29  ;;  %v2277_v56 = vadd.f32 %v2270_v62, %v10551_v47 }
 0x344   :  { %v8039_v58 = vmul.f32 -1.442695, %v2274_v60 }
 0x345   :  { %v8040_v11 = vmul.f32 -1.442695, %v2275_v33  ;;  %v8041_v39 = vmul.f32 -1.442695, %v2277_v56 }
 0x346   :  { %9380 = vpow2.f32 %v8039_v58 }
 0x347   :  { %9382 = vpow2.f32 %v8040_v11 }
 0x348   :  { %9384 = vpow2.f32 %v8041_v39  ;;  %v13159_v39 = vld [vmem:[#allocation18_spill] sm:$0xff] }
 0x349   :  { %9386 = vtanh.f32 %v2276_v54 }
 0x350   :  { %v9381_v55 = vpop.eup %9380 }
 0x351   :  { %v9383_v51 = vpop.eup %9382  ;;  %v2281_v50 = vadd.f32 1.0, %v9381_v55  ;;  %v13160_v55 = vld [vmem:[#allocation19_spill] sm:$0xff] }
 0x352   :  { %v2287_v4 = vadd.f32 1.0, %v9383_v51  ;;  %v9385_v0 = vpop.eup %9384 }
 0x353   :  { %9388 = vrcp.f32 %v2281_v50  ;;  %v9387_v45 = vpop.eup %9386  ;;  %v2294_v57 = vadd.f32 1.0, %v9385_v0 }
 0x354   :  { %9390 = vrcp.f32 %v2287_v4 }
 0x355   :  { %9392 = vrcp.f32 %v2294_v57  ;;  %v11046_v57 = vld [vmem:[%s12905_s4] ss:$16 sps:$4 sm:$0xff]  }
 0x35d   :  { %v9389_v49 = vpop.eup %9388 }
 0x35e   :  { %v9391_v53 = vpop.eup %9390  ;;  %v2298_v33 = vmul.f32 %v9389_v49, %v9387_v45 }
 0x35f   :  { %v2297_v59 = vmul.f32 %v9391_v53, %v10561_v22  ;;  %v2546_v62 = vpop.f32.mrb[40].mxu0  ;;  %v2587_v60 = vpop.f32.mrb[40].mxu1 }
 0x360   :  { %v2873_v52 = vadd.f32 %v2546_v62, %v13157_v61  ;;  %v2875_v9 = vadd.f32 %v2587_v60, %v13158_v19  ;;  %v2548_v58 = vpop.f32.mrb[41].mxu0  ;;  %v2589_v11 = vpop.f32.mrb[41].mxu1 }
 0x361   :  { %v11036_v56 = vadd.f32 %v2298_v33, %v2297_v59  ;;  %v2874_v54 = vadd.f32 %v2548_v58, %v13159_v39  ;;  %v2876_v51 = vadd.f32 %v2589_v11, %v13160_v55  ;;  %v2550_v50 = vpop.f32.mrb[42].mxu0  ;;  %v2591_v4 = vpop.f32.mrb[42].mxu1  ;;  %v11065_v55 = vld [vmem:[%s12905_s4 + $0x2c] ss:$16 sps:$4 sm:$0xff]  }
 0x362   :  { %v8107_v0 = vmul.f32 -1.442695, %v2873_v52  ;;  %v2551_v45 = vpop.f32.mrb[43].mxu0  ;;  %v2592_v22 = vpop.f32.mrb[43].mxu1  ;;  %v11051_v52 = vld [vmem:[%s12905_s4 + $0x8] ss:$16 sps:$4 sm:$0xff]  }
 0x363   :  { %9394 = vtanh.f32 %v11036_v56  ;;  %v8108_v49 = vmul.f32 -1.442695, %v2874_v54  ;;  %v8109_v53 = vmul.f32 -1.442695, %v2876_v51  ;;  %v9393_v62 = vpop.eup %9392  ;;  %v11060_v54 = vld [vmem:[%s12905_s4 + $0x24] ss:$16 sps:$4 sm:$0xff]  }
 0x364   :  { %9396 = vpow2.f32 %v8107_v0  ;;  %v11077_v51 = vld [vmem:[%s12905_s4 + $0x28] ss:$16 sps:$4 sm:$0xff]   ;;  %v11083_v50 = vld [vmem:[%s12905_s4 + $0x44] ss:$16 sps:$4 sm:$0xff]   ;;  %v11088_v4 = vld [vmem:[%s12905_s4 + $0x4c] ss:$16 sps:$4 sm:$0xff]  }
 0x365   :  { %9398 = vpow2.f32 %v8108_v49  ;;  %v11098_v0 = vld [vmem:[%s12905_s4 + $0x40] ss:$16 sps:$4 sm:$0xff]   ;;  %v11103_v45 = vld [vmem:[%s12905_s4 + $0x48] ss:$16 sps:$4 sm:$0xff]   ;;  %v11110_v22 = vld [vmem:[%s12905_s4 + $0x64] ss:$16 sps:$4 sm:$0xff]  }
 0x366   :  { %9400 = vpow2.f32 %v8109_v53  ;;  %13162 = vst [vmem:[#allocation17_spill] sm:$0xff] %v11098_v0  ;;  %13163 = vst [vmem:[#allocation18_spill] sm:$0xff] %v11103_v45  ;;  %v11115_v49 = vld [vmem:[%s12905_s4 + $0x6c] ss:$16 sps:$4 sm:$0xff]  }
 0x367   :  { %9402 = vtanh.f32 %v2875_v9  ;;  %v11072_v9 = vld [vmem:[%s12905_s4 + $0x20] ss:$16 sps:$4 sm:$0xff]  }
 0x36d   :  { %v9395_v60 = vpop.eup %9394 }
 0x36e   :  { %v9397_v33 = vpop.eup %9396  ;;  %v11041_v59 = vmul.f32 %v9395_v60, %v9393_v62 }
 0x36f   :  { %v9399_v61 = vpop.eup %9398  ;;  %v2880_v19 = vadd.f32 1.0, %v9397_v33  ;;  %v11122_v33 = vld [vmem:[%s12905_s4 + $0x60] ss:$16 sps:$4 sm:$0xff]  }
 0x370   :  { %13161 = vst [vmem:[#allocation16_spill] sm:$0xff] %v11041_v59  ;;  %v2886_v58 = vadd.f32 1.0, %v9399_v61  ;;  %v2594_v11 = vpack.c.bf16 %v11041_v59, %v11041_v59  ;;  %v2302_v39 = vmul.f32 %v10567_v38, %v11041_v59  ;;  %v9401_v53 = vpop.eup %9400  ;;  %v11127_v61 = vld [vmem:[%s12905_s4 + $0x68] ss:$16 sps:$4 sm:$0xff]   ;;  %v11139_v59 = vld [vmem:[%s12905_s4 + $0x8c] ss:$16 sps:$4 sm:$0xff]  }
 0x371   :  { %9404 = vrcp.f32 %v2880_v19  ;;  %v9403_v62 = vpop.eup %9402  ;;  %13165 = vst [vmem:[#allocation61_spill] sm:$0xff] %v11139_v59 }
 0x372   :  { %9406 = vrcp.f32 %v2886_v58  ;;  %2820 = vmatmul.mubr.bf16.vlgmr.msra.gmra.mrb[44].mxu0 %v2594_v11  ;;  %2861 = vmatmul.mubr.bf16.vlgmr.msra.gmra.mrb[44].mxu1 %v2594_v11  ;;  %v2893_v11 = vadd.f32 1.0, %v9401_v53  ;;  %v11149_v53 = vld [vmem:[%s12905_s4 + $0x80] ss:$16 sps:$4 sm:$0xff]  }
 0x373   :  { %3095 = vmatpush1.bf16.msra.mxu0 %v11046_v57  ;;  %3136 = vmatpush1.bf16.msra.mxu1 %v11051_v52  ;;  %13166 = vst [vmem:[#allocation62_spill] sm:$0xff] %v11149_v53 }
 0x374   :  { %2303 = vadd.xlane.f32.xlu0 %v2302_v39  ;;  %3096 = vmatprep.subr.bf16.mxu0 %v11060_v54  ;;  %v11134_v39 = vld [vmem:[%s12905_s4 + $0x84] ss:$16 sps:$4 sm:$0xff]   ;;  %9408 = vrcp.f32 %v2893_v11  ;;  %v11191_v11 = vld [vmem:[%s12905_s4 + $0xcc] ss:$16 sps:$4 sm:$0xff]  }
 0x375   :  { %3137 = vmatprep.subr.bf16.mxu1 %v11065_v55  ;;  %3126 = vmatprep.mubr.bf16.mxu0 %v13106_v14  ;;  %13164 = vst [vmem:[#allocation19_spill] sm:$0xff] %v11134_v39  ;;  %13173 = vst [vmem:[#allocation69_spill] sm:$0xff] %v11191_v11 }
 0x376   :  { %3167 = vmatprep.mubr.bf16.mxu1 %v13106_v14 }
 0x377   :  { %3097 = vmatpush1.bf16.msra.mxu0 %v11072_v9  ;;  %3138 = vmatpush1.bf16.msra.mxu1 %v11077_v51 }
 0x378   :  { %3098 = vmatprep.subr.bf16.mxu0 %v11083_v50  ;;  %3139 = vmatprep.subr.bf16.mxu1 %v11088_v4 }
 0x37b   :  { %v9405_v60 = vpop.eup %9404  ;;  %3099 = vmatpush1.bf16.msra.mxu0 %v11098_v0  ;;  %3140 = vmatpush1.bf16.msra.mxu1 %v11103_v45 }
 0x37c   :  { %v9407_v19 = vpop.eup %9406  ;;  %v2897_v58 = vmul.f32 %v9405_v60, %v9403_v62  ;;  %3100 = vmatprep.subr.bf16.mxu0 %v11110_v22  ;;  %3141 = vmatprep.subr.bf16.mxu1 %v11115_v49  ;;  %v11154_v62 = vld [vmem:[%s12905_s4 + $0x88] ss:$16 sps:$4 sm:$0xff]   ;;  %v11174_v60 = vld [vmem:[%s12905_s4 + $0xa0] ss:$16 sps:$4 sm:$0xff]  }
 0x37d   :  { %v2896_v45 = vmul.f32 %v9407_v19, %v10602_v46  ;;  %13167 = vst [vmem:[#allocation63_spill] sm:$0xff] %v11154_v62  ;;  %v11161_v46 = vld [vmem:[%s12905_s4 + $0xa4] ss:$16 sps:$4 sm:$0xff]   ;;  %13170 = vst [vmem:[#allocation66_spill] sm:$0xff] %v11174_v60  ;;  %v11179_v19 = vld [vmem:[%s12905_s4 + $0xa8] ss:$16 sps:$4 sm:$0xff]  }
 0x37e   :  { %13168 = vst [vmem:[#allocation64_spill] sm:$0xff] %v11161_v46  ;;  %13171 = vst [vmem:[#allocation67_spill] sm:$0xff] %v11179_v19 }
 0x37f   :  { %v11142_v0 = vadd.f32 %v2897_v58, %v2896_v45  ;;  %3101 = vmatpush1.bf16.msra.mxu0 %v11122_v33  ;;  %3142 = vmatpush1.bf16.msra.mxu1 %v11127_v61  ;;  %v11166_v45 = vld [vmem:[%s12905_s4 + $0xac] ss:$16 sps:$4 sm:$0xff]   ;;  %v11186_v58 = vld [vmem:[%s12905_s4 + $0xc4] ss:$16 sps:$4 sm:$0xff]  }
 0x380   :  { %3102 = vmatprep.subr.bf16.mxu0 %v11134_v39  ;;  %3143 = vmatprep.subr.bf16.mxu1 %v11139_v59  ;;  %13169 = vst [vmem:[#allocation65_spill] sm:$0xff] %v11166_v45  ;;  %13172 = vst [vmem:[#allocation68_spill] sm:$0xff] %v11186_v58 }
 0x381   :  { %9410 = vtanh.f32 %v11142_v0 }
 0x383   :  { %3103 = vmatpush1.bf16.msra.mxu0 %v11149_v53  ;;  %3144 = vmatpush1.bf16.msra.mxu1 %v11154_v62  ;;  %v9409_v62 = vpop.eup %9408 }
 0x384   :  { %3104 = vmatprep.subr.bf16.mxu0 %v11161_v46  ;;  %3145 = vmatprep.subr.bf16.mxu1 %v11166_v45  ;;  %v11198_v46 = vld [vmem:[%s12905_s4 + $0xc0] ss:$16 sps:$4 sm:$0xff]   ;;  %v11203_v45 = vld [vmem:[%s12905_s4 + $0xc8] ss:$16 sps:$4 sm:$0xff]  }
 0x387   :  { %3105 = vmatpush1.bf16.msra.mxu0 %v11174_v60  ;;  %3146 = vmatpush1.bf16.msra.mxu1 %v11179_v19  ;;  %v11210_v60 = vld [vmem:[%s12905_s4 + $0xe4] ss:$16 sps:$4 sm:$0xff]   ;;  %v11215_v19 = vld [vmem:[%s12905_s4 + $0xec] ss:$16 sps:$4 sm:$0xff]  }
 0x388   :  { %3106 = vmatprep.subr.bf16.mxu0 %v11186_v58  ;;  %3147 = vmatprep.subr.bf16.mxu1 %v11191_v11  ;;  %v11222_v11 = vld [vmem:[%s12905_s4 + $0xe0] ss:$16 sps:$4 sm:$0xff]   ;;  %v11227_v58 = vld [vmem:[%s12905_s4 + $0xe8] ss:$16 sps:$4 sm:$0xff]  }
 0x38b   :  { %v9411_v53 = vpop.eup %9410  ;;  %3107 = vmatpush1.bf16.msra.mxu0 %v11198_v46  ;;  %3148 = vmatpush1.bf16.msra.mxu1 %v11203_v45 }
 0x38c   :  { %3108 = vmatprep.subr.bf16.mxu0 %v11210_v60  ;;  %3149 = vmatprep.subr.bf16.mxu1 %v11215_v19  ;;  %v2900_v59 = vmul.f32 %v9411_v53, %v9409_v62 }
 0x38e   :  { %v2901_v39 = vpack.c.bf16 %v2900_v59, %v2900_v59 }
 0x38f   :  { %3109 = vmatpush1.bf16.msra.mxu0 %v11222_v11  ;;  %3150 = vmatpush1.bf16.msra.mxu1 %v11227_v58 }
 0x390   :  { %3414 = vmatprep.subr.bf16.mxu0 %v10624_v6  ;;  %3455 = vmatprep.subr.bf16.mxu1 %v10629_v63  ;;  %v13174_v6 = vld [vmem:[#allocation4_spill] sm:$0xff]  ;;  %v13175_v63 = vld [vmem:[#allocation5_spill] sm:$0xff] }
 0x392   :  { %3127 = vmatmul.mubr.bf16.vlgmr.msra.gmra.mrb[48].mxu0 %v2901_v39  ;;  %3168 = vmatmul.mubr.bf16.vlgmr.msra.gmra.mrb[48].mxu1 %v2901_v39 }
 0x393   :  { %3415 = vmatpush1.bf16.msra.mxu0 %v10636_v3  ;;  %3456 = vmatpush1.bf16.msra.mxu1 %v10641_v21  ;;  %v13176_v3 = vld [vmem:[#allocation6_spill] sm:$0xff]  ;;  %v13177_v21 = vld [vmem:[#allocation7_spill] sm:$0xff] }
 0x394   :  { %3416 = vmatprep.subr.bf16.mxu0 %v10650_v20  ;;  %3457 = vmatprep.subr.bf16.mxu1 %v10655_v7  ;;  %v13178_v20 = vld [vmem:[#allocation8_spill] sm:$0xff]  ;;  %v13179_v7 = vld [vmem:[#allocation10_spill] sm:$0xff] }
 0x395   :  { %3446 = vmatprep.mubr.bf16.mxu0 %v13106_v14  ;;  %3487 = vmatprep.mubr.bf16.mxu1 %v13106_v14 }
 0x397   :  { %3417 = vmatpush1.bf16.msra.mxu0 %v10664_v23  ;;  %3458 = vmatpush1.bf16.msra.mxu1 %v10669_v24  ;;  %v13180_v23 = vld [vmem:[#allocation9_spill] sm:$0xff]  ;;  %v13181_v24 = vld [vmem:[#allocation12_spill] sm:$0xff] }
 0x398   :  { %3418 = vmatprep.subr.bf16.mxu0 %v10676_v26  ;;  %3459 = vmatprep.subr.bf16.mxu1 %v10681_v27  ;;  %v13182_v26 = vld [vmem:[#allocation11_spill] sm:$0xff]  ;;  %v13183_v27 = vld [vmem:[#allocation13_spill] sm:$0xff] }
 0x39b   :  { %3419 = vmatpush1.bf16.msra.mxu0 %v10690_v28  ;;  %3460 = vmatpush1.bf16.msra.mxu1 %v10695_v30  ;;  %v13184_v28 = vld [vmem:[#allocation14_spill] sm:$0xff]  ;;  %v13185_v30 = vld [vmem:[#allocation15_spill] sm:$0xff] }
 0x39c   :  { %3420 = vmatprep.subr.bf16.mxu0 %v10702_v31  ;;  %3461 = vmatprep.subr.bf16.mxu1 %v10707_v32  ;;  %v13186_v31 = vld [vmem:[#allocation41_spill] sm:$0xff]  ;;  %v13187_v32 = vld [vmem:[#allocation42_spill] sm:$0xff] }
 0x39f   :  { %3421 = vmatpush1.bf16.msra.mxu0 %v10714_v1  ;;  %3462 = vmatpush1.bf16.msra.mxu1 %v10719_v10  ;;  %v13188_v1 = vld [vmem:[#allocation43_spill] sm:$0xff]  ;;  %v13189_v10 = vld [vmem:[#allocation44_spill] sm:$0xff] }
 0x3a0   :  { %3422 = vmatprep.subr.bf16.mxu0 %v10726_v35  ;;  %3463 = vmatprep.subr.bf16.mxu1 %v10731_v36  ;;  %v13190_v35 = vld [vmem:[#allocation45_spill] sm:$0xff]  ;;  %v13191_v36 = vld [vmem:[#allocation46_spill] sm:$0xff] }
 0x3a3   :  { %3423 = vmatpush1.bf16.msra.mxu0 %v10738_v37  ;;  %3464 = vmatpush1.bf16.msra.mxu1 %v10743_v8  ;;  %v13192_v37 = vld [vmem:[#allocation47_spill] sm:$0xff]  ;;  %v13193_v8 = vld [vmem:[#allocation48_spill] sm:$0xff] }
 0x3a4   :  { %3424 = vmatprep.subr.bf16.mxu0 %v10750_v13  ;;  %3465 = vmatprep.subr.bf16.mxu1 %v10755_v40  ;;  %v13194_v13 = vld [vmem:[#allocation49_spill] sm:$0xff]  ;;  %v13195_v40 = vld [vmem:[#allocation50_spill] sm:$0xff] }
 0x3a7   :  { %3425 = vmatpush1.bf16.msra.mxu0 %v10762_v41  ;;  %3466 = vmatpush1.bf16.msra.mxu1 %v10767_v44  ;;  %v13196_v41 = vld [vmem:[#allocation51_spill] sm:$0xff]  ;;  %v13197_v44 = vld [vmem:[#allocation52_spill] sm:$0xff] }
 0x3a8   :  { %3426 = vmatprep.subr.bf16.mxu0 %v10774_v2  ;;  %3467 = vmatprep.subr.bf16.mxu1 %v10779_v48  ;;  %v13198_v2 = vld [vmem:[#allocation53_spill] sm:$0xff]  ;;  %v13199_v48 = vld [vmem:[#allocation54_spill] sm:$0xff] }
 0x3ab   :  { %3427 = vmatpush1.bf16.msra.mxu0 %v10786_v12  ;;  %3468 = vmatpush1.bf16.msra.mxu1 %v10791_v15  ;;  %v13200_v12 = vld [vmem:[#allocation55_spill] sm:$0xff]  ;;  %v13201_v15 = vld [vmem:[#allocation56_spill] sm:$0xff] }
 0x3ac   :  { %3428 = vmatprep.subr.bf16.mxu0 %v10798_v34  ;;  %3469 = vmatprep.subr.bf16.mxu1 %v10803_v16  ;;  %v13202_v34 = vld [vmem:[#allocation57_spill] sm:$0xff]  ;;  %v13203_v16 = vld [vmem:[#allocation58_spill] sm:$0xff] }
 0x3af   :  { %3429 = vmatpush1.bf16.msra.mxu0 %v10810_v42  ;;  %3470 = vmatpush1.bf16.msra.mxu1 %v10815_v18  ;;  %v13204_v42 = vld [vmem:[#allocation59_spill] sm:$0xff]  ;;  %v13205_v18 = vld [vmem:[#allocation60_spill] sm:$0xff] }
 0x3b0   :  { %3689 = vmatprep.subr.bf16.mxu0 %v10828_v43  ;;  %3730 = vmatprep.subr.bf16.mxu1 %v10833_v5 }
 0x3b2   :  { %3447 = vmatmul.mubr.bf16.vlgmr.msra.gmra.mrb[52].mxu0 %v2901_v39  ;;  %3488 = vmatmul.mubr.bf16.vlgmr.msra.gmra.mrb[52].mxu1 %v2901_v39 }
 0x3b3   :  { %3690 = vmatpush1.bf16.msra.mxu0 %v13174_v6  ;;  %3731 = vmatpush1.bf16.msra.mxu1 %v13175_v63 }
 0x3b4   :  { %3691 = vmatprep.subr.bf16.mxu0 %v13176_v3  ;;  %3732 = vmatprep.subr.bf16.mxu1 %v13177_v21 }
 0x3b5   :  { %3721 = vmatprep.mubr.bf16.mxu0 %v13106_v14  ;;  %3762 = vmatprep.mubr.bf16.mxu1 %v13106_v14 }
 0x3b7   :  { %3692 = vmatpush1.bf16.msra.mxu0 %v13178_v20  ;;  %3733 = vmatpush1.bf16.msra.mxu1 %v13179_v7 }
 0x3b8   :  { %3693 = vmatprep.subr.bf16.mxu0 %v13180_v23  ;;  %3734 = vmatprep.subr.bf16.mxu1 %v13181_v24 }
 0x3bb   :  { %3694 = vmatpush1.bf16.msra.mxu0 %v13182_v26  ;;  %3735 = vmatpush1.bf16.msra.mxu1 %v13183_v27 }
 0x3bc   :  { %3695 = vmatprep.subr.bf16.mxu0 %v13184_v28  ;;  %3736 = vmatprep.subr.bf16.mxu1 %v13185_v30 }
 0x3bf   :  { %3696 = vmatpush1.bf16.msra.mxu0 %v13186_v31  ;;  %3737 = vmatpush1.bf16.msra.mxu1 %v13187_v32 }
 0x3c0   :  { %3697 = vmatprep.subr.bf16.mxu0 %v13188_v1  ;;  %3738 = vmatprep.subr.bf16.mxu1 %v13189_v10 }
 0x3c3   :  { %3698 = vmatpush1.bf16.msra.mxu0 %v13190_v35  ;;  %3739 = vmatpush1.bf16.msra.mxu1 %v13191_v36 }
 0x3c4   :  { %3699 = vmatprep.subr.bf16.mxu0 %v13192_v37  ;;  %3740 = vmatprep.subr.bf16.mxu1 %v13193_v8 }
 0x3c7   :  { %3700 = vmatpush1.bf16.msra.mxu0 %v13194_v13  ;;  %3741 = vmatpush1.bf16.msra.mxu1 %v13195_v40 }
 0x3c8   :  { %3701 = vmatprep.subr.bf16.mxu0 %v13196_v41  ;;  %3742 = vmatprep.subr.bf16.mxu1 %v13197_v44 }
 0x3cb   :  { %3702 = vmatpush1.bf16.msra.mxu0 %v13198_v2  ;;  %3743 = vmatpush1.bf16.msra.mxu1 %v13199_v48 }
 0x3cc   :  { %3703 = vmatprep.subr.bf16.mxu0 %v13200_v12  ;;  %3744 = vmatprep.subr.bf16.mxu1 %v13201_v15 }
 0x3cf   :  { %3704 = vmatpush1.bf16.msra.mxu0 %v13202_v34  ;;  %3745 = vmatpush1.bf16.msra.mxu1 %v13203_v16 }
 0x3d0   :  { %3996 = vmatprep.subr.bf16.mxu0 %v13204_v42  ;;  %4037 = vmatprep.subr.bf16.mxu1 %v13205_v18 }
 0x445   :  { %v2821_v43 = vpop.f32.mrb[44].mxu0  ;;  %v2862_v5 = vpop.f32.mrb[44].mxu1 }
 0x446   :  { %v2823_v59 = vpop.f32.mrb[45].mxu0  ;;  %v2864_v39 = vpop.f32.mrb[45].mxu1 }
 0x447   :  { %v2825_v53 = vpop.f32.mrb[46].mxu0  ;;  %v2866_v62 = vpop.f32.mrb[46].mxu1 }
 0x448   :  { %v2826_v6 = vpop.f32.mrb[47].mxu0  ;;  %v2867_v63 = vpop.f32.mrb[47].mxu1  ;;  %v13207_v53 = vld [vmem:[#allocation21_spill] sm:$0xff] }
 0x465   :  { %v3128_v3 = vpop.f32.mrb[48].mxu0  ;;  %v3169_v21 = vpop.f32.mrb[48].mxu1 }
 0x466   :  { %v3129_v20 = vadd.f32 %v3128_v3, %v2821_v43  ;;  %v3170_v7 = vadd.f32 %v3169_v21, %v2862_v5  ;;  %v3130_v23 = vpop.f32.mrb[49].mxu0  ;;  %v3171_v24 = vpop.f32.mrb[49].mxu1  ;;  %v13208_v21 = vld [vmem:[#allocation22_spill] sm:$0xff] }
 0x467   :  { %v3131_v26 = vadd.f32 %v3130_v23, %v2823_v59  ;;  %v3172_v27 = vadd.f32 %v3171_v24, %v2864_v39  ;;  %v3132_v28 = vpop.f32.mrb[50].mxu0  ;;  %v3173_v30 = vpop.f32.mrb[50].mxu1  ;;  %v13206_v59 = vld [vmem:[#allocation20_spill] sm:$0xff] }
 0x468   :  { %v3176_v31 = vadd.f32 %v3129_v20, %v10541_v25  ;;  %v3133_v32 = vpop.f32.mrb[51].mxu0  ;;  %v3174_v1 = vpop.f32.mrb[51].mxu1  ;;  %v3178_v13 = vadd.f32 %v3170_v7, %v10556_v17  ;;  %v13209_v7 = vld [vmem:[#allocation23_spill] sm:$0xff] }
 0x469   :  { %v3177_v10 = vadd.f32 %v3131_v26, %v10545_v29  ;;  %v3179_v37 = vadd.f32 %v3172_v27, %v10551_v47 }
 0x46a   :  { %v8142_v35 = vmul.f32 -1.442695, %v3176_v31 }
 0x46b   :  { %v8143_v36 = vmul.f32 -1.442695, %v3177_v10  ;;  %v8144_v8 = vmul.f32 -1.442695, %v3179_v37 }
 0x46c   :  { %9412 = vpow2.f32 %v8142_v35 }
 0x46d   :  { %9414 = vpow2.f32 %v8143_v36 }
 0x46e   :  { %9416 = vpow2.f32 %v8144_v8 }
 0x46f   :  { %9418 = vtanh.f32 %v3178_v13 }
 0x476   :  { %v9413_v40 = vpop.eup %9412 }
 0x477   :  { %v9415_v41 = vpop.eup %9414  ;;  %v3183_v44 = vadd.f32 1.0, %v9413_v40 }
 0x478   :  { %v3189_v2 = vadd.f32 1.0, %v9415_v41  ;;  %v9417_v48 = vpop.eup %9416 }
 0x479   :  { %9420 = vrcp.f32 %v3183_v44  ;;  %v9419_v12 = vpop.eup %9418  ;;  %v3196_v42 = vadd.f32 1.0, %v9417_v48  ;;  %v13211_v44 = vld [vmem:[#allocation17_spill] sm:$0xff] }
 0x47a   :  { %9422 = vrcp.f32 %v3189_v2 }
 0x47b   :  { %9424 = vrcp.f32 %v3196_v42 }
 0x483   :  { %v9421_v15 = vpop.eup %9420 }
 0x484   :  { %v9423_v34 = vpop.eup %9422  ;;  %v3200_v16 = vmul.f32 %v9421_v15, %v9419_v12  ;;  %v13215_v12 = vld [vmem:[#allocation62_spill] sm:$0xff] }
 0x485   :  { %v3199_v18 = vmul.f32 %v9423_v34, %v11036_v56  ;;  %v3448_v43 = vpop.f32.mrb[52].mxu0  ;;  %v3489_v5 = vpop.f32.mrb[52].mxu1  ;;  %v13219_v15 = vld [vmem:[#allocation66_spill] sm:$0xff]  ;;  %v13222_v34 = vld [vmem:[#allocation69_spill] sm:$0xff] }
 0x486   :  { %v3775_v39 = vadd.f32 %v3448_v43, %v13206_v59  ;;  %v3777_v62 = vadd.f32 %v3489_v5, %v13207_v53  ;;  %v3450_v6 = vpop.f32.mrb[53].mxu0  ;;  %v3491_v63 = vpop.f32.mrb[53].mxu1  ;;  %v11358_v43 = vld [vmem:[%s12903_s2 + $0x4] ss:$16 sps:$4 sm:$0xff]   ;;  %v11363_v5 = vld [vmem:[%s12903_s2 + $0xc] ss:$16 sps:$4 sm:$0xff]  }
 0x487   :  { %v11310_v3 = vadd.f32 %v3200_v16, %v3199_v18  ;;  %v3776_v20 = vadd.f32 %v3450_v6, %v13208_v21  ;;  %v3778_v23 = vadd.f32 %v3491_v63, %v13209_v7  ;;  %v3452_v24 = vpop.f32.mrb[54].mxu0  ;;  %v3493_v26 = vpop.f32.mrb[54].mxu1  ;;  %v11415_v53 = vld [vmem:[%s12903_s2 + $0x4c] ss:$16 sps:$4 sm:$0xff]   ;;  %v11429_v6 = vld [vmem:[%s12903_s2 + $0x48] ss:$16 sps:$4 sm:$0xff]  }
 0x488   :  { %v8210_v27 = vmul.f32 -1.442695, %v3775_v39  ;;  %v3453_v28 = vpop.f32.mrb[55].mxu0  ;;  %v3494_v56 = vpop.f32.mrb[55].mxu1  ;;  %v11410_v39 = vld [vmem:[%s12903_s2 + $0x44] ss:$16 sps:$4 sm:$0xff]  }
 0x489   :  { %9426 = vtanh.f32 %v11310_v3  ;;  %v8211_v30 = vmul.f32 -1.442695, %v3776_v20  ;;  %v8212_v31 = vmul.f32 -1.442695, %v3778_v23  ;;  %v9425_v32 = vpop.eup %9424  ;;  %v11436_v63 = vld [vmem:[%s12903_s2 + $0x64] ss:$16 sps:$4 sm:$0xff]  }
 0x48a   :  { %9428 = vpow2.f32 %v8210_v27  ;;  %v11441_v21 = vld [vmem:[%s12903_s2 + $0x6c] ss:$16 sps:$4 sm:$0xff]   ;;  %v11448_v20 = vld [vmem:[%s12903_s2 + $0x60] ss:$16 sps:$4 sm:$0xff]   ;;  %v11453_v7 = vld [vmem:[%s12903_s2 + $0x68] ss:$16 sps:$4 sm:$0xff]  }
 0x48b   :  { %9430 = vpow2.f32 %v8211_v30  ;;  %v11460_v23 = vld [vmem:[%s12903_s2 + $0x84] ss:$16 sps:$4 sm:$0xff]   ;;  %v11465_v24 = vld [vmem:[%s12903_s2 + $0x8c] ss:$16 sps:$4 sm:$0xff]   ;;  %v11472_v26 = vld [vmem:[%s12903_s2 + $0x80] ss:$16 sps:$4 sm:$0xff]  }
 0x48c   :  { %9432 = vpow2.f32 %v8212_v31  ;;  %v11477_v27 = vld [vmem:[%s12903_s2 + $0x88] ss:$16 sps:$4 sm:$0xff]   ;;  %v11484_v28 = vld [vmem:[%s12903_s2 + $0xa4] ss:$16 sps:$4 sm:$0xff]   ;;  %v11489_v56 = vld [vmem:[%s12903_s2 + $0xac] ss:$16 sps:$4 sm:$0xff]  }
 0x48d   :  { %9434 = vtanh.f32 %v3777_v62  ;;  %v11424_v62 = vld [vmem:[%s12903_s2 + $0x40] ss:$16 sps:$4 sm:$0xff]   ;;  %v11501_v31 = vld [vmem:[%s12903_s2 + $0xa8] ss:$16 sps:$4 sm:$0xff]  }
 0x48e   :  { %v11496_v30 = vld [vmem:[%s12903_s2 + $0xa0] ss:$16 sps:$4 sm:$0xff]  }
 0x493   :  { %v9427_v1 = vpop.eup %9426 }
 0x494   :  { %v9429_v10 = vpop.eup %9428  ;;  %v11315_v35 = vmul.f32 %v9427_v1, %v9425_v32  ;;  %v11508_v32 = vld [vmem:[%s12903_s2 + $0xc4] ss:$16 sps:$4 sm:$0xff]   ;;  %v11513_v1 = vld [vmem:[%s12903_s2 + $0xcc] ss:$16 sps:$4 sm:$0xff]  }
 0x495   :  { %v9431_v36 = vpop.eup %9430  ;;  %v3782_v37 = vadd.f32 1.0, %v9429_v10  ;;  %v11520_v10 = vld [vmem:[%s12903_s2 + $0xc0] ss:$16 sps:$4 sm:$0xff]  }
 0x496   :  { %13210 = vst [vmem:[#allocation4_spill] sm:$0xff] %v11315_v35  ;;  %v3788_v8 = vadd.f32 1.0, %v9431_v36  ;;  %v3496_v13 = vpack.c.bf16 %v11315_v35, %v11315_v35  ;;  %v3204_v40 = vmul.f32 %v10567_v38, %v11315_v35  ;;  %v11525_v36 = vld [vmem:[%s12903_s2 + $0xc8] ss:$16 sps:$4 sm:$0xff]  }
 0x497   :  { %9436 = vrcp.f32 %v3782_v37  ;;  %v11532_v37 = vld [vmem:[%s12903_s2 + $0xe4] ss:$16 sps:$4 sm:$0xff]   ;;  %v11697_v35 = vld [vmem:[%s12904_s5 + $0xa8] ss:$16 sps:$4 sm:$0xff]  }
 0x498   :  { %9438 = vrcp.f32 %v3788_v8  ;;  %3722 = vmatmul.mubr.bf16.vlgmr.msra.gmra.mrb[56].mxu0 %v3496_v13  ;;  %3763 = vmatmul.mubr.bf16.vlgmr.msra.gmra.mrb[56].mxu1 %v3496_v13  ;;  %v11537_v8 = vld [vmem:[%s12903_s2 + $0xec] ss:$16 sps:$4 sm:$0xff]   ;;  %v11544_v13 = vld [vmem:[%s12903_s2 + $0xe0] ss:$16 sps:$4 sm:$0xff]   ;;  %13244 = vst [vmem:[#allocation51_spill] sm:$0xff] %v11697_v35 }
 0x499   :  { %3997 = vmatpush1.bf16.msra.mxu0 %v11046_v57  ;;  %4038 = vmatpush1.bf16.msra.mxu1 %v11051_v52  ;;  %v9433_v57 = vpop.eup %9432 }
 0x49a   :  { %3205 = vadd.xlane.f32.xlu1 %v3204_v40  ;;  %3998 = vmatprep.subr.bf16.mxu0 %v11060_v54  ;;  %v9435_v41 = vpop.eup %9434  ;;  %v13212_v54 = vld [vmem:[#allocation18_spill] sm:$0xff]  ;;  %v3795_v48 = vadd.f32 1.0, %v9433_v57  ;;  %v11549_v40 = vld [vmem:[%s12903_s2 + $0xe8] ss:$16 sps:$4 sm:$0xff]  }
 0x49b   :  { %4039 = vmatprep.subr.bf16.mxu1 %v11065_v55  ;;  %4028 = vmatprep.mubr.bf16.mxu0 %v13106_v14  ;;  %v11562_v57 = vld [vmem:[%s12904_s5 + $0x4] ss:$16 sps:$4 sm:$0xff]  }
 0x49c   :  { %4069 = vmatprep.mubr.bf16.mxu1 %v13106_v14  ;;  %9440 = vrcp.f32 %v3795_v48  ;;  %v11601_v48 = vld [vmem:[%s12904_s5 + $0x28] ss:$16 sps:$4 sm:$0xff]  }
 0x49d   :  { %3999 = vmatpush1.bf16.msra.mxu0 %v11072_v9  ;;  %4040 = vmatpush1.bf16.msra.mxu1 %v11077_v51  ;;  %13228 = vst [vmem:[#allocation9_spill] sm:$0xff] %v11601_v48 }
 0x49e   :  { %4000 = vmatprep.subr.bf16.mxu0 %v11083_v50  ;;  %4041 = vmatprep.subr.bf16.mxu1 %v11088_v4  ;;  %v13213_v50 = vld [vmem:[#allocation19_spill] sm:$0xff]  ;;  %v13214_v4 = vld [vmem:[#allocation61_spill] sm:$0xff] }
 0x4a1   :  { %v9437_v52 = vpop.eup %9436  ;;  %4001 = vmatpush1.bf16.msra.mxu0 %v13211_v44  ;;  %4042 = vmatpush1.bf16.msra.mxu1 %v13212_v54  ;;  %v11577_v44 = vld [vmem:[%s12904_s5 + $0x8] ss:$16 sps:$4 sm:$0xff]   ;;  %v11586_v54 = vld [vmem:[%s12904_s5 + $0x24] ss:$16 sps:$4 sm:$0xff]  }
 0x4a2   :  { %v9439_v55 = vpop.eup %9438  ;;  %v3799_v2 = vmul.f32 %v9437_v52, %v9435_v41  ;;  %4002 = vmatprep.subr.bf16.mxu0 %v11110_v22  ;;  %4043 = vmatprep.subr.bf16.mxu1 %v11115_v49  ;;  %v13216_v22 = vld [vmem:[#allocation63_spill] sm:$0xff]  ;;  %v13217_v49 = vld [vmem:[#allocation64_spill] sm:$0xff]  ;;  %13224 = vst [vmem:[#allocation6_spill] sm:$0xff] %v11577_v44  ;;  %13225 = vst [vmem:[#allocation7_spill] sm:$0xff] %v11586_v54 }
 0x4a3   :  { %v3798_v9 = vmul.f32 %v9439_v55, %v11142_v0  ;;  %v13218_v0 = vld [vmem:[#allocation65_spill] sm:$0xff]  ;;  %v11572_v52 = vld [vmem:[%s12904_s5] ss:$16 sps:$4 sm:$0xff]  }
 0x4a4   :  { %v11567_v41 = vld [vmem:[%s12904_s5 + $0xc] ss:$16 sps:$4 sm:$0xff]   ;;  %13223 = vst [vmem:[#allocation5_spill] sm:$0xff] %v11572_v52 }
 0x4a5   :  { %v11336_v51 = vadd.f32 %v3799_v2, %v3798_v9  ;;  %4003 = vmatpush1.bf16.msra.mxu0 %v11122_v33  ;;  %4044 = vmatpush1.bf16.msra.mxu1 %v11127_v61  ;;  %v13220_v33 = vld [vmem:[#allocation67_spill] sm:$0xff]  ;;  %v13221_v61 = vld [vmem:[#allocation68_spill] sm:$0xff] }
 0x4a6   :  { %4004 = vmatprep.subr.bf16.mxu0 %v13213_v50  ;;  %4045 = vmatprep.subr.bf16.mxu1 %v13214_v4  ;;  %v9441_v16 = vpop.eup %9440  ;;  %v11591_v55 = vld [vmem:[%s12904_s5 + $0x2c] ss:$16 sps:$4 sm:$0xff]   ;;  %v11596_v2 = vld [vmem:[%s12904_s5 + $0x20] ss:$16 sps:$4 sm:$0xff]   ;;  %v11610_v9 = vld [vmem:[%s12904_s5 + $0x44] ss:$16 sps:$4 sm:$0xff]  }
 0x4a7   :  { %9442 = vtanh.f32 %v11336_v51  ;;  %13226 = vst [vmem:[#allocation8_spill] sm:$0xff] %v11591_v55  ;;  %13227 = vst [vmem:[#allocation10_spill] sm:$0xff] %v11596_v2  ;;  %v11615_v50 = vld [vmem:[%s12904_s5 + $0x4c] ss:$16 sps:$4 sm:$0xff]   ;;  %v11620_v4 = vld [vmem:[%s12904_s5 + $0x40] ss:$16 sps:$4 sm:$0xff]  }
 0x4a8   :  { %13229 = vst [vmem:[#allocation12_spill] sm:$0xff] %v11610_v9  ;;  %13230 = vst [vmem:[#allocation11_spill] sm:$0xff] %v11615_v50 }
 0x4a9   :  { %4005 = vmatpush1.bf16.msra.mxu0 %v13215_v12  ;;  %4046 = vmatpush1.bf16.msra.mxu1 %v13216_v22  ;;  %13231 = vst [vmem:[#allocation13_spill] sm:$0xff] %v11620_v4  ;;  %v11625_v12 = vld [vmem:[%s12904_s5 + $0x48] ss:$16 sps:$4 sm:$0xff]   ;;  %v11634_v22 = vld [vmem:[%s12904_s5 + $0x64] ss:$16 sps:$4 sm:$0xff]  }
 0x4aa   :  { %4006 = vmatprep.subr.bf16.mxu0 %v13217_v49  ;;  %4047 = vmatprep.subr.bf16.mxu1 %v13218_v0  ;;  %13232 = vst [vmem:[#allocation14_spill] sm:$0xff] %v11625_v12  ;;  %13233 = vst [vmem:[#allocation15_spill] sm:$0xff] %v11634_v22  ;;  %v11639_v49 = vld [vmem:[%s12904_s5 + $0x6c] ss:$16 sps:$4 sm:$0xff]   ;;  %v11644_v0 = vld [vmem:[%s12904_s5 + $0x60] ss:$16 sps:$4 sm:$0xff]  }
 0x4ab   :  { %13234 = vst [vmem:[#allocation41_spill] sm:$0xff] %v11639_v49  ;;  %13235 = vst [vmem:[#allocation42_spill] sm:$0xff] %v11644_v0 }
 0x4ad   :  { %4007 = vmatpush1.bf16.msra.mxu0 %v13219_v15  ;;  %4048 = vmatpush1.bf16.msra.mxu1 %v13220_v33  ;;  %v11649_v15 = vld [vmem:[%s12904_s5 + $0x68] ss:$16 sps:$4 sm:$0xff]   ;;  %v11658_v33 = vld [vmem:[%s12904_s5 + $0x84] ss:$16 sps:$4 sm:$0xff]  }
 0x4ae   :  { %4008 = vmatprep.subr.bf16.mxu0 %v13221_v61  ;;  %4049 = vmatprep.subr.bf16.mxu1 %v13222_v34  ;;  %13236 = vst [vmem:[#allocation43_spill] sm:$0xff] %v11649_v15  ;;  %13237 = vst [vmem:[#allocation44_spill] sm:$0xff] %v11658_v33  ;;  %v11663_v61 = vld [vmem:[%s12904_s5 + $0x8c] ss:$16 sps:$4 sm:$0xff]   ;;  %v11668_v34 = vld [vmem:[%s12904_s5 + $0x80] ss:$16 sps:$4 sm:$0xff]  }
 0x4af   :  { %13238 = vst [vmem:[#allocation45_spill] sm:$0xff] %v11663_v61  ;;  %13239 = vst [vmem:[#allocation46_spill] sm:$0xff] %v11668_v34 }
 0x4b1   :  { %v9443_v42 = vpop.eup %9442  ;;  %4009 = vmatpush1.bf16.msra.mxu0 %v11198_v46  ;;  %4050 = vmatpush1.bf16.msra.mxu1 %v11203_v45  ;;  %v11372_v46 = vld [vmem:[%s12903_s2] ss:$16 sps:$4 sm:$0xff]   ;;  %v11377_v45 = vld [vmem:[%s12903_s2 + $0x8] ss:$16 sps:$4 sm:$0xff]  }
 0x4b2   :  { %4010 = vmatprep.subr.bf16.mxu0 %v11210_v60  ;;  %4051 = vmatprep.subr.bf16.mxu1 %v11215_v19  ;;  %v3802_v18 = vmul.f32 %v9443_v42, %v9441_v16  ;;  %v11384_v60 = vld [vmem:[%s12903_s2 + $0x24] ss:$16 sps:$4 sm:$0xff]   ;;  %v11389_v19 = vld [vmem:[%s12903_s2 + $0x2c] ss:$16 sps:$4 sm:$0xff]   ;;  %v11673_v16 = vld [vmem:[%s12904_s5 + $0x88] ss:$16 sps:$4 sm:$0xff]  }
 0x4b3   :  { %13240 = vst [vmem:[#allocation47_spill] sm:$0xff] %v11673_v16  ;;  %v11682_v42 = vld [vmem:[%s12904_s5 + $0xa4] ss:$16 sps:$4 sm:$0xff]  }
 0x4b4   :  { %v11365_v59 = vpack.c.bf16 %v3802_v18, %v3802_v18  ;;  %13241 = vst [vmem:[#allocation48_spill] sm:$0xff] %v11682_v42  ;;  %v11687_v18 = vld [vmem:[%s12904_s5 + $0xac] ss:$16 sps:$4 sm:$0xff]  }
 0x4b5   :  { %4011 = vmatpush1.bf16.msra.mxu0 %v11222_v11  ;;  %4052 = vmatpush1.bf16.msra.mxu1 %v11227_v58  ;;  %v11398_v58 = vld [vmem:[%s12903_s2 + $0x20] ss:$16 sps:$4 sm:$0xff]   ;;  %v11403_v11 = vld [vmem:[%s12903_s2 + $0x28] ss:$16 sps:$4 sm:$0xff]   ;;  %13242 = vst [vmem:[#allocation49_spill] sm:$0xff] %v11687_v18 }
 0x4b6   :  { %4316 = vmatprep.subr.bf16.mxu0 %v11358_v43  ;;  %4357 = vmatprep.subr.bf16.mxu1 %v11363_v5 }
 0x4b8   :  { %4029 = vmatmul.mubr.bf16.vlgmr.msra.gmra.mrb[60].mxu0 %v11365_v59  ;;  %4070 = vmatmul.mubr.bf16.vlgmr.msra.gmra.mrb[60].mxu1 %v11365_v59 }
 0x4b9   :  { %4317 = vmatpush1.bf16.msra.mxu0 %v11372_v46  ;;  %4358 = vmatpush1.bf16.msra.mxu1 %v11377_v45 }
 0x4ba   :  { %4318 = vmatprep.subr.bf16.mxu0 %v11384_v60  ;;  %4359 = vmatprep.subr.bf16.mxu1 %v11389_v19 }
 0x4bb   :  { %4348 = vmatprep.mubr.bf16.mxu0 %v13106_v14  ;;  %4389 = vmatprep.mubr.bf16.mxu1 %v13106_v14 }
 0x4bd   :  { %4319 = vmatpush1.bf16.msra.mxu0 %v11398_v58  ;;  %4360 = vmatpush1.bf16.msra.mxu1 %v11403_v11 }
 0x4be   :  { %4320 = vmatprep.subr.bf16.mxu0 %v11410_v39  ;;  %4361 = vmatprep.subr.bf16.mxu1 %v11415_v53 }
 0x4c1   :  { %4321 = vmatpush1.bf16.msra.mxu0 %v11424_v62  ;;  %4362 = vmatpush1.bf16.msra.mxu1 %v11429_v6 }
 0x4c2   :  { %4322 = vmatprep.subr.bf16.mxu0 %v11436_v63  ;;  %4363 = vmatprep.subr.bf16.mxu1 %v11441_v21 }
 0x4c5   :  { %4323 = vmatpush1.bf16.msra.mxu0 %v11448_v20  ;;  %4364 = vmatpush1.bf16.msra.mxu1 %v11453_v7 }
 0x4c6   :  { %4324 = vmatprep.subr.bf16.mxu0 %v11460_v23  ;;  %4365 = vmatprep.subr.bf16.mxu1 %v11465_v24 }
 0x4c9   :  { %4325 = vmatpush1.bf16.msra.mxu0 %v11472_v26  ;;  %4366 = vmatpush1.bf16.msra.mxu1 %v11477_v27 }
 0x4ca   :  { %4326 = vmatprep.subr.bf16.mxu0 %v11484_v28  ;;  %4367 = vmatprep.subr.bf16.mxu1 %v11489_v56 }
 0x4cd   :  { %4327 = vmatpush1.bf16.msra.mxu0 %v11496_v30  ;;  %4368 = vmatpush1.bf16.msra.mxu1 %v11501_v31 }
 0x4ce   :  { %4328 = vmatprep.subr.bf16.mxu0 %v11508_v32  ;;  %4369 = vmatprep.subr.bf16.mxu1 %v11513_v1 }
 0x4d1   :  { %4329 = vmatpush1.bf16.msra.mxu0 %v11520_v10  ;;  %4370 = vmatpush1.bf16.msra.mxu1 %v11525_v36 }
 0x4d2   :  { %4330 = vmatprep.subr.bf16.mxu0 %v11532_v37  ;;  %4371 = vmatprep.subr.bf16.mxu1 %v11537_v8 }
 0x4d5   :  { %4331 = vmatpush1.bf16.msra.mxu0 %v11544_v13  ;;  %4372 = vmatpush1.bf16.msra.mxu1 %v11549_v40 }
 0x4d6   :  { %4591 = vmatprep.subr.bf16.mxu0 %v11562_v57  ;;  %4632 = vmatprep.subr.bf16.mxu1 %v11567_v41 }
 0x4d8   :  { %4349 = vmatmul.mubr.bf16.vlgmr.msra.gmra.mrb[64].mxu0 %v11365_v59  ;;  %4390 = vmatmul.mubr.bf16.vlgmr.msra.gmra.mrb[64].mxu1 %v11365_v59  ;;  %v11692_v59 = vld [vmem:[%s12904_s5 + $0xa0] ss:$16 sps:$4 sm:$0xff]  }
 0x4d9   :  { %4623 = vmatprep.mubr.bf16.mxu0 %v13106_v14  ;;  %4664 = vmatprep.mubr.bf16.mxu1 %v13106_v14  ;;  %13243 = vst [vmem:[#allocation50_spill] sm:$0xff] %v11692_v59 }
 0x4da   :  { %4592 = vmatpush1.bf16.msra.mxu0 %v11572_v52  ;;  %4633 = vmatpush1.bf16.msra.mxu1 %v11577_v44 }
 0x4db   :  { %4593 = vmatprep.subr.bf16.mxu0 %v11586_v54  ;;  %4634 = vmatprep.subr.bf16.mxu1 %v11591_v55 }
 0x4de   :  { %4594 = vmatpush1.bf16.msra.mxu0 %v11596_v2  ;;  %4635 = vmatpush1.bf16.msra.mxu1 %v11601_v48 }
 0x4df   :  { %4595 = vmatprep.subr.bf16.mxu0 %v11610_v9  ;;  %4636 = vmatprep.subr.bf16.mxu1 %v11615_v50 }
 0x4e2   :  { %4596 = vmatpush1.bf16.msra.mxu0 %v11620_v4  ;;  %4637 = vmatpush1.bf16.msra.mxu1 %v11625_v12 }
 0x4e3   :  { %4597 = vmatprep.subr.bf16.mxu0 %v11634_v22  ;;  %4638 = vmatprep.subr.bf16.mxu1 %v11639_v49 }
 0x4e6   :  { %4598 = vmatpush1.bf16.msra.mxu0 %v11644_v0  ;;  %4639 = vmatpush1.bf16.msra.mxu1 %v11649_v15 }
 0x4e7   :  { %4599 = vmatprep.subr.bf16.mxu0 %v11658_v33  ;;  %4640 = vmatprep.subr.bf16.mxu1 %v11663_v61 }
 0x4ea   :  { %4600 = vmatpush1.bf16.msra.mxu0 %v11668_v34  ;;  %4641 = vmatpush1.bf16.msra.mxu1 %v11673_v16  ;;  %v11706_v16 = vld [vmem:[%s12904_s5 + $0xc4] ss:$16 sps:$4 sm:$0xff]   ;;  %v11711_v34 = vld [vmem:[%s12904_s5 + $0xcc] ss:$16 sps:$4 sm:$0xff]  }
 0x4eb   :  { %4601 = vmatprep.subr.bf16.mxu0 %v11682_v42  ;;  %4642 = vmatprep.subr.bf16.mxu1 %v11687_v18  ;;  %13245 = vst [vmem:[#allocation52_spill] sm:$0xff] %v11706_v16  ;;  %13246 = vst [vmem:[#allocation53_spill] sm:$0xff] %v11711_v34  ;;  %v11716_v42 = vld [vmem:[%s12904_s5 + $0xc0] ss:$16 sps:$4 sm:$0xff]   ;;  %v11735_v18 = vld [vmem:[%s12904_s5 + $0xec] ss:$16 sps:$4 sm:$0xff]  }
 0x4ec   :  { %13247 = vst [vmem:[#allocation54_spill] sm:$0xff] %v11716_v42  ;;  %13250 = vst [vmem:[#allocation57_spill] sm:$0xff] %v11735_v18 }
 0x4ee   :  { %4602 = vmatpush1.bf16.msra.mxu0 %v11692_v59  ;;  %4643 = vmatpush1.bf16.msra.mxu1 %v11697_v35  ;;  %v11721_v59 = vld [vmem:[%s12904_s5 + $0xc8] ss:$16 sps:$4 sm:$0xff]   ;;  %v11730_v35 = vld [vmem:[%s12904_s5 + $0xe4] ss:$16 sps:$4 sm:$0xff]  }
 0x4ef   :  { %13248 = vst [vmem:[#allocation55_spill] sm:$0xff] %v11721_v59  ;;  %4603 = vmatprep.subr.bf16.mxu0 %v11706_v16  ;;  %4644 = vmatprep.subr.bf16.mxu1 %v11711_v34  ;;  %13249 = vst [vmem:[#allocation56_spill] sm:$0xff] %v11730_v35  ;;  %v11740_v16 = vld [vmem:[%s12904_s5 + $0xe0] ss:$16 sps:$4 sm:$0xff]   ;;  %v11759_v34 = vld [vmem:[%s12905_s4 + $0xc] ss:$16 sps:$4 sm:$0xff]  }
 0x4f0   :  { %13251 = vst [vmem:[#allocation58_spill] sm:$0xff] %v11740_v16  ;;  %13254 = vst [vmem:[#allocation20_spill] sm:$0xff] %v11759_v34 }
 0x4f2   :  { %4604 = vmatpush1.bf16.msra.mxu0 %v11716_v42  ;;  %4645 = vmatpush1.bf16.msra.mxu1 %v11721_v59  ;;  %v11745_v42 = vld [vmem:[%s12904_s5 + $0xe8] ss:$16 sps:$4 sm:$0xff]   ;;  %v11754_v59 = vld [vmem:[%s12905_s4 + $0x4] ss:$16 sps:$4 sm:$0xff]  }
 0x4f3   :  { %13252 = vst [vmem:[#allocation59_spill] sm:$0xff] %v11745_v42  ;;  %4605 = vmatprep.subr.bf16.mxu0 %v11730_v35  ;;  %4646 = vmatprep.subr.bf16.mxu1 %v11735_v18  ;;  %13253 = vst [vmem:[#allocation60_spill] sm:$0xff] %v11754_v59 }
 0x4f6   :  { %4606 = vmatpush1.bf16.msra.mxu0 %v11740_v16  ;;  %4647 = vmatpush1.bf16.msra.mxu1 %v11745_v42 }
 0x4f7   :  { %4898 = vmatprep.subr.bf16.mxu0 %v11754_v59  ;;  %4939 = vmatprep.subr.bf16.mxu1 %v11759_v34 }
 0x56b   :  { %v3723_v35 = vpop.f32.mrb[56].mxu0  ;;  %v3764_v18 = vpop.f32.mrb[56].mxu1 }
 0x56c   :  { %v3725_v61 = vpop.f32.mrb[57].mxu0  ;;  %v3766_v16 = vpop.f32.mrb[57].mxu1 }
 0x56d   :  { %v3727_v33 = vpop.f32.mrb[58].mxu0  ;;  %v3768_v42 = vpop.f32.mrb[58].mxu1 }
 0x56e   :  { %v3728_v15 = vpop.f32.mrb[59].mxu0  ;;  %v3769_v0 = vpop.f32.mrb[59].mxu1 }
 0x58b   :  { %v4030_v49 = vpop.f32.mrb[60].mxu0  ;;  %v4071_v22 = vpop.f32.mrb[60].mxu1 }
 0x58c   :  { %v4031_v12 = vadd.f32 %v4030_v49, %v3723_v35  ;;  %v4072_v4 = vadd.f32 %v4071_v22, %v3764_v18  ;;  %v4032_v50 = vpop.f32.mrb[61].mxu0  ;;  %v4073_v9 = vpop.f32.mrb[61].mxu1  ;;  %v13256_v18 = vld [vmem:[#allocation25_spill] sm:$0xff] }
 0x58d   :  { %v4033_v48 = vadd.f32 %v4032_v50, %v3725_v61  ;;  %v4074_v2 = vadd.f32 %v4073_v9, %v3766_v16  ;;  %v4034_v55 = vpop.f32.mrb[62].mxu0  ;;  %v4075_v59 = vpop.f32.mrb[62].mxu1  ;;  %v13255_v16 = vld [vmem:[#allocation24_spill] sm:$0xff] }
 0x58e   :  { %v4078_v34 = vadd.f32 %v4031_v12, %v10541_v25  ;;  %v4035_v54 = vpop.f32.mrb[63].mxu0  ;;  %v4076_v44 = vpop.f32.mrb[63].mxu1  ;;  %v4080_v22 = vadd.f32 %v4072_v4, %v10556_v17 }
 0x58f   :  { %v4079_v52 = vadd.f32 %v4033_v48, %v10545_v29  ;;  %v4081_v0 = vadd.f32 %v4074_v2, %v10551_v47 }
 0x590   :  { %v8245_v33 = vmul.f32 -1.442695, %v4078_v34 }
 0x591   :  { %v8246_v42 = vmul.f32 -1.442695, %v4079_v52  ;;  %v8247_v35 = vmul.f32 -1.442695, %v4081_v0 }
 0x592   :  { %9444 = vpow2.f32 %v8245_v33 }
 0x593   :  { %9446 = vpow2.f32 %v8246_v42 }
 0x594   :  { %9448 = vpow2.f32 %v8247_v35  ;;  %v13257_v35 = vld [vmem:[#allocation26_spill] sm:$0xff] }
 0x595   :  { %9450 = vtanh.f32 %v4080_v22 }
 0x59c   :  { %v9445_v49 = vpop.eup %9444 }
 0x59d   :  { %v9447_v50 = vpop.eup %9446  ;;  %v4085_v9 = vadd.f32 1.0, %v9445_v49  ;;  %v13258_v49 = vld [vmem:[#allocation27_spill] sm:$0xff] }
 0x59e   :  { %v4091_v55 = vadd.f32 1.0, %v9447_v50  ;;  %v9449_v44 = vpop.eup %9448 }
 0x59f   :  { %9452 = vrcp.f32 %v4085_v9  ;;  %v9451_v54 = vpop.eup %9450  ;;  %v4098_v15 = vadd.f32 1.0, %v9449_v44 }
 0x5a0   :  { %9454 = vrcp.f32 %v4091_v55 }
 0x5a1   :  { %9456 = vrcp.f32 %v4098_v15  ;;  %v11780_v15 = vld [vmem:[%s12905_s4] ss:$16 sps:$4 sm:$0xff]  }
 0x5a9   :  { %v9453_v48 = vpop.eup %9452 }
 0x5aa   :  { %v9455_v12 = vpop.eup %9454  ;;  %v4102_v52 = vmul.f32 %v9453_v48, %v9451_v54 }
 0x5ab   :  { %v4101_v61 = vmul.f32 %v9455_v12, %v11310_v3  ;;  %v4350_v2 = vpop.f32.mrb[64].mxu0  ;;  %v4391_v34 = vpop.f32.mrb[64].mxu1 }
 0x5ac   :  { %v4677_v4 = vadd.f32 %v4350_v2, %v13255_v16  ;;  %v4679_v59 = vadd.f32 %v4391_v34, %v13256_v18  ;;  %v4352_v33 = vpop.f32.mrb[65].mxu0  ;;  %v4393_v42 = vpop.f32.mrb[65].mxu1 }
 0x5ad   :  { %v11770_v0 = vadd.f32 %v4102_v52, %v4101_v61  ;;  %v4678_v22 = vadd.f32 %v4352_v33, %v13257_v35  ;;  %v4680_v50 = vadd.f32 %v4393_v42, %v13258_v49  ;;  %v4354_v9 = vpop.f32.mrb[66].mxu0  ;;  %v4395_v55 = vpop.f32.mrb[66].mxu1  ;;  %v11799_v49 = vld [vmem:[%s12905_s4 + $0x2c] ss:$16 sps:$4 sm:$0xff]  }
 0x5ae   :  { %v8313_v44 = vmul.f32 -1.442695, %v4677_v4  ;;  %v4355_v54 = vpop.f32.mrb[67].mxu0  ;;  %v4396_v3 = vpop.f32.mrb[67].mxu1  ;;  %v11785_v4 = vld [vmem:[%s12905_s4 + $0x8] ss:$16 sps:$4 sm:$0xff]  }
 0x5af   :  { %9458 = vtanh.f32 %v11770_v0  ;;  %v8314_v48 = vmul.f32 -1.442695, %v4678_v22  ;;  %v8315_v12 = vmul.f32 -1.442695, %v4680_v50  ;;  %v9457_v2 = vpop.eup %9456  ;;  %v11794_v22 = vld [vmem:[%s12905_s4 + $0x24] ss:$16 sps:$4 sm:$0xff]  }
 0x5b0   :  { %9460 = vpow2.f32 %v8313_v44  ;;  %v11811_v50 = vld [vmem:[%s12905_s4 + $0x28] ss:$16 sps:$4 sm:$0xff]   ;;  %v11817_v9 = vld [vmem:[%s12905_s4 + $0x44] ss:$16 sps:$4 sm:$0xff]   ;;  %v11822_v55 = vld [vmem:[%s12905_s4 + $0x4c] ss:$16 sps:$4 sm:$0xff]  }
 0x5b1   :  { %9462 = vpow2.f32 %v8314_v48  ;;  %v11832_v44 = vld [vmem:[%s12905_s4 + $0x40] ss:$16 sps:$4 sm:$0xff]   ;;  %v11837_v54 = vld [vmem:[%s12905_s4 + $0x48] ss:$16 sps:$4 sm:$0xff]   ;;  %v11844_v3 = vld [vmem:[%s12905_s4 + $0x64] ss:$16 sps:$4 sm:$0xff]  }
 0x5b2   :  { %9464 = vpow2.f32 %v8315_v12  ;;  %13260 = vst [vmem:[#allocation22_spill] sm:$0xff] %v11832_v44  ;;  %13261 = vst [vmem:[#allocation23_spill] sm:$0xff] %v11837_v54  ;;  %v11849_v48 = vld [vmem:[%s12905_s4 + $0x6c] ss:$16 sps:$4 sm:$0xff]  }
 0x5b3   :  { %9466 = vtanh.f32 %v4679_v59  ;;  %v11806_v59 = vld [vmem:[%s12905_s4 + $0x20] ss:$16 sps:$4 sm:$0xff]  }
 0x5b9   :  { %v9459_v34 = vpop.eup %9458 }
 0x5ba   :  { %v9461_v52 = vpop.eup %9460  ;;  %v11775_v61 = vmul.f32 %v9459_v34, %v9457_v2 }
 0x5bb   :  { %v9463_v16 = vpop.eup %9462  ;;  %v4684_v18 = vadd.f32 1.0, %v9461_v52  ;;  %v11856_v52 = vld [vmem:[%s12905_s4 + $0x60] ss:$16 sps:$4 sm:$0xff]  }
 0x5bc   :  { %13259 = vst [vmem:[#allocation21_spill] sm:$0xff] %v11775_v61  ;;  %v4690_v33 = vadd.f32 1.0, %v9463_v16  ;;  %v4398_v42 = vpack.c.bf16 %v11775_v61, %v11775_v61  ;;  %v4106_v35 = vmul.f32 %v10567_v38, %v11775_v61  ;;  %v9465_v12 = vpop.eup %9464  ;;  %v11861_v16 = vld [vmem:[%s12905_s4 + $0x68] ss:$16 sps:$4 sm:$0xff]   ;;  %v11873_v61 = vld [vmem:[%s12905_s4 + $0x8c] ss:$16 sps:$4 sm:$0xff]  }
 0x5bd   :  { %9468 = vrcp.f32 %v4684_v18  ;;  %v9467_v2 = vpop.eup %9466  ;;  %13263 = vst [vmem:[#allocation18_spill] sm:$0xff] %v11873_v61 }
 0x5be   :  { %9470 = vrcp.f32 %v4690_v33  ;;  %4624 = vmatmul.mubr.bf16.vlgmr.msra.gmra.mrb[68].mxu0 %v4398_v42  ;;  %4665 = vmatmul.mubr.bf16.vlgmr.msra.gmra.mrb[68].mxu1 %v4398_v42  ;;  %v4697_v42 = vadd.f32 1.0, %v9465_v12  ;;  %v11883_v12 = vld [vmem:[%s12905_s4 + $0x80] ss:$16 sps:$4 sm:$0xff]  }
 0x5bf   :  { %4899 = vmatpush1.bf16.msra.mxu0 %v11780_v15  ;;  %4940 = vmatpush1.bf16.msra.mxu1 %v11785_v4  ;;  %13264 = vst [vmem:[#allocation19_spill] sm:$0xff] %v11883_v12 }
 0x5c0   :  { %4107 = vadd.xlane.f32.xlu1 %v4106_v35  ;;  %4900 = vmatprep.subr.bf16.mxu0 %v11794_v22  ;;  %v11868_v35 = vld [vmem:[%s12905_s4 + $0x84] ss:$16 sps:$4 sm:$0xff]   ;;  %9472 = vrcp.f32 %v4697_v42  ;;  %v11925_v42 = vld [vmem:[%s12905_s4 + $0xcc] ss:$16 sps:$4 sm:$0xff]  }
 0x5c1   :  { %4941 = vmatprep.subr.bf16.mxu1 %v11799_v49  ;;  %4930 = vmatprep.mubr.bf16.mxu0 %v13106_v14  ;;  %13262 = vst [vmem:[#allocation17_spill] sm:$0xff] %v11868_v35  ;;  %13271 = vst [vmem:[#allocation67_spill] sm:$0xff] %v11925_v42 }
 0x5c2   :  { %4971 = vmatprep.mubr.bf16.mxu1 %v13106_v14 }
 0x5c3   :  { %4901 = vmatpush1.bf16.msra.mxu0 %v11806_v59  ;;  %4942 = vmatpush1.bf16.msra.mxu1 %v11811_v50 }
 0x5c4   :  { %4902 = vmatprep.subr.bf16.mxu0 %v11817_v9  ;;  %4943 = vmatprep.subr.bf16.mxu1 %v11822_v55 }
 0x5c7   :  { %v9469_v34 = vpop.eup %9468  ;;  %4903 = vmatpush1.bf16.msra.mxu0 %v11832_v44  ;;  %4944 = vmatpush1.bf16.msra.mxu1 %v11837_v54 }
 0x5c8   :  { %v9471_v18 = vpop.eup %9470  ;;  %v4701_v33 = vmul.f32 %v9469_v34, %v9467_v2  ;;  %4904 = vmatprep.subr.bf16.mxu0 %v11844_v3  ;;  %4945 = vmatprep.subr.bf16.mxu1 %v11849_v48  ;;  %v11888_v2 = vld [vmem:[%s12905_s4 + $0x88] ss:$16 sps:$4 sm:$0xff]   ;;  %v11908_v34 = vld [vmem:[%s12905_s4 + $0xa0] ss:$16 sps:$4 sm:$0xff]  }
 0x5c9   :  { %v4700_v54 = vmul.f32 %v9471_v18, %v11336_v51  ;;  %13265 = vst [vmem:[#allocation61_spill] sm:$0xff] %v11888_v2  ;;  %v11895_v51 = vld [vmem:[%s12905_s4 + $0xa4] ss:$16 sps:$4 sm:$0xff]   ;;  %13268 = vst [vmem:[#allocation64_spill] sm:$0xff] %v11908_v34  ;;  %v11913_v18 = vld [vmem:[%s12905_s4 + $0xa8] ss:$16 sps:$4 sm:$0xff]  }
 0x5ca   :  { %13266 = vst [vmem:[#allocation62_spill] sm:$0xff] %v11895_v51  ;;  %13269 = vst [vmem:[#allocation65_spill] sm:$0xff] %v11913_v18 }
 0x5cb   :  { %v11876_v44 = vadd.f32 %v4701_v33, %v4700_v54  ;;  %4905 = vmatpush1.bf16.msra.mxu0 %v11856_v52  ;;  %4946 = vmatpush1.bf16.msra.mxu1 %v11861_v16  ;;  %v11900_v54 = vld [vmem:[%s12905_s4 + $0xac] ss:$16 sps:$4 sm:$0xff]   ;;  %v11920_v33 = vld [vmem:[%s12905_s4 + $0xc4] ss:$16 sps:$4 sm:$0xff]  }
 0x5cc   :  { %4906 = vmatprep.subr.bf16.mxu0 %v11868_v35  ;;  %4947 = vmatprep.subr.bf16.mxu1 %v11873_v61  ;;  %13267 = vst [vmem:[#allocation63_spill] sm:$0xff] %v11900_v54  ;;  %13270 = vst [vmem:[#allocation66_spill] sm:$0xff] %v11920_v33 }
 0x5cd   :  { %9474 = vtanh.f32 %v11876_v44 }
 0x5cf   :  { %4907 = vmatpush1.bf16.msra.mxu0 %v11883_v12  ;;  %4948 = vmatpush1.bf16.msra.mxu1 %v11888_v2  ;;  %v9473_v2 = vpop.eup %9472 }
 0x5d0   :  { %4908 = vmatprep.subr.bf16.mxu0 %v11895_v51  ;;  %4949 = vmatprep.subr.bf16.mxu1 %v11900_v54  ;;  %v11932_v51 = vld [vmem:[%s12905_s4 + $0xc0] ss:$16 sps:$4 sm:$0xff]   ;;  %v11937_v54 = vld [vmem:[%s12905_s4 + $0xc8] ss:$16 sps:$4 sm:$0xff]  }
 0x5d3   :  { %4909 = vmatpush1.bf16.msra.mxu0 %v11908_v34  ;;  %4950 = vmatpush1.bf16.msra.mxu1 %v11913_v18  ;;  %v11944_v34 = vld [vmem:[%s12905_s4 + $0xe4] ss:$16 sps:$4 sm:$0xff]   ;;  %v11949_v18 = vld [vmem:[%s12905_s4 + $0xec] ss:$16 sps:$4 sm:$0xff]  }
 0x5d4   :  { %4910 = vmatprep.subr.bf16.mxu0 %v11920_v33  ;;  %4951 = vmatprep.subr.bf16.mxu1 %v11925_v42  ;;  %v11956_v42 = vld [vmem:[%s12905_s4 + $0xe0] ss:$16 sps:$4 sm:$0xff]   ;;  %v11961_v33 = vld [vmem:[%s12905_s4 + $0xe8] ss:$16 sps:$4 sm:$0xff]  }
 0x5d7   :  { %v9475_v12 = vpop.eup %9474  ;;  %4911 = vmatpush1.bf16.msra.mxu0 %v11932_v51  ;;  %4952 = vmatpush1.bf16.msra.mxu1 %v11937_v54 }
 0x5d8   :  { %4912 = vmatprep.subr.bf16.mxu0 %v11944_v34  ;;  %4953 = vmatprep.subr.bf16.mxu1 %v11949_v18  ;;  %v4704_v61 = vmul.f32 %v9475_v12, %v9473_v2 }
 0x5da   :  { %v4705_v35 = vpack.c.bf16 %v4704_v61, %v4704_v61 }
 0x5db   :  { %4913 = vmatpush1.bf16.msra.mxu0 %v11956_v42  ;;  %4954 = vmatpush1.bf16.msra.mxu1 %v11961_v33 }
 0x5dc   :  { %5218 = vmatprep.subr.bf16.mxu0 %v11358_v43  ;;  %5259 = vmatprep.subr.bf16.mxu1 %v11363_v5  ;;  %v13272_v43 = vld [vmem:[#allocation5_spill] sm:$0xff]  ;;  %v13273_v5 = vld [vmem:[#allocation6_spill] sm:$0xff] }
 0x5de   :  { %4931 = vmatmul.mubr.bf16.vlgmr.msra.gmra.mrb[72].mxu0 %v4705_v35  ;;  %4972 = vmatmul.mubr.bf16.vlgmr.msra.gmra.mrb[72].mxu1 %v4705_v35 }
 0x5df   :  { %5219 = vmatpush1.bf16.msra.mxu0 %v11372_v46  ;;  %5260 = vmatpush1.bf16.msra.mxu1 %v11377_v45  ;;  %v13274_v46 = vld [vmem:[#allocation7_spill] sm:$0xff]  ;;  %v13275_v45 = vld [vmem:[#allocation8_spill] sm:$0xff] }
 0x5e0   :  { %5220 = vmatprep.subr.bf16.mxu0 %v11384_v60  ;;  %5261 = vmatprep.subr.bf16.mxu1 %v11389_v19  ;;  %v13276_v60 = vld [vmem:[#allocation10_spill] sm:$0xff]  ;;  %v13277_v19 = vld [vmem:[#allocation9_spill] sm:$0xff] }
 0x5e1   :  { %5250 = vmatprep.mubr.bf16.mxu0 %v13106_v14  ;;  %5291 = vmatprep.mubr.bf16.mxu1 %v13106_v14 }
 0x5e3   :  { %5221 = vmatpush1.bf16.msra.mxu0 %v11398_v58  ;;  %5262 = vmatpush1.bf16.msra.mxu1 %v11403_v11  ;;  %v13278_v58 = vld [vmem:[#allocation12_spill] sm:$0xff]  ;;  %v13279_v11 = vld [vmem:[#allocation11_spill] sm:$0xff] }
 0x5e4   :  { %5222 = vmatprep.subr.bf16.mxu0 %v11410_v39  ;;  %5263 = vmatprep.subr.bf16.mxu1 %v11415_v53  ;;  %v13280_v39 = vld [vmem:[#allocation13_spill] sm:$0xff]  ;;  %v13281_v53 = vld [vmem:[#allocation14_spill] sm:$0xff] }
 0x5e7   :  { %5223 = vmatpush1.bf16.msra.mxu0 %v11424_v62  ;;  %5264 = vmatpush1.bf16.msra.mxu1 %v11429_v6  ;;  %v13282_v62 = vld [vmem:[#allocation15_spill] sm:$0xff]  ;;  %v13283_v6 = vld [vmem:[#allocation41_spill] sm:$0xff] }
 0x5e8   :  { %5224 = vmatprep.subr.bf16.mxu0 %v11436_v63  ;;  %5265 = vmatprep.subr.bf16.mxu1 %v11441_v21  ;;  %v13284_v63 = vld [vmem:[#allocation42_spill] sm:$0xff]  ;;  %v13285_v21 = vld [vmem:[#allocation43_spill] sm:$0xff] }
 0x5eb   :  { %5225 = vmatpush1.bf16.msra.mxu0 %v11448_v20  ;;  %5266 = vmatpush1.bf16.msra.mxu1 %v11453_v7  ;;  %v13286_v20 = vld [vmem:[#allocation44_spill] sm:$0xff]  ;;  %v13287_v7 = vld [vmem:[#allocation45_spill] sm:$0xff] }
 0x5ec   :  { %5226 = vmatprep.subr.bf16.mxu0 %v11460_v23  ;;  %5267 = vmatprep.subr.bf16.mxu1 %v11465_v24  ;;  %v13288_v23 = vld [vmem:[#allocation46_spill] sm:$0xff]  ;;  %v13289_v24 = vld [vmem:[#allocation47_spill] sm:$0xff] }
 0x5ef   :  { %5227 = vmatpush1.bf16.msra.mxu0 %v11472_v26  ;;  %5268 = vmatpush1.bf16.msra.mxu1 %v11477_v27  ;;  %v13290_v26 = vld [vmem:[#allocation48_spill] sm:$0xff]  ;;  %v13291_v27 = vld [vmem:[#allocation49_spill] sm:$0xff] }
 0x5f0   :  { %5228 = vmatprep.subr.bf16.mxu0 %v11484_v28  ;;  %5269 = vmatprep.subr.bf16.mxu1 %v11489_v56  ;;  %v13292_v28 = vld [vmem:[#allocation50_spill] sm:$0xff]  ;;  %v13293_v56 = vld [vmem:[#allocation51_spill] sm:$0xff] }
 0x5f3   :  { %5229 = vmatpush1.bf16.msra.mxu0 %v11496_v30  ;;  %5270 = vmatpush1.bf16.msra.mxu1 %v11501_v31  ;;  %v13294_v30 = vld [vmem:[#allocation52_spill] sm:$0xff]  ;;  %v13295_v31 = vld [vmem:[#allocation53_spill] sm:$0xff] }
 0x5f4   :  { %5230 = vmatprep.subr.bf16.mxu0 %v11508_v32  ;;  %5271 = vmatprep.subr.bf16.mxu1 %v11513_v1  ;;  %v13296_v32 = vld [vmem:[#allocation54_spill] sm:$0xff]  ;;  %v13297_v1 = vld [vmem:[#allocation55_spill] sm:$0xff] }
 0x5f7   :  { %5231 = vmatpush1.bf16.msra.mxu0 %v11520_v10  ;;  %5272 = vmatpush1.bf16.msra.mxu1 %v11525_v36  ;;  %v13298_v10 = vld [vmem:[#allocation56_spill] sm:$0xff]  ;;  %v13299_v36 = vld [vmem:[#allocation57_spill] sm:$0xff] }
 0x5f8   :  { %5232 = vmatprep.subr.bf16.mxu0 %v11532_v37  ;;  %5273 = vmatprep.subr.bf16.mxu1 %v11537_v8  ;;  %v13300_v37 = vld [vmem:[#allocation58_spill] sm:$0xff]  ;;  %v13301_v8 = vld [vmem:[#allocation59_spill] sm:$0xff] }
 0x5fb   :  { %5233 = vmatpush1.bf16.msra.mxu0 %v11544_v13  ;;  %5274 = vmatpush1.bf16.msra.mxu1 %v11549_v40  ;;  %v13302_v13 = vld [vmem:[#allocation60_spill] sm:$0xff] }
 0x5fc   :  { %5493 = vmatprep.subr.bf16.mxu0 %v11562_v57  ;;  %5534 = vmatprep.subr.bf16.mxu1 %v11567_v41  ;;  %v13303_v40 = vld [vmem:[#allocation20_spill] sm:$0xff] }
 0x5fe   :  { %5251 = vmatmul.mubr.bf16.vlgmr.msra.gmra.mrb[76].mxu0 %v4705_v35  ;;  %5292 = vmatmul.mubr.bf16.vlgmr.msra.gmra.mrb[76].mxu1 %v4705_v35 }
 0x5ff   :  { %5494 = vmatpush1.bf16.msra.mxu0 %v13272_v43  ;;  %5535 = vmatpush1.bf16.msra.mxu1 %v13273_v5 }
 0x600   :  { %5495 = vmatprep.subr.bf16.mxu0 %v13274_v46  ;;  %5536 = vmatprep.subr.bf16.mxu1 %v13275_v45 }
 0x601   :  { %5525 = vmatprep.mubr.bf16.mxu0 %v13106_v14  ;;  %5566 = vmatprep.mubr.bf16.mxu1 %v13106_v14 }
 0x603   :  { %5496 = vmatpush1.bf16.msra.mxu0 %v13276_v60  ;;  %5537 = vmatpush1.bf16.msra.mxu1 %v13277_v19 }
 0x604   :  { %5497 = vmatprep.subr.bf16.mxu0 %v13278_v58  ;;  %5538 = vmatprep.subr.bf16.mxu1 %v13279_v11 }
 0x607   :  { %5498 = vmatpush1.bf16.msra.mxu0 %v13280_v39  ;;  %5539 = vmatpush1.bf16.msra.mxu1 %v13281_v53 }
 0x608   :  { %5499 = vmatprep.subr.bf16.mxu0 %v13282_v62  ;;  %5540 = vmatprep.subr.bf16.mxu1 %v13283_v6 }
 0x60b   :  { %5500 = vmatpush1.bf16.msra.mxu0 %v13284_v63  ;;  %5541 = vmatpush1.bf16.msra.mxu1 %v13285_v21 }
 0x60c   :  { %5501 = vmatprep.subr.bf16.mxu0 %v13286_v20  ;;  %5542 = vmatprep.subr.bf16.mxu1 %v13287_v7 }
 0x60f   :  { %5502 = vmatpush1.bf16.msra.mxu0 %v13288_v23  ;;  %5543 = vmatpush1.bf16.msra.mxu1 %v13289_v24 }
 0x610   :  { %5503 = vmatprep.subr.bf16.mxu0 %v13290_v26  ;;  %5544 = vmatprep.subr.bf16.mxu1 %v13291_v27 }
 0x613   :  { %5504 = vmatpush1.bf16.msra.mxu0 %v13292_v28  ;;  %5545 = vmatpush1.bf16.msra.mxu1 %v13293_v56 }
 0x614   :  { %5505 = vmatprep.subr.bf16.mxu0 %v13294_v30  ;;  %5546 = vmatprep.subr.bf16.mxu1 %v13295_v31 }
 0x617   :  { %5506 = vmatpush1.bf16.msra.mxu0 %v13296_v32  ;;  %5547 = vmatpush1.bf16.msra.mxu1 %v13297_v1 }
 0x618   :  { %5507 = vmatprep.subr.bf16.mxu0 %v13298_v10  ;;  %5548 = vmatprep.subr.bf16.mxu1 %v13299_v36 }
 0x61b   :  { %5508 = vmatpush1.bf16.msra.mxu0 %v13300_v37  ;;  %5549 = vmatpush1.bf16.msra.mxu1 %v13301_v8 }
 0x61c   :  { %5800 = vmatprep.subr.bf16.mxu0 %v13302_v13  ;;  %5841 = vmatprep.subr.bf16.mxu1 %v13303_v40 }
 0x691   :  { %v4625_v57 = vpop.f32.mrb[68].mxu0  ;;  %v4666_v41 = vpop.f32.mrb[68].mxu1 }
 0x692   :  { %v4627_v61 = vpop.f32.mrb[69].mxu0  ;;  %v4668_v35 = vpop.f32.mrb[69].mxu1 }
 0x693   :  { %v4629_v12 = vpop.f32.mrb[70].mxu0  ;;  %v4670_v2 = vpop.f32.mrb[70].mxu1 }
 0x694   :  { %v4630_v43 = vpop.f32.mrb[71].mxu0  ;;  %v4671_v5 = vpop.f32.mrb[71].mxu1  ;;  %v13305_v12 = vld [vmem:[#allocation29_spill] sm:$0xff] }
 0x6b1   :  { %v4932_v46 = vpop.f32.mrb[72].mxu0  ;;  %v4973_v45 = vpop.f32.mrb[72].mxu1 }
 0x6b2   :  { %v4933_v60 = vadd.f32 %v4932_v46, %v4625_v57  ;;  %v4974_v19 = vadd.f32 %v4973_v45, %v4666_v41  ;;  %v4934_v58 = vpop.f32.mrb[73].mxu0  ;;  %v4975_v11 = vpop.f32.mrb[73].mxu1  ;;  %v13306_v45 = vld [vmem:[#allocation30_spill] sm:$0xff] }
 0x6b3   :  { %v4935_v39 = vadd.f32 %v4934_v58, %v4627_v61  ;;  %v4976_v53 = vadd.f32 %v4975_v11, %v4668_v35  ;;  %v4936_v62 = vpop.f32.mrb[74].mxu0  ;;  %v4977_v6 = vpop.f32.mrb[74].mxu1  ;;  %v13304_v61 = vld [vmem:[#allocation28_spill] sm:$0xff] }
 0x6b4   :  { %v4980_v63 = vadd.f32 %v4933_v60, %v10541_v25  ;;  %v4937_v21 = vpop.f32.mrb[75].mxu0  ;;  %v4978_v20 = vpop.f32.mrb[75].mxu1  ;;  %v4982_v28 = vadd.f32 %v4974_v19, %v10556_v17  ;;  %v13307_v19 = vld [vmem:[#allocation31_spill] sm:$0xff] }
 0x6b5   :  { %v4981_v7 = vadd.f32 %v4935_v39, %v10545_v29  ;;  %v4983_v26 = vadd.f32 %v4976_v53, %v10551_v47 }
 0x6b6   :  { %v8348_v23 = vmul.f32 -1.442695, %v4980_v63 }
 0x6b7   :  { %v8349_v24 = vmul.f32 -1.442695, %v4981_v7  ;;  %v8350_v27 = vmul.f32 -1.442695, %v4983_v26 }
 0x6b8   :  { %9476 = vpow2.f32 %v8348_v23 }
 0x6b9   :  { %9478 = vpow2.f32 %v8349_v24 }
 0x6ba   :  { %9480 = vpow2.f32 %v8350_v27 }
 0x6bb   :  { %9482 = vtanh.f32 %v4982_v28 }
 0x6c2   :  { %v9477_v56 = vpop.eup %9476 }
 0x6c3   :  { %v9479_v30 = vpop.eup %9478  ;;  %v4987_v31 = vadd.f32 1.0, %v9477_v56 }
 0x6c4   :  { %v4993_v32 = vadd.f32 1.0, %v9479_v30  ;;  %v9481_v1 = vpop.eup %9480 }
 0x6c5   :  { %9484 = vrcp.f32 %v4987_v31  ;;  %v9483_v10 = vpop.eup %9482  ;;  %v5000_v13 = vadd.f32 1.0, %v9481_v1  ;;  %v13309_v31 = vld [vmem:[#allocation22_spill] sm:$0xff] }
 0x6c6   :  { %9486 = vrcp.f32 %v4993_v32 }
 0x6c7   :  { %9488 = vrcp.f32 %v5000_v13 }
 0x6cf   :  { %v9485_v36 = vpop.eup %9484 }
 0x6d0   :  { %v9487_v37 = vpop.eup %9486  ;;  %v5004_v8 = vmul.f32 %v9485_v36, %v9483_v10  ;;  %v13313_v10 = vld [vmem:[#allocation19_spill] sm:$0xff]  ;;  %v13317_v36 = vld [vmem:[#allocation64_spill] sm:$0xff] }
 0x6d1   :  { %v5003_v40 = vmul.f32 %v9487_v37, %v11770_v0  ;;  %v5252_v57 = vpop.f32.mrb[76].mxu0  ;;  %v5293_v41 = vpop.f32.mrb[76].mxu1  ;;  %v13320_v37 = vld [vmem:[#allocation67_spill] sm:$0xff] }
 0x6d2   :  { %v5579_v35 = vadd.f32 %v5252_v57, %v13304_v61  ;;  %v5581_v2 = vadd.f32 %v5293_v41, %v13305_v12  ;;  %v5254_v43 = vpop.f32.mrb[77].mxu0  ;;  %v5295_v5 = vpop.f32.mrb[77].mxu1  ;;  %v12092_v57 = vld [vmem:[%s12903_s2 + $0x4] ss:$16 sps:$4 sm:$0xff]   ;;  %v12097_v41 = vld [vmem:[%s12903_s2 + $0xc] ss:$16 sps:$4 sm:$0xff]  }
 0x6d3   :  { %v12044_v46 = vadd.f32 %v5004_v8, %v5003_v40  ;;  %v5580_v60 = vadd.f32 %v5254_v43, %v13306_v45  ;;  %v5582_v58 = vadd.f32 %v5295_v5, %v13307_v19  ;;  %v5256_v11 = vpop.f32.mrb[78].mxu0  ;;  %v5297_v39 = vpop.f32.mrb[78].mxu1  ;;  %v12149_v12 = vld [vmem:[%s12903_s2 + $0x4c] ss:$16 sps:$4 sm:$0xff]   ;;  %v12163_v43 = vld [vmem:[%s12903_s2 + $0x48] ss:$16 sps:$4 sm:$0xff]  }
 0x6d4   :  { %v8416_v53 = vmul.f32 -1.442695, %v5579_v35  ;;  %v5257_v62 = vpop.f32.mrb[79].mxu0  ;;  %v5298_v0 = vpop.f32.mrb[79].mxu1  ;;  %v12144_v35 = vld [vmem:[%s12903_s2 + $0x44] ss:$16 sps:$4 sm:$0xff]  }
 0x6d5   :  { %9490 = vtanh.f32 %v12044_v46  ;;  %v8417_v6 = vmul.f32 -1.442695, %v5580_v60  ;;  %v8418_v63 = vmul.f32 -1.442695, %v5582_v58  ;;  %v9489_v21 = vpop.eup %9488  ;;  %v12170_v5 = vld [vmem:[%s12903_s2 + $0x64] ss:$16 sps:$4 sm:$0xff]  }
 0x6d6   :  { %9492 = vpow2.f32 %v8416_v53  ;;  %v12175_v45 = vld [vmem:[%s12903_s2 + $0x6c] ss:$16 sps:$4 sm:$0xff]   ;;  %v12182_v60 = vld [vmem:[%s12903_s2 + $0x60] ss:$16 sps:$4 sm:$0xff]   ;;  %v12187_v19 = vld [vmem:[%s12903_s2 + $0x68] ss:$16 sps:$4 sm:$0xff]  }
 0x6d7   :  { %9494 = vpow2.f32 %v8417_v6  ;;  %v12194_v58 = vld [vmem:[%s12903_s2 + $0x84] ss:$16 sps:$4 sm:$0xff]   ;;  %v12199_v11 = vld [vmem:[%s12903_s2 + $0x8c] ss:$16 sps:$4 sm:$0xff]   ;;  %v12206_v39 = vld [vmem:[%s12903_s2 + $0x80] ss:$16 sps:$4 sm:$0xff]  }
 0x6d8   :  { %9496 = vpow2.f32 %v8418_v63  ;;  %v12211_v53 = vld [vmem:[%s12903_s2 + $0x88] ss:$16 sps:$4 sm:$0xff]   ;;  %v12218_v62 = vld [vmem:[%s12903_s2 + $0xa4] ss:$16 sps:$4 sm:$0xff]   ;;  %v12223_v0 = vld [vmem:[%s12903_s2 + $0xac] ss:$16 sps:$4 sm:$0xff]  }
 0x6d9   :  { %9498 = vtanh.f32 %v5581_v2  ;;  %v12158_v2 = vld [vmem:[%s12903_s2 + $0x40] ss:$16 sps:$4 sm:$0xff]   ;;  %v12235_v63 = vld [vmem:[%s12903_s2 + $0xa8] ss:$16 sps:$4 sm:$0xff]  }
 0x6da   :  { %v12230_v6 = vld [vmem:[%s12903_s2 + $0xa0] ss:$16 sps:$4 sm:$0xff]  }
 0x6df   :  { %v9491_v20 = vpop.eup %9490 }
 0x6e0   :  { %v9493_v7 = vpop.eup %9492  ;;  %v12049_v23 = vmul.f32 %v9491_v20, %v9489_v21  ;;  %v12242_v21 = vld [vmem:[%s12903_s2 + $0xc4] ss:$16 sps:$4 sm:$0xff]   ;;  %v12247_v20 = vld [vmem:[%s12903_s2 + $0xcc] ss:$16 sps:$4 sm:$0xff]  }
 0x6e1   :  { %v9495_v24 = vpop.eup %9494  ;;  %v5586_v26 = vadd.f32 1.0, %v9493_v7  ;;  %v12254_v7 = vld [vmem:[%s12903_s2 + $0xc0] ss:$16 sps:$4 sm:$0xff]  }
 0x6e2   :  { %13308 = vst [vmem:[#allocation68_spill] sm:$0xff] %v12049_v23  ;;  %v5592_v27 = vadd.f32 1.0, %v9495_v24  ;;  %v5300_v28 = vpack.c.bf16 %v12049_v23, %v12049_v23  ;;  %v5008_v56 = vmul.f32 %v10567_v38, %v12049_v23  ;;  %v12259_v24 = vld [vmem:[%s12903_s2 + $0xc8] ss:$16 sps:$4 sm:$0xff]  }
 0x6e3   :  { %9500 = vrcp.f32 %v5586_v26  ;;  %v12266_v26 = vld [vmem:[%s12903_s2 + $0xe4] ss:$16 sps:$4 sm:$0xff]   ;;  %v12431_v23 = vld [vmem:[%s12904_s5 + $0xa8] ss:$16 sps:$4 sm:$0xff]  }
 0x6e4   :  { %9502 = vrcp.f32 %v5592_v27  ;;  %5526 = vmatmul.mubr.bf16.vlgmr.msra.gmra.mrb[80].mxu0 %v5300_v28  ;;  %5567 = vmatmul.mubr.bf16.vlgmr.msra.gmra.mrb[80].mxu1 %v5300_v28  ;;  %v12271_v27 = vld [vmem:[%s12903_s2 + $0xec] ss:$16 sps:$4 sm:$0xff]   ;;  %v12278_v28 = vld [vmem:[%s12903_s2 + $0xe0] ss:$16 sps:$4 sm:$0xff]   ;;  %13342 = vst [vmem:[#allocation46_spill] sm:$0xff] %v12431_v23 }
 0x6e5   :  { %5801 = vmatpush1.bf16.msra.mxu0 %v11780_v15  ;;  %5842 = vmatpush1.bf16.msra.mxu1 %v11785_v4  ;;  %v9497_v15 = vpop.eup %9496 }
 0x6e6   :  { %5009 = vadd.xlane.f32.xlu0 %v5008_v56  ;;  %5802 = vmatprep.subr.bf16.mxu0 %v11794_v22  ;;  %v9499_v30 = vpop.eup %9498  ;;  %v13310_v22 = vld [vmem:[#allocation23_spill] sm:$0xff]  ;;  %v5599_v1 = vadd.f32 1.0, %v9497_v15  ;;  %v12296_v15 = vld [vmem:[%s12904_s5 + $0x4] ss:$16 sps:$4 sm:$0xff]  }
 0x6e7   :  { %5843 = vmatprep.subr.bf16.mxu1 %v11799_v49  ;;  %5832 = vmatprep.mubr.bf16.mxu0 %v13106_v14  ;;  %v12283_v56 = vld [vmem:[%s12903_s2 + $0xe8] ss:$16 sps:$4 sm:$0xff]  }
 0x6e8   :  { %5873 = vmatprep.mubr.bf16.mxu1 %v13106_v14  ;;  %9504 = vrcp.f32 %v5599_v1  ;;  %v12335_v1 = vld [vmem:[%s12904_s5 + $0x28] ss:$16 sps:$4 sm:$0xff]  }
 0x6e9   :  { %5803 = vmatpush1.bf16.msra.mxu0 %v11806_v59  ;;  %5844 = vmatpush1.bf16.msra.mxu1 %v11811_v50  ;;  %13326 = vst [vmem:[#allocation5_spill] sm:$0xff] %v12335_v1 }
 0x6ea   :  { %5804 = vmatprep.subr.bf16.mxu0 %v11817_v9  ;;  %5845 = vmatprep.subr.bf16.mxu1 %v11822_v55  ;;  %v13311_v9 = vld [vmem:[#allocation17_spill] sm:$0xff]  ;;  %v13312_v55 = vld [vmem:[#allocation18_spill] sm:$0xff] }
 0x6ed   :  { %v9501_v4 = vpop.eup %9500  ;;  %5805 = vmatpush1.bf16.msra.mxu0 %v13309_v31  ;;  %5846 = vmatpush1.bf16.msra.mxu1 %v13310_v22  ;;  %v12311_v31 = vld [vmem:[%s12904_s5 + $0x8] ss:$16 sps:$4 sm:$0xff]   ;;  %v12320_v22 = vld [vmem:[%s12904_s5 + $0x24] ss:$16 sps:$4 sm:$0xff]  }
 0x6ee   :  { %v9503_v49 = vpop.eup %9502  ;;  %v5603_v32 = vmul.f32 %v9501_v4, %v9499_v30  ;;  %5806 = vmatprep.subr.bf16.mxu0 %v11844_v3  ;;  %5847 = vmatprep.subr.bf16.mxu1 %v11849_v48  ;;  %v13314_v3 = vld [vmem:[#allocation61_spill] sm:$0xff]  ;;  %v13315_v48 = vld [vmem:[#allocation62_spill] sm:$0xff]  ;;  %13322 = vst [vmem:[#allocation24_spill] sm:$0xff] %v12311_v31  ;;  %13323 = vst [vmem:[#allocation25_spill] sm:$0xff] %v12320_v22 }
 0x6ef   :  { %v5602_v59 = vmul.f32 %v9503_v49, %v11876_v44  ;;  %v13316_v44 = vld [vmem:[#allocation63_spill] sm:$0xff]  ;;  %v12306_v4 = vld [vmem:[%s12904_s5] ss:$16 sps:$4 sm:$0xff]  }
 0x6f0   :  { %v12301_v30 = vld [vmem:[%s12904_s5 + $0xc] ss:$16 sps:$4 sm:$0xff]   ;;  %13321 = vst [vmem:[#allocation69_spill] sm:$0xff] %v12306_v4 }
 0x6f1   :  { %v12070_v50 = vadd.f32 %v5603_v32, %v5602_v59  ;;  %5807 = vmatpush1.bf16.msra.mxu0 %v11856_v52  ;;  %5848 = vmatpush1.bf16.msra.mxu1 %v11861_v16  ;;  %v13318_v52 = vld [vmem:[#allocation65_spill] sm:$0xff]  ;;  %v13319_v16 = vld [vmem:[#allocation66_spill] sm:$0xff] }
 0x6f2   :  { %5808 = vmatprep.subr.bf16.mxu0 %v13311_v9  ;;  %5849 = vmatprep.subr.bf16.mxu1 %v13312_v55  ;;  %v9505_v8 = vpop.eup %9504  ;;  %v12325_v49 = vld [vmem:[%s12904_s5 + $0x2c] ss:$16 sps:$4 sm:$0xff]   ;;  %v12330_v32 = vld [vmem:[%s12904_s5 + $0x20] ss:$16 sps:$4 sm:$0xff]   ;;  %v12344_v59 = vld [vmem:[%s12904_s5 + $0x44] ss:$16 sps:$4 sm:$0xff]  }
 0x6f3   :  { %9506 = vtanh.f32 %v12070_v50  ;;  %13324 = vst [vmem:[#allocation26_spill] sm:$0xff] %v12325_v49  ;;  %13325 = vst [vmem:[#allocation27_spill] sm:$0xff] %v12330_v32  ;;  %v12349_v9 = vld [vmem:[%s12904_s5 + $0x4c] ss:$16 sps:$4 sm:$0xff]   ;;  %v12354_v55 = vld [vmem:[%s12904_s5 + $0x40] ss:$16 sps:$4 sm:$0xff]  }
 0x6f4   :  { %13327 = vst [vmem:[#allocation6_spill] sm:$0xff] %v12344_v59  ;;  %13328 = vst [vmem:[#allocation7_spill] sm:$0xff] %v12349_v9 }
 0x6f5   :  { %5809 = vmatpush1.bf16.msra.mxu0 %v13313_v10  ;;  %5850 = vmatpush1.bf16.msra.mxu1 %v13314_v3  ;;  %13329 = vst [vmem:[#allocation8_spill] sm:$0xff] %v12354_v55  ;;  %v12359_v10 = vld [vmem:[%s12904_s5 + $0x48] ss:$16 sps:$4 sm:$0xff]   ;;  %v12368_v3 = vld [vmem:[%s12904_s5 + $0x64] ss:$16 sps:$4 sm:$0xff]  }
 0x6f6   :  { %5810 = vmatprep.subr.bf16.mxu0 %v13315_v48  ;;  %5851 = vmatprep.subr.bf16.mxu1 %v13316_v44  ;;  %13330 = vst [vmem:[#allocation10_spill] sm:$0xff] %v12359_v10  ;;  %13331 = vst [vmem:[#allocation9_spill] sm:$0xff] %v12368_v3  ;;  %v12373_v48 = vld [vmem:[%s12904_s5 + $0x6c] ss:$16 sps:$4 sm:$0xff]   ;;  %v12378_v44 = vld [vmem:[%s12904_s5 + $0x60] ss:$16 sps:$4 sm:$0xff]  }
 0x6f7   :  { %13332 = vst [vmem:[#allocation12_spill] sm:$0xff] %v12373_v48  ;;  %13333 = vst [vmem:[#allocation11_spill] sm:$0xff] %v12378_v44 }
 0x6f9   :  { %5811 = vmatpush1.bf16.msra.mxu0 %v13317_v36  ;;  %5852 = vmatpush1.bf16.msra.mxu1 %v13318_v52  ;;  %v12383_v36 = vld [vmem:[%s12904_s5 + $0x68] ss:$16 sps:$4 sm:$0xff]   ;;  %v12392_v52 = vld [vmem:[%s12904_s5 + $0x84] ss:$16 sps:$4 sm:$0xff]  }
 0x6fa   :  { %5812 = vmatprep.subr.bf16.mxu0 %v13319_v16  ;;  %5853 = vmatprep.subr.bf16.mxu1 %v13320_v37  ;;  %13334 = vst [vmem:[#allocation13_spill] sm:$0xff] %v12383_v36  ;;  %13335 = vst [vmem:[#allocation14_spill] sm:$0xff] %v12392_v52  ;;  %v12397_v16 = vld [vmem:[%s12904_s5 + $0x8c] ss:$16 sps:$4 sm:$0xff]   ;;  %v12402_v37 = vld [vmem:[%s12904_s5 + $0x80] ss:$16 sps:$4 sm:$0xff]  }
 0x6fb   :  { %13336 = vst [vmem:[#allocation15_spill] sm:$0xff] %v12397_v16  ;;  %13337 = vst [vmem:[#allocation41_spill] sm:$0xff] %v12402_v37 }
 0x6fd   :  { %v9507_v13 = vpop.eup %9506  ;;  %5813 = vmatpush1.bf16.msra.mxu0 %v11932_v51  ;;  %5854 = vmatpush1.bf16.msra.mxu1 %v11937_v54  ;;  %v12106_v51 = vld [vmem:[%s12903_s2] ss:$16 sps:$4 sm:$0xff]   ;;  %v12111_v54 = vld [vmem:[%s12903_s2 + $0x8] ss:$16 sps:$4 sm:$0xff]  }
 0x6fe   :  { %5814 = vmatprep.subr.bf16.mxu0 %v11944_v34  ;;  %5855 = vmatprep.subr.bf16.mxu1 %v11949_v18  ;;  %v5606_v40 = vmul.f32 %v9507_v13, %v9505_v8  ;;  %v12118_v34 = vld [vmem:[%s12903_s2 + $0x24] ss:$16 sps:$4 sm:$0xff]   ;;  %v12123_v18 = vld [vmem:[%s12903_s2 + $0x2c] ss:$16 sps:$4 sm:$0xff]   ;;  %v12407_v8 = vld [vmem:[%s12904_s5 + $0x88] ss:$16 sps:$4 sm:$0xff]  }
 0x6ff   :  { %13338 = vst [vmem:[#allocation42_spill] sm:$0xff] %v12407_v8  ;;  %v12416_v13 = vld [vmem:[%s12904_s5 + $0xa4] ss:$16 sps:$4 sm:$0xff]  }
 0x700   :  { %v12099_v61 = vpack.c.bf16 %v5606_v40, %v5606_v40  ;;  %13339 = vst [vmem:[#allocation43_spill] sm:$0xff] %v12416_v13  ;;  %v12421_v40 = vld [vmem:[%s12904_s5 + $0xac] ss:$16 sps:$4 sm:$0xff]  }
 0x701   :  { %5815 = vmatpush1.bf16.msra.mxu0 %v11956_v42  ;;  %5856 = vmatpush1.bf16.msra.mxu1 %v11961_v33  ;;  %v12132_v33 = vld [vmem:[%s12903_s2 + $0x20] ss:$16 sps:$4 sm:$0xff]   ;;  %v12137_v42 = vld [vmem:[%s12903_s2 + $0x28] ss:$16 sps:$4 sm:$0xff]   ;;  %13340 = vst [vmem:[#allocation44_spill] sm:$0xff] %v12421_v40 }
 0x702   :  { %6120 = vmatprep.subr.bf16.mxu0 %v12092_v57  ;;  %6161 = vmatprep.subr.bf16.mxu1 %v12097_v41 }
 0x704   :  { %5833 = vmatmul.mubr.bf16.vlgmr.msra.gmra.mrb[84].mxu0 %v12099_v61  ;;  %5874 = vmatmul.mubr.bf16.vlgmr.msra.gmra.mrb[84].mxu1 %v12099_v61 }
 0x705   :  { %6121 = vmatpush1.bf16.msra.mxu0 %v12106_v51  ;;  %6162 = vmatpush1.bf16.msra.mxu1 %v12111_v54 }
 0x706   :  { %6122 = vmatprep.subr.bf16.mxu0 %v12118_v34  ;;  %6163 = vmatprep.subr.bf16.mxu1 %v12123_v18 }
 0x707   :  { %6152 = vmatprep.mubr.bf16.mxu0 %v13106_v14  ;;  %6193 = vmatprep.mubr.bf16.mxu1 %v13106_v14 }
 0x709   :  { %6123 = vmatpush1.bf16.msra.mxu0 %v12132_v33  ;;  %6164 = vmatpush1.bf16.msra.mxu1 %v12137_v42 }
 0x70a   :  { %6124 = vmatprep.subr.bf16.mxu0 %v12144_v35  ;;  %6165 = vmatprep.subr.bf16.mxu1 %v12149_v12 }
 0x70d   :  { %6125 = vmatpush1.bf16.msra.mxu0 %v12158_v2  ;;  %6166 = vmatpush1.bf16.msra.mxu1 %v12163_v43 }
 0x70e   :  { %6126 = vmatprep.subr.bf16.mxu0 %v12170_v5  ;;  %6167 = vmatprep.subr.bf16.mxu1 %v12175_v45 }
 0x711   :  { %6127 = vmatpush1.bf16.msra.mxu0 %v12182_v60  ;;  %6168 = vmatpush1.bf16.msra.mxu1 %v12187_v19 }
 0x712   :  { %6128 = vmatprep.subr.bf16.mxu0 %v12194_v58  ;;  %6169 = vmatprep.subr.bf16.mxu1 %v12199_v11 }
 0x715   :  { %6129 = vmatpush1.bf16.msra.mxu0 %v12206_v39  ;;  %6170 = vmatpush1.bf16.msra.mxu1 %v12211_v53 }
 0x716   :  { %6130 = vmatprep.subr.bf16.mxu0 %v12218_v62  ;;  %6171 = vmatprep.subr.bf16.mxu1 %v12223_v0 }
 0x719   :  { %6131 = vmatpush1.bf16.msra.mxu0 %v12230_v6  ;;  %6172 = vmatpush1.bf16.msra.mxu1 %v12235_v63 }
 0x71a   :  { %6132 = vmatprep.subr.bf16.mxu0 %v12242_v21  ;;  %6173 = vmatprep.subr.bf16.mxu1 %v12247_v20 }
 0x71d   :  { %6133 = vmatpush1.bf16.msra.mxu0 %v12254_v7  ;;  %6174 = vmatpush1.bf16.msra.mxu1 %v12259_v24 }
 0x71e   :  { %6134 = vmatprep.subr.bf16.mxu0 %v12266_v26  ;;  %6175 = vmatprep.subr.bf16.mxu1 %v12271_v27 }
 0x721   :  { %6135 = vmatpush1.bf16.msra.mxu0 %v12278_v28  ;;  %6176 = vmatpush1.bf16.msra.mxu1 %v12283_v56 }
 0x722   :  { %6395 = vmatprep.subr.bf16.mxu0 %v12296_v15  ;;  %6436 = vmatprep.subr.bf16.mxu1 %v12301_v30 }
 0x724   :  { %6153 = vmatmul.mubr.bf16.vlgmr.msra.gmra.mrb[88].mxu0 %v12099_v61  ;;  %6194 = vmatmul.mubr.bf16.vlgmr.msra.gmra.mrb[88].mxu1 %v12099_v61  ;;  %v12426_v61 = vld [vmem:[%s12904_s5 + $0xa0] ss:$16 sps:$4 sm:$0xff]  }
 0x725   :  { %6427 = vmatprep.mubr.bf16.mxu0 %v13106_v14  ;;  %6468 = vmatprep.mubr.bf16.mxu1 %v13106_v14  ;;  %13341 = vst [vmem:[#allocation45_spill] sm:$0xff] %v12426_v61 }
 0x726   :  { %6396 = vmatpush1.bf16.msra.mxu0 %v12306_v4  ;;  %6437 = vmatpush1.bf16.msra.mxu1 %v12311_v31 }
 0x727   :  { %6397 = vmatprep.subr.bf16.mxu0 %v12320_v22  ;;  %6438 = vmatprep.subr.bf16.mxu1 %v12325_v49 }
 0x72a   :  { %6398 = vmatpush1.bf16.msra.mxu0 %v12330_v32  ;;  %6439 = vmatpush1.bf16.msra.mxu1 %v12335_v1 }
 0x72b   :  { %6399 = vmatprep.subr.bf16.mxu0 %v12344_v59  ;;  %6440 = vmatprep.subr.bf16.mxu1 %v12349_v9 }
 0x72e   :  { %6400 = vmatpush1.bf16.msra.mxu0 %v12354_v55  ;;  %6441 = vmatpush1.bf16.msra.mxu1 %v12359_v10 }
 0x72f   :  { %6401 = vmatprep.subr.bf16.mxu0 %v12368_v3  ;;  %6442 = vmatprep.subr.bf16.mxu1 %v12373_v48 }
 0x732   :  { %6402 = vmatpush1.bf16.msra.mxu0 %v12378_v44  ;;  %6443 = vmatpush1.bf16.msra.mxu1 %v12383_v36 }
 0x733   :  { %6403 = vmatprep.subr.bf16.mxu0 %v12392_v52  ;;  %6444 = vmatprep.subr.bf16.mxu1 %v12397_v16 }
 0x736   :  { %6404 = vmatpush1.bf16.msra.mxu0 %v12402_v37  ;;  %6445 = vmatpush1.bf16.msra.mxu1 %v12407_v8  ;;  %v12440_v8 = vld [vmem:[%s12904_s5 + $0xc4] ss:$16 sps:$4 sm:$0xff]   ;;  %v12445_v37 = vld [vmem:[%s12904_s5 + $0xcc] ss:$16 sps:$4 sm:$0xff]  }
 0x737   :  { %6405 = vmatprep.subr.bf16.mxu0 %v12416_v13  ;;  %6446 = vmatprep.subr.bf16.mxu1 %v12421_v40  ;;  %13343 = vst [vmem:[#allocation47_spill] sm:$0xff] %v12440_v8  ;;  %13344 = vst [vmem:[#allocation48_spill] sm:$0xff] %v12445_v37  ;;  %v12450_v13 = vld [vmem:[%s12904_s5 + $0xc0] ss:$16 sps:$4 sm:$0xff]   ;;  %v12469_v40 = vld [vmem:[%s12904_s5 + $0xec] ss:$16 sps:$4 sm:$0xff]  }
 0x738   :  { %13345 = vst [vmem:[#allocation49_spill] sm:$0xff] %v12450_v13  ;;  %13348 = vst [vmem:[#allocation52_spill] sm:$0xff] %v12469_v40 }
 0x73a   :  { %6406 = vmatpush1.bf16.msra.mxu0 %v12426_v61  ;;  %6447 = vmatpush1.bf16.msra.mxu1 %v12431_v23  ;;  %v12455_v61 = vld [vmem:[%s12904_s5 + $0xc8] ss:$16 sps:$4 sm:$0xff]   ;;  %v12464_v23 = vld [vmem:[%s12904_s5 + $0xe4] ss:$16 sps:$4 sm:$0xff]  }
 0x73b   :  { %13346 = vst [vmem:[#allocation50_spill] sm:$0xff] %v12455_v61  ;;  %6407 = vmatprep.subr.bf16.mxu0 %v12440_v8  ;;  %6448 = vmatprep.subr.bf16.mxu1 %v12445_v37  ;;  %13347 = vst [vmem:[#allocation51_spill] sm:$0xff] %v12464_v23  ;;  %v12474_v8 = vld [vmem:[%s12904_s5 + $0xe0] ss:$16 sps:$4 sm:$0xff]   ;;  %v12493_v37 = vld [vmem:[%s12905_s4 + $0xc] ss:$16 sps:$4 sm:$0xff]  }
 0x73c   :  { %13349 = vst [vmem:[#allocation53_spill] sm:$0xff] %v12474_v8  ;;  %13352 = vst [vmem:[#allocation56_spill] sm:$0xff] %v12493_v37 }
 0x73e   :  { %6408 = vmatpush1.bf16.msra.mxu0 %v12450_v13  ;;  %6449 = vmatpush1.bf16.msra.mxu1 %v12455_v61  ;;  %v12479_v13 = vld [vmem:[%s12904_s5 + $0xe8] ss:$16 sps:$4 sm:$0xff]   ;;  %v12488_v61 = vld [vmem:[%s12905_s4 + $0x4] ss:$16 sps:$4 sm:$0xff]  }
 0x73f   :  { %13350 = vst [vmem:[#allocation54_spill] sm:$0xff] %v12479_v13  ;;  %6409 = vmatprep.subr.bf16.mxu0 %v12464_v23  ;;  %6450 = vmatprep.subr.bf16.mxu1 %v12469_v40  ;;  %13351 = vst [vmem:[#allocation55_spill] sm:$0xff] %v12488_v61 }
 0x742   :  { %6410 = vmatpush1.bf16.msra.mxu0 %v12474_v8  ;;  %6451 = vmatpush1.bf16.msra.mxu1 %v12479_v13 }
 0x743   :  { %6702 = vmatprep.subr.bf16.mxu0 %v12488_v61  ;;  %6743 = vmatprep.subr.bf16.mxu1 %v12493_v37 }
 0x7b7   :  { %v5527_v23 = vpop.f32.mrb[80].mxu0  ;;  %v5568_v40 = vpop.f32.mrb[80].mxu1 }
 0x7b8   :  { %v5529_v16 = vpop.f32.mrb[81].mxu0  ;;  %v5570_v8 = vpop.f32.mrb[81].mxu1 }
 0x7b9   :  { %v5531_v52 = vpop.f32.mrb[82].mxu0  ;;  %v5572_v13 = vpop.f32.mrb[82].mxu1 }
 0x7ba   :  { %v5532_v36 = vpop.f32.mrb[83].mxu0  ;;  %v5573_v44 = vpop.f32.mrb[83].mxu1 }
 0x7d7   :  { %v5834_v48 = vpop.f32.mrb[84].mxu0  ;;  %v5875_v3 = vpop.f32.mrb[84].mxu1 }
 0x7d8   :  { %v5835_v10 = vadd.f32 %v5834_v48, %v5527_v23  ;;  %v5876_v55 = vadd.f32 %v5875_v3, %v5568_v40  ;;  %v5836_v9 = vpop.f32.mrb[85].mxu0  ;;  %v5877_v59 = vpop.f32.mrb[85].mxu1  ;;  %v13354_v40 = vld [vmem:[#allocation33_spill] sm:$0xff] }
 0x7d9   :  { %v5837_v1 = vadd.f32 %v5836_v9, %v5529_v16  ;;  %v5878_v32 = vadd.f32 %v5877_v59, %v5570_v8  ;;  %v5838_v49 = vpop.f32.mrb[86].mxu0  ;;  %v5879_v61 = vpop.f32.mrb[86].mxu1  ;;  %v13353_v8 = vld [vmem:[#allocation32_spill] sm:$0xff] }
 0x7da   :  { %v5882_v37 = vadd.f32 %v5835_v10, %v10541_v25  ;;  %v5839_v22 = vpop.f32.mrb[87].mxu0  ;;  %v5880_v31 = vpop.f32.mrb[87].mxu1  ;;  %v5884_v3 = vadd.f32 %v5876_v55, %v10556_v17 }
 0x7db   :  { %v5883_v4 = vadd.f32 %v5837_v1, %v10545_v29  ;;  %v5885_v44 = vadd.f32 %v5878_v32, %v10551_v47 }
 0x7dc   :  { %v8451_v52 = vmul.f32 -1.442695, %v5882_v37 }
 0x7dd   :  { %v8452_v13 = vmul.f32 -1.442695, %v5883_v4  ;;  %v8453_v23 = vmul.f32 -1.442695, %v5885_v44 }
 0x7de   :  { %9508 = vpow2.f32 %v8451_v52 }
 0x7df   :  { %9510 = vpow2.f32 %v8452_v13 }
 0x7e0   :  { %9512 = vpow2.f32 %v8453_v23  ;;  %v13355_v23 = vld [vmem:[#allocation34_spill] sm:$0xff] }
 0x7e1   :  { %9514 = vtanh.f32 %v5884_v3 }
 0x7e8   :  { %v9509_v48 = vpop.eup %9508 }
 0x7e9   :  { %v9511_v9 = vpop.eup %9510  ;;  %v5889_v59 = vadd.f32 1.0, %v9509_v48  ;;  %v13356_v48 = vld [vmem:[#allocation35_spill] sm:$0xff] }
 0x7ea   :  { %v5895_v49 = vadd.f32 1.0, %v9511_v9  ;;  %v9513_v31 = vpop.eup %9512 }
 0x7eb   :  { %9516 = vrcp.f32 %v5889_v59  ;;  %v9515_v22 = vpop.eup %9514  ;;  %v5902_v36 = vadd.f32 1.0, %v9513_v31 }
 0x7ec   :  { %9518 = vrcp.f32 %v5895_v49 }
 0x7ed   :  { %9520 = vrcp.f32 %v5902_v36  ;;  %v12514_v36 = vld [vmem:[%s12905_s4] ss:$16 sps:$4 sm:$0xff]  }
 0x7f5   :  { %v9517_v1 = vpop.eup %9516 }
 0x7f6   :  { %v9519_v10 = vpop.eup %9518  ;;  %v5906_v4 = vmul.f32 %v9517_v1, %v9515_v22 }
 0x7f7   :  { %v5905_v16 = vmul.f32 %v9519_v10, %v12044_v46  ;;  %v6154_v32 = vpop.f32.mrb[88].mxu0  ;;  %v6195_v37 = vpop.f32.mrb[88].mxu1 }
 0x7f8   :  { %v6481_v55 = vadd.f32 %v6154_v32, %v13353_v8  ;;  %v6483_v61 = vadd.f32 %v6195_v37, %v13354_v40  ;;  %v6156_v52 = vpop.f32.mrb[89].mxu0  ;;  %v6197_v13 = vpop.f32.mrb[89].mxu1 }
 0x7f9   :  { %v12504_v44 = vadd.f32 %v5906_v4, %v5905_v16  ;;  %v6482_v3 = vadd.f32 %v6156_v52, %v13355_v23  ;;  %v6484_v9 = vadd.f32 %v6197_v13, %v13356_v48  ;;  %v6158_v59 = vpop.f32.mrb[90].mxu0  ;;  %v6199_v49 = vpop.f32.mrb[90].mxu1  ;;  %v12533_v48 = vld [vmem:[%s12905_s4 + $0x2c] ss:$16 sps:$4 sm:$0xff]  }
 0x7fa   :  { %v8519_v31 = vmul.f32 -1.442695, %v6481_v55  ;;  %v6159_v22 = vpop.f32.mrb[91].mxu0  ;;  %v6200_v46 = vpop.f32.mrb[91].mxu1  ;;  %v12519_v55 = vld [vmem:[%s12905_s4 + $0x8] ss:$16 sps:$4 sm:$0xff]  }
 0x7fb   :  { %9522 = vtanh.f32 %v12504_v44  ;;  %v8520_v1 = vmul.f32 -1.442695, %v6482_v3  ;;  %v8521_v10 = vmul.f32 -1.442695, %v6484_v9  ;;  %v9521_v32 = vpop.eup %9520  ;;  %v12528_v3 = vld [vmem:[%s12905_s4 + $0x24] ss:$16 sps:$4 sm:$0xff]  }
 0x7fc   :  { %9524 = vpow2.f32 %v8519_v31  ;;  %v12545_v9 = vld [vmem:[%s12905_s4 + $0x28] ss:$16 sps:$4 sm:$0xff]   ;;  %v12551_v59 = vld [vmem:[%s12905_s4 + $0x44] ss:$16 sps:$4 sm:$0xff]   ;;  %v12556_v49 = vld [vmem:[%s12905_s4 + $0x4c] ss:$16 sps:$4 sm:$0xff]  }
 0x7fd   :  { %9526 = vpow2.f32 %v8520_v1  ;;  %v12566_v31 = vld [vmem:[%s12905_s4 + $0x40] ss:$16 sps:$4 sm:$0xff]   ;;  %v12571_v22 = vld [vmem:[%s12905_s4 + $0x48] ss:$16 sps:$4 sm:$0xff]   ;;  %v12578_v46 = vld [vmem:[%s12905_s4 + $0x64] ss:$16 sps:$4 sm:$0xff]  }
 0x7fe   :  { %9528 = vpow2.f32 %v8521_v10  ;;  %13358 = vst [vmem:[#allocation58_spill] sm:$0xff] %v12566_v31  ;;  %13359 = vst [vmem:[#allocation59_spill] sm:$0xff] %v12571_v22  ;;  %v12583_v1 = vld [vmem:[%s12905_s4 + $0x6c] ss:$16 sps:$4 sm:$0xff]  }
 0x7ff   :  { %9530 = vtanh.f32 %v6483_v61  ;;  %v12540_v61 = vld [vmem:[%s12905_s4 + $0x20] ss:$16 sps:$4 sm:$0xff]  }
 0x805   :  { %v9523_v37 = vpop.eup %9522 }
 0x806   :  { %v9525_v4 = vpop.eup %9524  ;;  %v12509_v16 = vmul.f32 %v9523_v37, %v9521_v32 }
 0x807   :  { %v9527_v8 = vpop.eup %9526  ;;  %v6488_v40 = vadd.f32 1.0, %v9525_v4  ;;  %v12590_v4 = vld [vmem:[%s12905_s4 + $0x60] ss:$16 sps:$4 sm:$0xff]  }
 0x808   :  { %13357 = vst [vmem:[#allocation57_spill] sm:$0xff] %v12509_v16  ;;  %v6494_v52 = vadd.f32 1.0, %v9527_v8  ;;  %v6202_v13 = vpack.c.bf16 %v12509_v16, %v12509_v16  ;;  %v5910_v23 = vmul.f32 %v10567_v38, %v12509_v16  ;;  %v9529_v10 = vpop.eup %9528  ;;  %v12595_v8 = vld [vmem:[%s12905_s4 + $0x68] ss:$16 sps:$4 sm:$0xff]   ;;  %v12607_v16 = vld [vmem:[%s12905_s4 + $0x8c] ss:$16 sps:$4 sm:$0xff]  }
 0x809   :  { %9532 = vrcp.f32 %v6488_v40  ;;  %v9531_v32 = vpop.eup %9530  ;;  %13361 = vst [vmem:[#allocation20_spill] sm:$0xff] %v12607_v16 }
 0x80a   :  { %9534 = vrcp.f32 %v6494_v52  ;;  %6428 = vmatmul.mubr.bf16.vlgmr.msra.gmra.mrb[92].mxu0 %v6202_v13  ;;  %6469 = vmatmul.mubr.bf16.vlgmr.msra.gmra.mrb[92].mxu1 %v6202_v13  ;;  %v6501_v13 = vadd.f32 1.0, %v9529_v10  ;;  %v12617_v10 = vld [vmem:[%s12905_s4 + $0x80] ss:$16 sps:$4 sm:$0xff]  }
 0x80b   :  { %6703 = vmatpush1.bf16.msra.mxu0 %v12514_v36  ;;  %6744 = vmatpush1.bf16.msra.mxu1 %v12519_v55  ;;  %13362 = vst [vmem:[#allocation28_spill] sm:$0xff] %v12617_v10 }
 0x80c   :  { %5911 = vadd.xlane.f32.xlu1 %v5910_v23  ;;  %6704 = vmatprep.subr.bf16.mxu0 %v12528_v3  ;;  %v12602_v23 = vld [vmem:[%s12905_s4 + $0x84] ss:$16 sps:$4 sm:$0xff]   ;;  %9536 = vrcp.f32 %v6501_v13  ;;  %v12659_v13 = vld [vmem:[%s12905_s4 + $0xcc] ss:$16 sps:$4 sm:$0xff]  }
 0x80d   :  { %6745 = vmatprep.subr.bf16.mxu1 %v12533_v48  ;;  %6734 = vmatprep.mubr.bf16.mxu0 %v13106_v14  ;;  %13360 = vst [vmem:[#allocation60_spill] sm:$0xff] %v12602_v23  ;;  %13369 = vst [vmem:[#allocation18_spill] sm:$0xff] %v12659_v13 }
 0x80e   :  { %6775 = vmatprep.mubr.bf16.mxu1 %v13106_v14 }
 0x80f   :  { %6705 = vmatpush1.bf16.msra.mxu0 %v12540_v61  ;;  %6746 = vmatpush1.bf16.msra.mxu1 %v12545_v9 }
 0x810   :  { %6706 = vmatprep.subr.bf16.mxu0 %v12551_v59  ;;  %6747 = vmatprep.subr.bf16.mxu1 %v12556_v49 }
 0x813   :  { %v9533_v37 = vpop.eup %9532  ;;  %6707 = vmatpush1.bf16.msra.mxu0 %v12566_v31  ;;  %6748 = vmatpush1.bf16.msra.mxu1 %v12571_v22 }
 0x814   :  { %v9535_v40 = vpop.eup %9534  ;;  %v6505_v52 = vmul.f32 %v9533_v37, %v9531_v32  ;;  %6708 = vmatprep.subr.bf16.mxu0 %v12578_v46  ;;  %6749 = vmatprep.subr.bf16.mxu1 %v12583_v1  ;;  %v12622_v32 = vld [vmem:[%s12905_s4 + $0x88] ss:$16 sps:$4 sm:$0xff]   ;;  %v12642_v37 = vld [vmem:[%s12905_s4 + $0xa0] ss:$16 sps:$4 sm:$0xff]  }
 0x815   :  { %v6504_v22 = vmul.f32 %v9535_v40, %v12070_v50  ;;  %13363 = vst [vmem:[#allocation29_spill] sm:$0xff] %v12622_v32  ;;  %v12629_v50 = vld [vmem:[%s12905_s4 + $0xa4] ss:$16 sps:$4 sm:$0xff]   ;;  %13366 = vst [vmem:[#allocation22_spill] sm:$0xff] %v12642_v37  ;;  %v12647_v40 = vld [vmem:[%s12905_s4 + $0xa8] ss:$16 sps:$4 sm:$0xff]  }
 0x816   :  { %13364 = vst [vmem:[#allocation30_spill] sm:$0xff] %v12629_v50  ;;  %13367 = vst [vmem:[#allocation23_spill] sm:$0xff] %v12647_v40 }
 0x817   :  { %v12610_v31 = vadd.f32 %v6505_v52, %v6504_v22  ;;  %6709 = vmatpush1.bf16.msra.mxu0 %v12590_v4  ;;  %6750 = vmatpush1.bf16.msra.mxu1 %v12595_v8  ;;  %v12634_v22 = vld [vmem:[%s12905_s4 + $0xac] ss:$16 sps:$4 sm:$0xff]   ;;  %v12654_v52 = vld [vmem:[%s12905_s4 + $0xc4] ss:$16 sps:$4 sm:$0xff]  }
 0x818   :  { %6710 = vmatprep.subr.bf16.mxu0 %v12602_v23  ;;  %6751 = vmatprep.subr.bf16.mxu1 %v12607_v16  ;;  %13365 = vst [vmem:[#allocation31_spill] sm:$0xff] %v12634_v22  ;;  %13368 = vst [vmem:[#allocation17_spill] sm:$0xff] %v12654_v52 }
 0x819   :  { %9538 = vtanh.f32 %v12610_v31 }
 0x81b   :  { %6711 = vmatpush1.bf16.msra.mxu0 %v12617_v10  ;;  %6752 = vmatpush1.bf16.msra.mxu1 %v12622_v32  ;;  %v9537_v32 = vpop.eup %9536 }
 0x81c   :  { %6712 = vmatprep.subr.bf16.mxu0 %v12629_v50  ;;  %6753 = vmatprep.subr.bf16.mxu1 %v12634_v22  ;;  %v12666_v50 = vld [vmem:[%s12905_s4 + $0xc0] ss:$16 sps:$4 sm:$0xff]   ;;  %v12671_v22 = vld [vmem:[%s12905_s4 + $0xc8] ss:$16 sps:$4 sm:$0xff]  }
 0x81f   :  { %6713 = vmatpush1.bf16.msra.mxu0 %v12642_v37  ;;  %6754 = vmatpush1.bf16.msra.mxu1 %v12647_v40  ;;  %v12678_v37 = vld [vmem:[%s12905_s4 + $0xe4] ss:$16 sps:$4 sm:$0xff]   ;;  %v12683_v40 = vld [vmem:[%s12905_s4 + $0xec] ss:$16 sps:$4 sm:$0xff]  }
 0x820   :  { %6714 = vmatprep.subr.bf16.mxu0 %v12654_v52  ;;  %6755 = vmatprep.subr.bf16.mxu1 %v12659_v13  ;;  %v12690_v13 = vld [vmem:[%s12905_s4 + $0xe0] ss:$16 sps:$4 sm:$0xff]   ;;  %v12695_v52 = vld [vmem:[%s12905_s4 + $0xe8] ss:$16 sps:$4 sm:$0xff]  }
 0x823   :  { %v9539_v10 = vpop.eup %9538  ;;  %6715 = vmatpush1.bf16.msra.mxu0 %v12666_v50  ;;  %6756 = vmatpush1.bf16.msra.mxu1 %v12671_v22 }
 0x824   :  { %6716 = vmatprep.subr.bf16.mxu0 %v12678_v37  ;;  %6757 = vmatprep.subr.bf16.mxu1 %v12683_v40  ;;  %v6508_v16 = vmul.f32 %v9539_v10, %v9537_v32 }
 0x826   :  { %v6509_v23 = vpack.c.bf16 %v6508_v16, %v6508_v16 }
 0x827   :  { %6717 = vmatpush1.bf16.msra.mxu0 %v12690_v13  ;;  %6758 = vmatpush1.bf16.msra.mxu1 %v12695_v52 }
 0x828   :  { %7022 = vmatprep.subr.bf16.mxu0 %v12092_v57  ;;  %7063 = vmatprep.subr.bf16.mxu1 %v12097_v41  ;;  %v13370_v57 = vld [vmem:[#allocation69_spill] sm:$0xff]  ;;  %v13371_v41 = vld [vmem:[#allocation24_spill] sm:$0xff] }
 0x82a   :  { %6735 = vmatmul.mubr.bf16.vlgmr.msra.gmra.mrb[96].mxu0 %v6509_v23  ;;  %6776 = vmatmul.mubr.bf16.vlgmr.msra.gmra.mrb[96].mxu1 %v6509_v23 }
 0x82b   :  { %7023 = vmatpush1.bf16.msra.mxu0 %v12106_v51  ;;  %7064 = vmatpush1.bf16.msra.mxu1 %v12111_v54  ;;  %v13372_v51 = vld [vmem:[#allocation25_spill] sm:$0xff]  ;;  %v13373_v54 = vld [vmem:[#allocation26_spill] sm:$0xff] }
 0x82c   :  { %7024 = vmatprep.subr.bf16.mxu0 %v12118_v34  ;;  %7065 = vmatprep.subr.bf16.mxu1 %v12123_v18  ;;  %v13374_v34 = vld [vmem:[#allocation27_spill] sm:$0xff]  ;;  %v13375_v18 = vld [vmem:[#allocation5_spill] sm:$0xff] }
 0x82d   :  { %7054 = vmatprep.mubr.bf16.mxu0 %v13106_v14  ;;  %7095 = vmatprep.mubr.bf16.mxu1 %v13106_v14 }
 0x82f   :  { %7025 = vmatpush1.bf16.msra.mxu0 %v12132_v33  ;;  %7066 = vmatpush1.bf16.msra.mxu1 %v12137_v42  ;;  %v13376_v33 = vld [vmem:[#allocation6_spill] sm:$0xff]  ;;  %v13377_v42 = vld [vmem:[#allocation7_spill] sm:$0xff] }
 0x830   :  { %7026 = vmatprep.subr.bf16.mxu0 %v12144_v35  ;;  %7067 = vmatprep.subr.bf16.mxu1 %v12149_v12  ;;  %v13378_v35 = vld [vmem:[#allocation8_spill] sm:$0xff]  ;;  %v13379_v12 = vld [vmem:[#allocation10_spill] sm:$0xff] }
 0x833   :  { %7027 = vmatpush1.bf16.msra.mxu0 %v12158_v2  ;;  %7068 = vmatpush1.bf16.msra.mxu1 %v12163_v43  ;;  %v13380_v2 = vld [vmem:[#allocation9_spill] sm:$0xff]  ;;  %v13381_v43 = vld [vmem:[#allocation12_spill] sm:$0xff] }
 0x834   :  { %7028 = vmatprep.subr.bf16.mxu0 %v12170_v5  ;;  %7069 = vmatprep.subr.bf16.mxu1 %v12175_v45  ;;  %v13382_v5 = vld [vmem:[#allocation11_spill] sm:$0xff]  ;;  %v13383_v45 = vld [vmem:[#allocation13_spill] sm:$0xff] }
 0x837   :  { %7029 = vmatpush1.bf16.msra.mxu0 %v12182_v60  ;;  %7070 = vmatpush1.bf16.msra.mxu1 %v12187_v19  ;;  %v13384_v60 = vld [vmem:[#allocation14_spill] sm:$0xff]  ;;  %v13385_v19 = vld [vmem:[#allocation15_spill] sm:$0xff] }
 0x838   :  { %7030 = vmatprep.subr.bf16.mxu0 %v12194_v58  ;;  %7071 = vmatprep.subr.bf16.mxu1 %v12199_v11  ;;  %v13386_v58 = vld [vmem:[#allocation41_spill] sm:$0xff]  ;;  %v13387_v11 = vld [vmem:[#allocation42_spill] sm:$0xff] }
 0x83b   :  { %7031 = vmatpush1.bf16.msra.mxu0 %v12206_v39  ;;  %7072 = vmatpush1.bf16.msra.mxu1 %v12211_v53  ;;  %v13388_v39 = vld [vmem:[#allocation43_spill] sm:$0xff]  ;;  %v13389_v53 = vld [vmem:[#allocation44_spill] sm:$0xff] }
 0x83c   :  { %7032 = vmatprep.subr.bf16.mxu0 %v12218_v62  ;;  %7073 = vmatprep.subr.bf16.mxu1 %v12223_v0  ;;  %v13390_v62 = vld [vmem:[#allocation45_spill] sm:$0xff]  ;;  %v13391_v0 = vld [vmem:[#allocation46_spill] sm:$0xff] }
 0x83f   :  { %7033 = vmatpush1.bf16.msra.mxu0 %v12230_v6  ;;  %7074 = vmatpush1.bf16.msra.mxu1 %v12235_v63  ;;  %v13392_v6 = vld [vmem:[#allocation47_spill] sm:$0xff]  ;;  %v13393_v63 = vld [vmem:[#allocation48_spill] sm:$0xff] }
 0x840   :  { %7034 = vmatprep.subr.bf16.mxu0 %v12242_v21  ;;  %7075 = vmatprep.subr.bf16.mxu1 %v12247_v20  ;;  %v13394_v21 = vld [vmem:[#allocation49_spill] sm:$0xff]  ;;  %v13395_v20 = vld [vmem:[#allocation50_spill] sm:$0xff] }
 0x843   :  { %7035 = vmatpush1.bf16.msra.mxu0 %v12254_v7  ;;  %7076 = vmatpush1.bf16.msra.mxu1 %v12259_v24  ;;  %v13396_v7 = vld [vmem:[#allocation51_spill] sm:$0xff]  ;;  %v13397_v24 = vld [vmem:[#allocation52_spill] sm:$0xff] }
 0x844   :  { %7036 = vmatprep.subr.bf16.mxu0 %v12266_v26  ;;  %7077 = vmatprep.subr.bf16.mxu1 %v12271_v27  ;;  %v13398_v26 = vld [vmem:[#allocation53_spill] sm:$0xff]  ;;  %v13399_v27 = vld [vmem:[#allocation54_spill] sm:$0xff] }
 0x847   :  { %7037 = vmatpush1.bf16.msra.mxu0 %v12278_v28  ;;  %7078 = vmatpush1.bf16.msra.mxu1 %v12283_v56  ;;  %v13400_v28 = vld [vmem:[#allocation55_spill] sm:$0xff]  ;;  %v13401_v56 = vld [vmem:[#allocation56_spill] sm:$0xff] }
 0x848   :  { %7297 = vmatprep.subr.bf16.mxu0 %v12296_v15  ;;  %7338 = vmatprep.subr.bf16.mxu1 %v12301_v30 }
 0x84a   :  { %7055 = vmatmul.mubr.bf16.vlgmr.msra.gmra.mrb[100].mxu0 %v6509_v23  ;;  %7096 = vmatmul.mubr.bf16.vlgmr.msra.gmra.mrb[100].mxu1 %v6509_v23 }
 0x84b   :  { %7298 = vmatpush1.bf16.msra.mxu0 %v13370_v57  ;;  %7339 = vmatpush1.bf16.msra.mxu1 %v13371_v41 }
 0x84c   :  { %7299 = vmatprep.subr.bf16.mxu0 %v13372_v51  ;;  %7340 = vmatprep.subr.bf16.mxu1 %v13373_v54 }
 0x84d   :  { %7329 = vmatprep.mubr.bf16.mxu0 %v13106_v14  ;;  %7370 = vmatprep.mubr.bf16.mxu1 %v13106_v14 }
 0x84f   :  { %7300 = vmatpush1.bf16.msra.mxu0 %v13374_v34  ;;  %7341 = vmatpush1.bf16.msra.mxu1 %v13375_v18 }
 0x850   :  { %7301 = vmatprep.subr.bf16.mxu0 %v13376_v33  ;;  %7342 = vmatprep.subr.bf16.mxu1 %v13377_v42 }
 0x853   :  { %7302 = vmatpush1.bf16.msra.mxu0 %v13378_v35  ;;  %7343 = vmatpush1.bf16.msra.mxu1 %v13379_v12 }
 0x854   :  { %7303 = vmatprep.subr.bf16.mxu0 %v13380_v2  ;;  %7344 = vmatprep.subr.bf16.mxu1 %v13381_v43 }
 0x857   :  { %7304 = vmatpush1.bf16.msra.mxu0 %v13382_v5  ;;  %7345 = vmatpush1.bf16.msra.mxu1 %v13383_v45 }
 0x858   :  { %7305 = vmatprep.subr.bf16.mxu0 %v13384_v60  ;;  %7346 = vmatprep.subr.bf16.mxu1 %v13385_v19 }
 0x85b   :  { %7306 = vmatpush1.bf16.msra.mxu0 %v13386_v58  ;;  %7347 = vmatpush1.bf16.msra.mxu1 %v13387_v11 }
 0x85c   :  { %7307 = vmatprep.subr.bf16.mxu0 %v13388_v39  ;;  %7348 = vmatprep.subr.bf16.mxu1 %v13389_v53 }
 0x85f   :  { %7308 = vmatpush1.bf16.msra.mxu0 %v13390_v62  ;;  %7349 = vmatpush1.bf16.msra.mxu1 %v13391_v0 }
 0x860   :  { %7309 = vmatprep.subr.bf16.mxu0 %v13392_v6  ;;  %7350 = vmatprep.subr.bf16.mxu1 %v13393_v63 }
 0x863   :  { %7310 = vmatpush1.bf16.msra.mxu0 %v13394_v21  ;;  %7351 = vmatpush1.bf16.msra.mxu1 %v13395_v20 }
 0x864   :  { %7311 = vmatprep.subr.bf16.mxu0 %v13396_v7  ;;  %7352 = vmatprep.subr.bf16.mxu1 %v13397_v24 }
 0x867   :  { %7312 = vmatpush1.bf16.msra.mxu0 %v13398_v26  ;;  %7353 = vmatpush1.bf16.msra.mxu1 %v13399_v27 }
 0x868   :  { %7604 = vmatprep.subr.bf16.mxu0 %v13400_v28  ;;  %7645 = vmatprep.subr.bf16.mxu1 %v13401_v56 }
 0x8dd   :  { %v6429_v15 = vpop.f32.mrb[92].mxu0  ;;  %v6470_v30 = vpop.f32.mrb[92].mxu1 }
 0x8de   :  { %v6431_v16 = vpop.f32.mrb[93].mxu0  ;;  %v6472_v23 = vpop.f32.mrb[93].mxu1 }
 0x8df   :  { %v6433_v10 = vpop.f32.mrb[94].mxu0  ;;  %v6474_v32 = vpop.f32.mrb[94].mxu1 }
 0x8e0   :  { %v6434_v57 = vpop.f32.mrb[95].mxu0  ;;  %v6475_v41 = vpop.f32.mrb[95].mxu1  ;;  %v13403_v10 = vld [vmem:[#allocation37_spill] sm:$0xff] }
 0x8fd   :  { %v6736_v51 = vpop.f32.mrb[96].mxu0  ;;  %v6777_v54 = vpop.f32.mrb[96].mxu1 }
 0x8fe   :  { %v6737_v34 = vadd.f32 %v6736_v51, %v6429_v15  ;;  %v6778_v18 = vadd.f32 %v6777_v54, %v6470_v30  ;;  %v6738_v33 = vpop.f32.mrb[97].mxu0  ;;  %v6779_v42 = vpop.f32.mrb[97].mxu1  ;;  %v13404_v54 = vld [vmem:[#allocation38_spill] sm:$0xff] }
 0x8ff   :  { %v6739_v35 = vadd.f32 %v6738_v33, %v6431_v16  ;;  %v6780_v12 = vadd.f32 %v6779_v42, %v6472_v23  ;;  %v6740_v2 = vpop.f32.mrb[98].mxu0  ;;  %v6781_v43 = vpop.f32.mrb[98].mxu1  ;;  %v13402_v16 = vld [vmem:[#allocation36_spill] sm:$0xff] }
 0x900   :  { %v6784_v5 = vadd.f32 %v6737_v34, %v10541_v25  ;;  %v6741_v45 = vpop.f32.mrb[99].mxu0  ;;  %v6782_v60 = vpop.f32.mrb[99].mxu1  ;;  %v6786_v62 = vadd.f32 %v6778_v18, %v10556_v17  ;;  %v13405_v18 = vld [vmem:[#allocation39_spill] sm:$0xff] }
 0x901   :  { %v6785_v19 = vadd.f32 %v6739_v35, %v10545_v29  ;;  %v6787_v39 = vadd.f32 %v6780_v12, %v10551_v47 }
 0x902   :  { %v8554_v58 = vmul.f32 -1.442695, %v6784_v5  ;;  %v1402_v5 = vpop.xlane.xlu0 %1401 }
 0x903   :  { %v8555_v11 = vmul.f32 -1.442695, %v6785_v19  ;;  %v8556_v53 = vmul.f32 -1.442695, %v6787_v39  ;;  %v1403_v45 = vmul.f32 0.03125, %v1402_v5  ;;  %v3206_v19 = vpop.xlane.xlu1 %3205 }
 0x904   :  { %9540 = vpow2.f32 %v8554_v58 }
 0x905   :  { %9542 = vpow2.f32 %v8555_v11 }
 0x906   :  { %9544 = vpow2.f32 %v8556_v53  ;;  %v12783_v60 = vpop.xlane.xlu0 %2303 }
 0x907   :  { %9546 = vtanh.f32 %v6786_v62  ;;  %v13406_v62 = vld [vmem:[#allocation40_spill] sm:$0xff] }
 0x90e   :  { %v9541_v0 = vpop.eup %9540 }
 0x90f   :  { %v9543_v6 = vpop.eup %9542  ;;  %v6791_v63 = vadd.f32 1.0, %v9541_v0  ;;  %v1404_v0 = vsub.f32 %v13406_v62, %v1403_v45 }
 0x910   :  { %v6797_v21 = vadd.f32 1.0, %v9543_v6  ;;  %v9545_v20 = vpop.eup %9544  ;;  %v3207_v6 = vmul.f32 0.03125, %v3206_v19 }
 0x911   :  { %9548 = vrcp.f32 %v6791_v63  ;;  %v9547_v7 = vpop.eup %9546  ;;  %v6804_v28 = vadd.f32 1.0, %v9545_v20  ;;  %v5010_v20 = vpop.xlane.xlu0 %5009 }
 0x912   :  { %9550 = vrcp.f32 %v6797_v21 }
 0x913   :  { %9552 = vrcp.f32 %v6804_v28  ;;  %v13407_v28 = vld [vmem:[#allocation4_spill] sm:$0xff] }
 0x91b   :  { %v9549_v24 = vpop.eup %9548 }
 0x91c   :  { %v9551_v26 = vpop.eup %9550  ;;  %v6808_v27 = vmul.f32 %v9549_v24, %v9547_v7 }
 0x91d   :  { %v6807_v56 = vmul.f32 %v9551_v26, %v12504_v44  ;;  %v7056_v15 = vpop.f32.mrb[100].mxu0  ;;  %v7097_v30 = vpop.f32.mrb[100].mxu1 }
 0x91e   :  { %v7383_v23 = vadd.f32 %v7056_v15, %v13402_v16  ;;  %v7385_v32 = vadd.f32 %v7097_v30, %v13403_v10  ;;  %v7058_v57 = vpop.f32.mrb[101].mxu0  ;;  %v7099_v41 = vpop.f32.mrb[101].mxu1  ;;  %v5011_v15 = vmul.f32 0.03125, %v5010_v20  ;;  %v12794_v30 = vmul.f32 %v10567_v38, %v1404_v0  ;;  %v13408_v16 = vld [vmem:[#allocation68_spill] sm:$0xff] }
 0x91f   :  { %v12778_v51 = vadd.f32 %v6808_v27, %v6807_v56  ;;  %v7384_v34 = vadd.f32 %v7058_v57, %v13404_v54  ;;  %v7386_v33 = vadd.f32 %v7099_v41, %v13405_v18  ;;  %v7060_v42 = vpop.f32.mrb[102].mxu0  ;;  %v7101_v35 = vpop.f32.mrb[102].mxu1  ;;  %v3208_v56 = vsub.f32 %v13407_v28, %v3207_v6  ;;  %v13409_v41 = vld [vmem:[#allocation58_spill] sm:$0xff]  ;;  %v13411_v18 = vld [vmem:[#allocation60_spill] sm:$0xff] }
 0x920   :  { %v8622_v12 = vmul.f32 -1.442695, %v7383_v23  ;;  %v7061_v2 = vpop.f32.mrb[103].mxu0  ;;  %v7102_v44 = vpop.f32.mrb[103].mxu1  ;;  %v5012_v23 = vsub.f32 %v13408_v16, %v5011_v15  ;;  %v1406_v10 = vmul.f32 %v12794_v30, %v12794_v30  ;;  %v13418_v42 = vld [vmem:[#allocation23_spill] sm:$0xff]  ;;  %v13419_v35 = vld [vmem:[#allocation17_spill] sm:$0xff] }
 0x921   :  { %9554 = vtanh.f32 %v12778_v51  ;;  %v8623_v43 = vmul.f32 -1.442695, %v7384_v34  ;;  %v8624_v58 = vmul.f32 -1.442695, %v7386_v33  ;;  %v9553_v11 = vpop.eup %9552  ;;  %v13415_v33 = vld [vmem:[#allocation30_spill] sm:$0xff] }
 0x922   :  { %9556 = vpow2.f32 %v8622_v12  ;;  %v13420_v12 = vld [vmem:[#allocation18_spill] sm:$0xff] }
 0x923   :  { %9558 = vpow2.f32 %v8623_v43 }
 0x924   :  { %9560 = vpow2.f32 %v8624_v58 }
 0x925   :  { %9562 = vtanh.f32 %v7385_v32  ;;  %v12805_v32 = vmul.f32 %v10567_v38, %v3208_v56 }
 0x92b   :  { %v9555_v39 = vpop.eup %9554 }
 0x92c   :  { %v9557_v53 = vpop.eup %9556  ;;  %v12786_v63 = vmul.f32 %v9555_v39, %v9553_v11 }
 0x92d   :  { %v9559_v21 = vpop.eup %9558  ;;  %v7390_v7 = vadd.f32 1.0, %v9557_v53 }
 0x92e   :  { %v7396_v24 = vadd.f32 1.0, %v9559_v21  ;;  %v7104_v26 = vpack.c.bf16 %v12786_v63, %v12786_v63  ;;  %v6812_v27 = vmul.f32 %v10567_v38, %v12786_v63 }
 0x92f   :  { %9564 = vrcp.f32 %v7390_v7 }
 0x930   :  { %9566 = vrcp.f32 %v7396_v24  ;;  %7330 = vmatmul.mubr.bf16.vlgmr.msra.gmra.mrb[104].mxu0 %v7104_v26  ;;  %7371 = vmatmul.mubr.bf16.vlgmr.msra.gmra.mrb[104].mxu1 %v7104_v26 }
 0x931   :  { %7605 = vmatpush1.bf16.msra.mxu0 %v12514_v36  ;;  %7646 = vmatpush1.bf16.msra.mxu1 %v12519_v55  ;;  %v9561_v36 = vpop.eup %9560 }
 0x932   :  { %6813 = vadd.xlane.f32.xlu0 %v6812_v27  ;;  %7606 = vmatprep.subr.bf16.mxu0 %v12528_v3  ;;  %v9563_v55 = vpop.eup %9562  ;;  %v3210_v3 = vmul.f32 %v12805_v32, %v12805_v32  ;;  %v7403_v54 = vadd.f32 1.0, %v9561_v36 }
 0x933   :  { %7647 = vmatprep.subr.bf16.mxu1 %v12533_v48  ;;  %7636 = vmatprep.mubr.bf16.mxu0 %v13106_v14  ;;  %v12815_v48 = vmul.f32 %v10567_v38, %v5012_v23 }
 0x934   :  { %7677 = vmatprep.mubr.bf16.mxu1 %v13106_v14  ;;  %v13410_v14 = vld [vmem:[#allocation59_spill] sm:$0xff]  ;;  %9568 = vrcp.f32 %v7403_v54 }
 0x935   :  { %7607 = vmatpush1.bf16.msra.mxu0 %v12540_v61  ;;  %7648 = vmatpush1.bf16.msra.mxu1 %v12545_v9 }
 0x936   :  { %1407 = vadd.xlane.f32.xlu0 %v1406_v10  ;;  %7608 = vmatprep.subr.bf16.mxu0 %v12551_v59 }
 0x937   :  { %7649 = vmatprep.subr.bf16.mxu1 %v12556_v49  ;;  %v5014_v49 = vmul.f32 %v12815_v48, %v12815_v48 }
 0x939   :  { %v9565_v57 = vpop.eup %9564  ;;  %7609 = vmatpush1.bf16.msra.mxu0 %v13409_v41  ;;  %7650 = vmatpush1.bf16.msra.mxu1 %v13410_v14 }
 0x93a   :  { %v9567_v61 = vpop.eup %9566  ;;  %v7407_v9 = vmul.f32 %v9565_v57, %v9563_v55  ;;  %3211 = vadd.xlane.f32.xlu0 %v3210_v3  ;;  %7610 = vmatprep.subr.bf16.mxu0 %v12578_v46  ;;  %v13413_v46 = vld [vmem:[#allocation28_spill] sm:$0xff] }
 0x93b   :  { %v7406_v59 = vmul.f32 %v9567_v61, %v12610_v31  ;;  %7651 = vmatprep.subr.bf16.mxu1 %v12583_v1  ;;  %v13412_v31 = vld [vmem:[#allocation20_spill] sm:$0xff]  ;;  %v13414_v1 = vld [vmem:[#allocation29_spill] sm:$0xff] }
 0x93d   :  { %v7408_v34 = vadd.f32 %v7407_v9, %v7406_v59  ;;  %7611 = vmatpush1.bf16.msra.mxu0 %v12590_v4  ;;  %7652 = vmatpush1.bf16.msra.mxu1 %v12595_v8  ;;  %v13416_v4 = vld [vmem:[#allocation31_spill] sm:$0xff]  ;;  %v13417_v8 = vld [vmem:[#allocation22_spill] sm:$0xff] }
 0x93e   :  { %5015 = vadd.xlane.f32.xlu0 %v5014_v49  ;;  %7612 = vmatprep.subr.bf16.mxu0 %v13411_v18  ;;  %v9569_v2 = vpop.eup %9568 }
 0x93f   :  { %9570 = vtanh.f32 %v7408_v34  ;;  %7781 = vst [vmem:[%s12908_s11] sm:$0xff] %v7408_v34  ;;  %7653 = vmatprep.subr.bf16.mxu1 %v13412_v31  ;;  %v4108_v31 = vpop.xlane.xlu1 %4107 }
 0x941   :  { %7613 = vmatpush1.bf16.msra.mxu0 %v13413_v46  ;;  %7654 = vmatpush1.bf16.msra.mxu1 %v13414_v1  ;;  %v13421_v1 = vld [vmem:[#allocation16_spill] sm:$0xff] }
 0x942   :  { %7614 = vmatprep.subr.bf16.mxu0 %v13415_v33  ;;  %7655 = vmatprep.subr.bf16.mxu1 %v13416_v4  ;;  %v4109_v4 = vmul.f32 0.03125, %v4108_v31 }
 0x945   :  { %7615 = vmatpush1.bf16.msra.mxu0 %v13417_v8  ;;  %7656 = vmatpush1.bf16.msra.mxu1 %v13418_v42  ;;  %v5912_v42 = vpop.xlane.xlu1 %5911 }
 0x946   :  { %7616 = vmatprep.subr.bf16.mxu0 %v13419_v35  ;;  %7657 = vmatprep.subr.bf16.mxu1 %v13420_v12  ;;  %v13422_v12 = vld [vmem:[#allocation21_spill] sm:$0xff] }
 0x949   :  { %v9571_v44 = vpop.eup %9570  ;;  %7617 = vmatpush1.bf16.msra.mxu0 %v12666_v50  ;;  %7658 = vmatpush1.bf16.msra.mxu1 %v12671_v22 }
 0x94a   :  { %7618 = vmatprep.subr.bf16.mxu0 %v12678_v37  ;;  %7659 = vmatprep.subr.bf16.mxu1 %v12683_v40  ;;  %v7410_v43 = vmul.f32 %v9571_v44, %v9569_v2  ;;  %v4110_v2 = vsub.f32 %v13422_v12, %v4109_v4 }
 0x94c   :  { %v7411_v5 = vpack.c.bf16 %v7410_v43, %v7410_v43  ;;  %7780 = vst [vmem:[%s12909_s10] sm:$0xff] %v7410_v43 }
 0x94d   :  { %7619 = vmatpush1.bf16.msra.mxu0 %v12690_v13  ;;  %7660 = vmatpush1.bf16.msra.mxu1 %v12695_v52 }
 0x950   :  { %7637 = vmatmul.mubr.bf16.vlgmr.msra.gmra.mrb[108].mxu0 %v7411_v5  ;;  %7678 = vmatmul.mubr.bf16.vlgmr.msra.gmra.mrb[108].mxu1 %v7411_v5 }
 0x9bf   :  { %v6814_v45 = vpop.xlane.xlu0 %6813 }
 0x9c0   :  { %v6815_v50 = vmul.f32 0.03125, %v6814_v45 }
 0x9c2   :  { %v6816_v22 = vsub.f32 %v12786_v63, %v6815_v50  ;;  %v4111_v50 = vmul.f32 %v10567_v38, %v4110_v2 }
 0x9c4   :  { %v12850_v37 = vmul.f32 %v10567_v38, %v6816_v22  ;;  %v4112_v22 = vmul.f32 %v4111_v50, %v4111_v50 }
 0x9c6   :  { %v6818_v40 = vmul.f32 %v12850_v37, %v12850_v37 }
 0x9c8   :  { %6819 = vadd.xlane.f32.xlu0 %v6818_v40 }
 0xa03   :  { %v7331_v19 = vpop.f32.mrb[104].mxu0  ;;  %v7372_v58 = vpop.f32.mrb[104].mxu1 }
 0xa04   :  { %v7333_v11 = vpop.f32.mrb[105].mxu0  ;;  %v7374_v39 = vpop.f32.mrb[105].mxu1 }
 0xa05   :  { %v7335_v13 = vpop.f32.mrb[106].mxu0  ;;  %v7376_v53 = vpop.f32.mrb[106].mxu1 }
 0xa06   :  { %v7336_v52 = vpop.f32.mrb[107].mxu0  ;;  %v7377_v62 = vpop.f32.mrb[107].mxu1 }
 0xa23   :  { %v7638_v0 = vpop.f32.mrb[108].mxu0  ;;  %v7679_v6 = vpop.f32.mrb[108].mxu1 }
 0xa24   :  { %v7639_v21 = vadd.f32 %v7638_v0, %v7331_v19  ;;  %v7680_v20 = vadd.f32 %v7679_v6, %v7372_v58  ;;  %v7640_v63 = vpop.f32.mrb[109].mxu0  ;;  %v7681_v7 = vpop.f32.mrb[109].mxu1 }
 0xa25   :  { %v7641_v24 = vadd.f32 %v7640_v63, %v7333_v11  ;;  %v7682_v26 = vadd.f32 %v7681_v7, %v7374_v39  ;;  %v7642_v27 = vpop.f32.mrb[110].mxu0  ;;  %v7683_v28 = vpop.f32.mrb[110].mxu1 }
 0xa26   :  { %v7686_v56 = vadd.f32 %v7639_v21, %v10541_v25  ;;  %v7643_v15 = vpop.f32.mrb[111].mxu0  ;;  %v7684_v16 = vpop.f32.mrb[111].mxu1  ;;  %v7688_v57 = vadd.f32 %v7680_v20, %v10556_v17  ;;  %v2305_v17 = vmul.f32 0.03125, %v12783_v60  ;;  %v13423_v60 = vld [vmem:[#allocation57_spill] sm:$0xff] }
 0xa27   :  { %v7687_v23 = vadd.f32 %v7641_v24, %v10545_v29  ;;  %v7689_v55 = vadd.f32 %v7682_v26, %v10551_v47  ;;  %v1408_v58 = vpop.xlane.xlu0 %1407 }
 0xa28   :  { %v8657_v10 = vmul.f32 -1.442695, %v7686_v56  ;;  %v2306_v33 = vsub.f32 %v13421_v1, %v2305_v17  ;;  %v1409_v39 = vmul.f32 0.03125, %v1408_v58 }
 0xa29   :  { %v8658_v36 = vmul.f32 -1.442695, %v7687_v23  ;;  %v8659_v3 = vmul.f32 -1.442695, %v7689_v55 }
 0xa2a   :  { %9572 = vpow2.f32 %v8657_v10  ;;  %v2307_v43 = vmul.f32 %v10567_v38, %v2306_v33  ;;  %v1410_v13 = vadd.f32 1e-05, %v1409_v39 }
 0xa2b   :  { %9574 = vpow2.f32 %v8658_v36  ;;  %v3212_v11 = vpop.xlane.xlu0 %3211 }
 0xa2c   :  { %9576 = vpow2.f32 %v8659_v3  ;;  %v2308_v45 = vmul.f32 %v2307_v43, %v2307_v43  ;;  %v3213_v53 = vmul.f32 0.03125, %v3212_v11 }
 0xa2d   :  { %9578 = vtanh.f32 %v7688_v57 }
 0xa2e   :  { %v3214_v6 = vadd.f32 1e-05, %v3213_v53 }
 0xa2f   :  { %v5016_v52 = vpop.xlane.xlu0 %5015 }
 0xa30   :  { %v5017_v62 = vmul.f32 0.03125, %v5016_v52 }
 0xa32   :  { %v5018_v63 = vadd.f32 1e-05, %v5017_v62 }
 0xa34   :  { %v9573_v41 = vpop.eup %9572 }
 0xa35   :  { %v9575_v14 = vpop.eup %9574  ;;  %v7693_v61 = vadd.f32 1.0, %v9573_v41 }
 0xa36   :  { %v7699_v9 = vadd.f32 1.0, %v9575_v14  ;;  %v9577_v25 = vpop.eup %9576 }
 0xa37   :  { %9580 = vrcp.f32 %v7693_v61  ;;  %v9579_v54 = vpop.eup %9578  ;;  %v7706_v34 = vadd.f32 1.0, %v9577_v25  ;;  %v7833_v61 = vld [vmem:[%s12911_s8] ss:$0 sm:$0xff] }
 0xa38   :  { %9582 = vrcp.f32 %v7699_v9 }
 0xa39   :  { %9584 = vrcp.f32 %v7706_v34 }
 0xa41   :  { %v9581_v29 = vpop.eup %9580 }
 0xa42   :  { %v9583_v59 = vpop.eup %9582  ;;  %v7710_v49 = vmul.f32 %v9581_v29, %v9579_v54 }
 0xa43   :  { %v7709_v18 = vmul.f32 %v9583_v59, %v12778_v51  ;;  %v9585_v46 = vpop.eup %9584  ;;  %v5913_v51 = vmul.f32 0.03125, %v5912_v42 }
 0xa45   :  { %v7711_v47 = vadd.f32 %v7710_v49, %v7709_v18  ;;  %v5914_v5 = vsub.f32 %v13423_v60, %v5913_v51 }
 0xa47   :  { %9586 = vtanh.f32 %v7711_v47  ;;  %8670 = vst [vmem:[%s12908_s11 + $0x8] sm:$0xff] %v7711_v47  ;;  %v5915_v40 = vmul.f32 %v10567_v38, %v5914_v5 }
 0xa48   :  { %9588 = vrsqrt.f32 %v1410_v13 }
 0xa49   :  { %v5916_v19 = vmul.f32 %v5915_v40, %v5915_v40  ;;  %9590 = vrsqrt.f32 %v3214_v6 }
 0xa4a   :  { %9592 = vrsqrt.f32 %v5018_v63 }
 0xa51   :  { %v9587_v8 = vpop.eup %9586 }
 0xa52   :  { %v7713_v35 = vmul.f32 %v9587_v8, %v9585_v46  ;;  %v9589_v16 = vpop.eup %9588 }
 0xa53   :  { %v1412_v36 = vmul.f32 %v9589_v16, %v12794_v30  ;;  %v9591_v3 = vpop.eup %9590 }
 0xa54   :  { %v7714_v44 = vmul.f32 %v10567_v38, %v7713_v35  ;;  %8669 = vst [vmem:[%s12909_s10 + $0x8] sm:$0xff] %v7713_v35  ;;  %v9593_v14 = vpop.eup %9592  ;;  %v3216_v9 = vmul.f32 %v9591_v3, %v12805_v32 }
 0xa55   :  { %v5020_v59 = vmul.f32 %v9593_v14, %v12815_v48 }
 0xa56   :  { %7715 = vadd.xlane.f32.xlu1 %v7714_v44 }
 0xa5a   :  { %2309 = vadd.xlane.f32.xlu1 %v2308_v45  ;;  %v6820_v45 = vpop.xlane.xlu0 %6819 }
 0xa5e   :  { %4113 = vadd.xlane.f32.xlu1 %v4112_v22 }
 0xa62   :  { %5917 = vadd.xlane.f32.xlu1 %v5916_v19 }
 0xae3   :  { %v7716_v0 = vpop.xlane.xlu1 %7715 }
 0xae4   :  { %v7717_v21 = vmul.f32 0.03125, %v7716_v0 }
 0xae6   :  { %v7718_v20 = vsub.f32 %v7713_v35, %v7717_v21 }
 0xae7   :  { %v2310_v7 = vpop.xlane.xlu1 %2309 }
 0xae8   :  { %v2311_v24 = vmul.f32 0.03125, %v2310_v7  ;;  %v12874_v26 = vmul.f32 %v10567_v38, %v7718_v20  ;;  %v7832_v38 = vld [vmem:[%s12910_s7] ss:$0 sm:$0xff] }
 0xae9   :  { %v1413_v41 = vmul.f32 %v7832_v38, %v1412_v36  ;;  %v3217_v29 = vmul.f32 %v7832_v38, %v3216_v9  ;;  %v5021_v46 = vmul.f32 %v7832_v38, %v5020_v59 }
 0xaea   :  { %v2312_v27 = vadd.f32 1e-05, %v2311_v24  ;;  %v7720_v28 = vmul.f32 %v12874_v26, %v12874_v26 }
 0xaeb   :  { %v4114_v56 = vpop.xlane.xlu1 %4113  ;;  %v1414_v30 = vadd.f32 %v7833_v61, %v1413_v41  ;;  %v3218_v31 = vadd.f32 %v7833_v61, %v3217_v29  ;;  %v5022_v12 = vadd.f32 %v7833_v61, %v5021_v46 }
 0xaec   :  { %9594 = vrsqrt.f32 %v2312_v27  ;;  %v4115_v15 = vmul.f32 0.03125, %v4114_v56  ;;  %7721 = vadd.xlane.f32.xlu1 %v7720_v28 }
 0xaed   :  { %v7939_v17 = vclamps-f32 %v1414_v30, 100.0  ;;  %v8145_v32 = vclamps-f32 %v3218_v31, 100.0 }
 0xaee   :  { %v4116_v23 = vadd.f32 1e-05, %v4115_v15 }
 0xaef   :  { %v5918_v10 = vpop.xlane.xlu1 %5917 }
 0xaf0   :  { %9596 = vrsqrt.f32 %v4116_v23  ;;  %v5919_v55 = vmul.f32 0.03125, %v5918_v10 }
 0xaf2   :  { %v5920_v57 = vadd.f32 1e-05, %v5919_v55 }
 0xaf4   :  { %9598 = vrsqrt.f32 %v5920_v57 }
 0xaf6   :  { %v9595_v25 = vpop.eup %9594 }
 0xaf7   :  { %v2314_v54 = vmul.f32 %v9595_v25, %v2307_v43  ;;  %v8351_v43 = vclamps-f32 %v5022_v12, 100.0 }
 0xaf9   :  { %v2315_v49 = vmul.f32 %v7832_v38, %v2314_v54 }
 0xafa   :  { %v9597_v34 = vpop.eup %9596 }
 0xafb   :  { %v2316_v18 = vadd.f32 %v7833_v61, %v2315_v49  ;;  %v4118_v47 = vmul.f32 %v9597_v34, %v4111_v50  ;;  %v6821_v50 = vmul.f32 0.03125, %v6820_v45 }
 0xafd   :  { %v8042_v1 = vclamps-f32 %v2316_v18, 100.0  ;;  %v4119_v33 = vmul.f32 %v7832_v38, %v4118_v47  ;;  %v6822_v22 = vadd.f32 1e-05, %v6821_v50 }
 0xafe   :  { %v9599_v4 = vpop.eup %9598 }
 0xaff   :  { %v8682_v8 = vpack.c.bf16 %v8042_v1, %v7939_v17  ;;  %v4120_v42 = vadd.f32 %v7833_v61, %v4119_v33  ;;  %v5922_v35 = vmul.f32 %v9599_v4, %v5915_v40  ;;  %9600 = vrsqrt.f32 %v6822_v22 }
 0xb01   :  { %8683 = vst [vmem:[%s12912_s9] sm:$0xff] %v8682_v8   ;;  %v8248_v48 = vclamps-f32 %v4120_v42, 100.0  ;;  %v5923_v2 = vmul.f32 %v7832_v38, %v5922_v35 }
 0xb03   :  { %v8687_v51 = vpack.c.bf16 %v8248_v48, %v8145_v32  ;;  %v5924_v44 = vadd.f32 %v7833_v61, %v5923_v2 }
 0xb05   :  { %8699 = vst [vmem:[%s12912_s9 + $0x8] sm:$0xff] %v8687_v51   ;;  %v8454_v60 = vclamps-f32 %v5924_v44, 100.0 }
 0xb07   :  { %v8692_v5 = vpack.c.bf16 %v8454_v60, %v8351_v43 }
 0xb09   :  { %8700 = vst [vmem:[%s12912_s9 + $0x10] sm:$0xff] %v8692_v5   ;;  %v9601_v11 = vpop.eup %9600 }
 0xb0a   :  { %v6824_v39 = vmul.f32 %v9601_v11, %v12850_v37 }
 0xb0c   :  { %v6825_v13 = vmul.f32 %v7832_v38, %v6824_v39 }
 0xb0e   :  { %v6826_v62 = vadd.f32 %v7833_v61, %v6825_v13 }
 0xb10   :  { %v8557_v21 = vclamps-f32 %v6826_v62, 100.0 }
 0xb79   :  { %v7722_v40 = vpop.xlane.xlu1 %7721 }
 0xb7a   :  { %v7723_v19 = vmul.f32 0.03125, %v7722_v40 }
 0xb7c   :  { %v7724_v58 = vadd.f32 1e-05, %v7723_v19 }
 0xb7e   :  { %9602 = vrsqrt.f32 %v7724_v58 }
 0xb88   :  { %v9603_v53 = vpop.eup %9602 }
 0xb89   :  { %v7726_v52 = vmul.f32 %v9603_v53, %v12874_v26 }
 0xb8b   :  { %v7727_v0 = vmul.f32 %v7832_v38, %v7726_v52 }
 0xb8d   :  { %v7728_v6 = vadd.f32 %v7833_v61, %v7727_v0 }
 0xb8f   :  { %v8660_v20 = vclamps-f32 %v7728_v6, 100.0 }
 0xb91   :  { %v8697_v63 = vpack.c.bf16 %v8660_v20, %v8557_v21 }
 0xb93   :  { %8701 = vst [vmem:[%s12912_s9 + $0x18] sm:$0xff] %v8697_v63  }

</bundles_post_ra>
